<compile_context>
chip_gen: v5e
topology: v5e:2x2
jax: 0.10.0
libtpu: 0.0.40
codegen_flags: <defaults>
</compile_context>

<pallas_src>
import functools

import jax
import jax.numpy as jnp
from jax.experimental import pallas as pl
from jax.experimental.pallas import tpu as pltpu


class Config:
  prefix_length = 4      # P
  prefix_dim = 16        # CLIP embedding size C
  seq_len = 8            # caption tokens S
  n_embd = 32            # gpt_embedding_size D
  n_head = 4
  n_layer = 2
  vocab = 128


# ----------------------------------------------------------------------------
# Parameters (deterministic synthetic "GPT-2" + Mapping_Network)
# ----------------------------------------------------------------------------

def init_params(key, cfg):
  D, V, P, C = cfg.n_embd, cfg.vocab, cfg.prefix_length, cfg.prefix_dim
  T = P + cfg.seq_len
  Hm = (D * P) // 2  # mapping-network hidden width (ClipCap-style MLP)
  keys = jax.random.split(key, 8 + 6 * cfg.n_layer)
  ki = iter(keys)
  s = 0.02

  p = {
      "wte": jax.random.normal(next(ki), (V, D), jnp.float32) * s,
      "wpe": jax.random.normal(next(ki), (T, D), jnp.float32) * s,
      "lnf_g": jnp.ones((D,), jnp.float32),
      "lnf_b": jnp.zeros((D,), jnp.float32),
      # Mapping_Network: Linear(C, Hm) -> Tanh -> Linear(Hm, P*D)
      "map_w1": jax.random.normal(next(ki), (C, Hm), jnp.float32) * s,
      "map_b1": jnp.zeros((1, Hm), jnp.float32),
      "map_w2": jax.random.normal(next(ki), (Hm, P * D), jnp.float32) * s,
      "map_b2": jnp.zeros((1, P * D), jnp.float32),
      "layers": [],
  }
  for _ in range(cfg.n_layer):
    p["layers"].append({
        "ln1_g": jnp.ones((D,), jnp.float32),
        "ln1_b": jnp.zeros((D,), jnp.float32),
        "attn_w": jax.random.normal(next(ki), (D, 3 * D), jnp.float32) * s,
        "attn_b": jnp.zeros((1, 3 * D), jnp.float32),
        "proj_w": jax.random.normal(next(ki), (D, D), jnp.float32) * s,
        "proj_b": jnp.zeros((1, D), jnp.float32),
        "ln2_g": jnp.ones((D,), jnp.float32),
        "ln2_b": jnp.zeros((D,), jnp.float32),
        "fc_w": jax.random.normal(next(ki), (D, 4 * D), jnp.float32) * s,
        "fc_b": jnp.zeros((1, 4 * D), jnp.float32),
        "fcp_w": jax.random.normal(next(ki), (4 * D, D), jnp.float32) * s,
        "fcp_b": jnp.zeros((1, D), jnp.float32),
    })
  return p


def prepare_params(params, cfg):
  """One-time host-side weight prep (hoisted out of the forward):
     * stack per-layer tensors and cast MXU weight operands to bf16
     * fold 1/sqrt(hd) into the q columns of attn_w / attn_b
     * fold wpe[:P] into the mapping-network output bias
     * keep an f32 wte for the embedding gather and a bf16 (D, V) transposed
       copy for the in-kernel LM head (no in-kernel transposed contraction)."""
  D, P, L = cfg.n_embd, cfg.prefix_length, cfg.n_layer
  S = cfg.seq_len
  T = P + S
  hd = D // cfg.n_head
  Hm = params["map_w2"].shape[0]
  scale = 1.0 / float(hd) ** 0.5

  def stack(name):
    return jnp.stack([lyr[name] for lyr in params["layers"]])

  attn_w = stack("attn_w")                                   # (L, D, 3D)
  attn_b = stack("attn_b")                                   # (L, 1, 3D)
  qscale = jnp.concatenate([jnp.full((D,), scale, jnp.float32),
                            jnp.ones((2 * D,), jnp.float32)])
  attn_w = attn_w * qscale[None, None, :]
  attn_b = attn_b * qscale[None, None, :]

  wpe = params["wpe"]                                        # (T, D)
  map_b2 = params["map_b2"].reshape(P, 1, D) + wpe[:P].reshape(P, 1, D)

  return {
      "wte": params["wte"],                                            # (V, D) f32 (gather)
      "wte_t": params["wte"].T.astype(jnp.bfloat16),                   # (D, V) bf16 (LM head)
      "wpe_cap": wpe[P:T],                                             # (S, D) caption positions
      "lnf_g": params["lnf_g"].reshape(1, D),
      "lnf_b": params["lnf_b"].reshape(1, D),
      "map_w1": params["map_w1"].astype(jnp.bfloat16),                 # (C, Hm)
      "map_b1": params["map_b1"],                                      # (1, Hm)
      "map_w2": params["map_w2"].reshape(Hm, P, D).transpose(1, 0, 2)
                                .astype(jnp.bfloat16),                 # (P, Hm, D)
      "map_b2": map_b2,                                                # (P, 1, D) + wpe[:P]
      "ln1_g": stack("ln1_g").reshape(L, 1, D),
      "ln1_b": stack("ln1_b").reshape(L, 1, D),
      "attn_w": attn_w.astype(jnp.bfloat16),                           # (L, D, 3D), q scaled
      "attn_b": attn_b,                                                # (L, 1, 3D), q scaled
      "proj_w": stack("proj_w").astype(jnp.bfloat16),                  # (L, D, D)
      "proj_b": stack("proj_b"),                                       # (L, 1, D)
      "ln2_g": stack("ln2_g").reshape(L, 1, D),
      "ln2_b": stack("ln2_b").reshape(L, 1, D),
      "fc_w": stack("fc_w").astype(jnp.bfloat16),                      # (L, D, 4D)
      "fc_b": stack("fc_b"),                                           # (L, 1, 4D)
      "fcp_w": stack("fcp_w").astype(jnp.bfloat16),                    # (L, 4D, D)
      "fcp_b": stack("fcp_b"),                                         # (L, 1, D)
  }


# ----------------------------------------------------------------------------
# Fused forward kernel: one grid step == full forward for one batch block
# ----------------------------------------------------------------------------

def _fused_caption_kernel(
    # inputs
    prefix_ref, cap_ref, mask_ref,
    wpe_cap_ref, map_w1_ref, map_b1_ref, map_w2_ref, map_b2_ref,
    ln1_g_ref, ln1_b_ref, attn_w_ref, attn_b_ref,
    proj_w_ref, proj_b_ref, ln2_g_ref, ln2_b_ref,
    fc_w_ref, fc_b_ref, fcp_w_ref, fcp_b_ref,
    lnf_g_ref, lnf_b_ref, wte_t_ref,
    # output
    logits_ref,
    # scratch
    hid_ref, qkv_ref, ctx_ref,
    *, n_layer, n_head, prefix_length):
  Bblk, S, D = cap_ref.shape
  P = prefix_length
  T = P + S
  H = n_head
  hd = D // H

  def ln(x, g, b):  # f32 LayerNorm
    mu = jnp.mean(x, axis=-1, keepdims=True)
    xc = x - mu
    var = jnp.mean(xc * xc, axis=-1, keepdims=True)
    return xc * jax.lax.rsqrt(var + 1e-5) * g + b

  def mm(a, b):  # 2-D a @ b : bf16 MXU inputs, f32 accumulation
    return jnp.dot(a.astype(jnp.bfloat16), b.astype(jnp.bfloat16),
                   preferred_element_type=jnp.float32)

  def bmm(pattern, a, b):  # batched (leading batch dim) matmul on the MXU
    return jnp.einsum(pattern, a.astype(jnp.bfloat16), b.astype(jnp.bfloat16),
                      preferred_element_type=jnp.float32)

  def gelu_new(x):  # GPT-2 "gelu_new", f32
    return 0.5 * x * (1.0 + jnp.tanh(
        0.7978845608028654 * (x + 0.044715 * x * x * x)))

  # ---- assemble hidden = [Mapping_Network(prefix); wte(tokens)] + wpe
  #      as a flat (Bblk*T, D) slab so all weight matmuls see M = Bblk*T.
  for b in range(Bblk):
    hid_ref[b * T + P:(b + 1) * T, :] = cap_ref[b] + wpe_cap_ref[...]    # (S, D)
  # Mapping_Network: Linear -> Tanh -> Linear (batched over all rows at once)
  h1 = jnp.tanh(mm(prefix_ref[...], map_w1_ref[...]) + map_b1_ref[...])  # (Bblk, Hm)
  for p in range(P):
    row = mm(h1, map_w2_ref[p]) + map_b2_ref[p]                          # (Bblk, D), wpe folded in
    for b in range(Bblk):
      hid_ref[b * T + p:b * T + p + 1, :] = row[b:b + 1, :]
  hidden = hid_ref[...]                                                  # (Bblk*T, D) f32

  # ---- causal + key-padding additive bias (built once, shared by all layers/heads)
  rows = jax.lax.broadcasted_iota(jnp.int32, (Bblk, T, T), 1)
  cols = jax.lax.broadcasted_iota(jnp.int32, (Bblk, T, T), 2)
  keep = jnp.logical_and(rows >= cols, mask_ref[...] > 0.5)              # (Bblk,1,T) broadcasts
  bias = jnp.where(keep, 0.0, -1e9).astype(jnp.float32)                  # (Bblk, T, T)

  for l in range(n_layer):
    # -------- attention block --------
    xn = ln(hidden, ln1_g_ref[l], ln1_b_ref[l])
    qkv = mm(xn, attn_w_ref[l]) + attn_b_ref[l]                          # (Bblk*T, 3D); q pre-scaled
    for b in range(Bblk):
      qkv_ref[b] = qkv[b * T:(b + 1) * T, :]                             # -> (Bblk, T, 3D) scratch
    for h in range(H):
      q = qkv_ref[:, :, h * hd:(h + 1) * hd]                             # (Bblk, T, hd)
      k = qkv_ref[:, :, D + h * hd:D + (h + 1) * hd]
      v = qkv_ref[:, :, 2 * D + h * hd:2 * D + (h + 1) * hd]
      s = bmm('bqd,bkd->bqk', q, k) + bias                               # (Bblk, T, T)
      m = jnp.max(s, axis=-1, keepdims=True)
      e = jnp.exp(s - m)
      pr = e * pl.reciprocal(jnp.sum(e, axis=-1, keepdims=True), approx=True)
      cx = bmm('bqk,bkd->bqd', pr, v)                                    # (Bblk, T, hd)
      for b in range(Bblk):
        ctx_ref[b * T:(b + 1) * T, h * hd:(h + 1) * hd] = cx[b]
    hidden = hidden + mm(ctx_ref[...], proj_w_ref[l]) + proj_b_ref[l]

    # -------- MLP block --------
    xn = ln(hidden, ln2_g_ref[l], ln2_b_ref[l])
    hm = gelu_new(mm(xn, fc_w_ref[l]) + fc_b_ref[l])                     # (Bblk*T, 4D)
    hidden = hidden + mm(hm, fcp_w_ref[l]) + fcp_b_ref[l]

  # ---- final LN + tied LM head: plain matmul against pre-transposed (D, V)
  xn = ln(hidden, lnf_g_ref[...], lnf_b_ref[...])
  logits_ref[...] = mm(xn, wte_t_ref[...])                               # (Bblk*T, V) lane-dense


# ----------------------------------------------------------------------------
# Wrapper
# ----------------------------------------------------------------------------

def caption_model_forward(fp, tokens, prefix, mask, cfg):
  B, S = tokens.shape
  C = cfg.prefix_dim
  D, V, P, H, L = cfg.n_embd, cfg.vocab, cfg.prefix_length, cfg.n_head, cfg.n_layer
  T = P + S
  hd = D // H
  Hm = fp["map_w1"].shape[1]

  # One grid step owns the whole batch at toy B; for larger even B, split into
  # exactly 2 blocks (one large step per v7x TensorCore via "parallel").
  num_blocks = 2 if (B >= 4 and B % 2 == 0) else 1
  Bblk = B // num_blocks

  # Token embedding gather from the f32 table (no one-hot matmul, no bf16 rounding).
  cap_emb = jnp.take(fp["wte"], tokens, axis=0)                 # (B, S, D) f32
  prefix2 = prefix.astype(jnp.float32)                          # (B, C)
  mask3 = mask.astype(jnp.float32).reshape(B, 1, T)             # (B, 1, T)

  def w_spec(a):  # weight: full-array block, constant index -> DMA'd once
    nd = a.ndim
    return pl.BlockSpec(a.shape, lambda i, nd=nd: (0,) * nd)

  weight_keys = ("wpe_cap", "map_w1", "map_b1", "map_w2", "map_b2",
                 "ln1_g", "ln1_b", "attn_w", "attn_b",
                 "proj_w", "proj_b", "ln2_g", "ln2_b",
                 "fc_w", "fc_b", "fcp_w", "fcp_b",
                 "lnf_g", "lnf_b", "wte_t")
  weights = [fp[k] for k in weight_keys]

  in_specs = [
      pl.BlockSpec((Bblk, C), lambda i: (i, 0)),                # prefix  -> (Bblk, C)
      pl.BlockSpec((Bblk, S, D), lambda i: (i, 0, 0)),          # cap_emb -> (Bblk, S, D)
      pl.BlockSpec((Bblk, 1, T), lambda i: (i, 0, 0)),          # mask    -> (Bblk, 1, T)
  ] + [w_spec(w) for w in weights]
  out_spec = pl.BlockSpec((Bblk * T, V), lambda i: (i, 0))      # logits  -> (Bblk*T, V)

  flops_per_b = (
      2 * C * Hm + 2 * Hm * P * D                       # Mapping_Network
      + L * (2 * T * D * 3 * D                          # qkv projection
             + 4 * H * T * T * hd                       # q@k^T and p@v
             + 2 * T * D * D                            # attention out-proj
             + 16 * T * D * D)                          # MLP
      + 2 * T * D * V)                                  # LM head
  transc_per_b = L * (H * T * T + T * 4 * D) + Hm
  bytes_accessed = (sum(int(a.size) * a.dtype.itemsize for a in weights)
                    + (int(prefix2.size) + int(cap_emb.size) + int(mask3.size)) * 4
                    + B * T * V * 4)

  kernel = functools.partial(_fused_caption_kernel,
                             n_layer=L, n_head=H, prefix_length=P)

  logits = pl.pallas_call(
      kernel,
      grid=(num_blocks,),
      in_specs=in_specs,
      out_specs=out_spec,
      out_shape=jax.ShapeDtypeStruct((B * T, V), jnp.float32),
      scratch_shapes=[pltpu.VMEM((Bblk * T, D), jnp.float32),       # hidden assembly
                      pltpu.VMEM((Bblk, T, 3 * D), jnp.float32),    # per-batch qkv
                      pltpu.VMEM((Bblk * T, D), jnp.float32)],      # attention context
      compiler_params=pltpu.CompilerParams(
          dimension_semantics=("parallel",),    # batch blocks across v7x's 2 TCs
          vmem_limit_bytes=32 * 1024 * 1024),
      cost_estimate=pl.CostEstimate(
          flops=int(B * flops_per_b),
          transcendentals=int(B * transc_per_b),
          bytes_accessed=int(bytes_accessed)),
  )(prefix2, cap_emb, mask3, *weights)
  return logits.reshape(B, T, V)


if __name__ == "__main__":
  cfg = Config()
  key = jax.random.PRNGKey(0)
  kp, kt, kx = jax.random.split(key, 3)

  params = init_params(kp, cfg)
  fp = prepare_params(params, cfg)

  B = 2
  T = cfg.prefix_length + cfg.seq_len
  tokens = jax.random.randint(kt, (B, cfg.seq_len), 0, cfg.vocab, dtype=jnp.int32)
  prefix = jax.random.normal(kx, (B, cfg.prefix_dim), jnp.float32)
  mask = jnp.ones((B, T), jnp.float32)

  logits = caption_model_forward(fp, tokens, prefix, mask, cfg)
  jax.block_until_ready(logits)
  assert logits.shape == (B, T, cfg.vocab)
  assert bool(jnp.isfinite(logits).all())
  print("KERNEL_OK")
</pallas_src>

<mosaic_0001>
module attributes {stable_mosaic.version = 11 : i64} {
  func.func @_fused_caption_kernel(%arg0: i32, %arg1: memref<2x16xf32, #tpu.memory_space<vmem>>, %arg2: memref<2x8x32xf32, #tpu.memory_space<vmem>>, %arg3: memref<2x1x12xf32, #tpu.memory_space<vmem>>, %arg4: memref<8x32xf32, #tpu.memory_space<vmem>>, %arg5: memref<16x64xbf16, #tpu.memory_space<vmem>>, %arg6: memref<1x64xf32, #tpu.memory_space<vmem>>, %arg7: memref<4x64x32xbf16, #tpu.memory_space<vmem>>, %arg8: memref<4x1x32xf32, #tpu.memory_space<vmem>>, %arg9: memref<2x1x32xf32, #tpu.memory_space<vmem>>, %arg10: memref<2x1x32xf32, #tpu.memory_space<vmem>>, %arg11: memref<2x32x96xbf16, #tpu.memory_space<vmem>>, %arg12: memref<2x1x96xf32, #tpu.memory_space<vmem>>, %arg13: memref<2x32x32xbf16, #tpu.memory_space<vmem>>, %arg14: memref<2x1x32xf32, #tpu.memory_space<vmem>>, %arg15: memref<2x1x32xf32, #tpu.memory_space<vmem>>, %arg16: memref<2x1x32xf32, #tpu.memory_space<vmem>>, %arg17: memref<2x32x128xbf16, #tpu.memory_space<vmem>>, %arg18: memref<2x1x128xf32, #tpu.memory_space<vmem>>, %arg19: memref<2x128x32xbf16, #tpu.memory_space<vmem>>, %arg20: memref<2x1x32xf32, #tpu.memory_space<vmem>>, %arg21: memref<1x32xf32, #tpu.memory_space<vmem>>, %arg22: memref<1x32xf32, #tpu.memory_space<vmem>>, %arg23: memref<32x128xbf16, #tpu.memory_space<vmem>>, %arg24: memref<24x128xf32, #tpu.memory_space<vmem>>, %arg25: memref<24x32xf32, #tpu.memory_space<vmem>>, %arg26: memref<2x12x96xf32, #tpu.memory_space<vmem>>, %arg27: memref<24x32xf32, #tpu.memory_space<vmem>>) attributes {dimension_semantics = [#tpu.dimension_semantics<parallel>], iteration_bounds = array<i64: 1>, scalar_prefetch = 0 : i64, scratch_operands = 3 : i64, tpu.core_type = #tpu.core_type<tc>, window_params = [{transform_indices = @transform_0, window_bounds = array<i64: 2, 16>}, {transform_indices = @transform_1, window_bounds = array<i64: 2, 8, 32>}, {transform_indices = @transform_2, window_bounds = array<i64: 2, 1, 12>}, {pipeline_mode = #tpu.pipeline_mode<synchronous>, transform_indices = @transform_3, window_bounds = array<i64: 8, 32>}, {pipeline_mode = #tpu.pipeline_mode<synchronous>, transform_indices = @transform_4, window_bounds = array<i64: 16, 64>}, {pipeline_mode = #tpu.pipeline_mode<synchronous>, transform_indices = @transform_5, window_bounds = array<i64: 1, 64>}, {pipeline_mode = #tpu.pipeline_mode<synchronous>, transform_indices = @transform_6, window_bounds = array<i64: 4, 64, 32>}, {pipeline_mode = #tpu.pipeline_mode<synchronous>, transform_indices = @transform_7, window_bounds = array<i64: 4, 1, 32>}, {pipeline_mode = #tpu.pipeline_mode<synchronous>, transform_indices = @transform_8, window_bounds = array<i64: 2, 1, 32>}, {pipeline_mode = #tpu.pipeline_mode<synchronous>, transform_indices = @transform_9, window_bounds = array<i64: 2, 1, 32>}, {pipeline_mode = #tpu.pipeline_mode<synchronous>, transform_indices = @transform_10, window_bounds = array<i64: 2, 32, 96>}, {pipeline_mode = #tpu.pipeline_mode<synchronous>, transform_indices = @transform_11, window_bounds = array<i64: 2, 1, 96>}, {pipeline_mode = #tpu.pipeline_mode<synchronous>, transform_indices = @transform_12, window_bounds = array<i64: 2, 32, 32>}, {pipeline_mode = #tpu.pipeline_mode<synchronous>, transform_indices = @transform_13, window_bounds = array<i64: 2, 1, 32>}, {pipeline_mode = #tpu.pipeline_mode<synchronous>, transform_indices = @transform_14, window_bounds = array<i64: 2, 1, 32>}, {pipeline_mode = #tpu.pipeline_mode<synchronous>, transform_indices = @transform_15, window_bounds = array<i64: 2, 1, 32>}, {pipeline_mode = #tpu.pipeline_mode<synchronous>, transform_indices = @transform_16, window_bounds = array<i64: 2, 32, 128>}, {pipeline_mode = #tpu.pipeline_mode<synchronous>, transform_indices = @transform_17, window_bounds = array<i64: 2, 1, 128>}, {pipeline_mode = #tpu.pipeline_mode<synchronous>, transform_indices = @transform_18, window_bounds = array<i64: 2, 128, 32>}, {pipeline_mode = #tpu.pipeline_mode<synchronous>, transform_indices = @transform_19, window_bounds = array<i64: 2, 1, 32>}, {pipeline_mode = #tpu.pipeline_mode<synchronous>, transform_indices = @transform_20, window_bounds = array<i64: 1, 32>}, {pipeline_mode = #tpu.pipeline_mode<synchronous>, transform_indices = @transform_21, window_bounds = array<i64: 1, 32>}, {pipeline_mode = #tpu.pipeline_mode<synchronous>, transform_indices = @transform_22, window_bounds = array<i64: 32, 128>}, {transform_indices = @transform_23, window_bounds = array<i64: 24, 128>}]} {
    %c0 = arith.constant 0 : index
    %c0_0 = arith.constant 0 : index
    %c0_1 = arith.constant 0 : index
    %0 = vector.load %arg2[%c0, %c0_0, %c0_1] : memref<2x8x32xf32, #tpu.memory_space<vmem>>, vector<1x8x32xf32>
    %1 = vector.shape_cast %0 : vector<1x8x32xf32> to vector<8x32xf32>
    %c0_2 = arith.constant 0 : index
    %c0_3 = arith.constant 0 : index
    %2 = vector.load %arg4[%c0_2, %c0_3] : memref<8x32xf32, #tpu.memory_space<vmem>>, vector<8x32xf32>
    %3 = arith.addf %1, %2 : vector<8x32xf32>
    %c4 = arith.constant 4 : index
    %c0_4 = arith.constant 0 : index
    %4 = vector.load %arg25[%c4, %c0_4] : memref<24x32xf32, #tpu.memory_space<vmem>>, vector<8x32xf32>
    tpu.vector_store %arg25[%c4, %c0_4], %3 {strides = array<i32>} : memref<24x32xf32, #tpu.memory_space<vmem>>, vector<8x32xf32>,
    %c1 = arith.constant 1 : index
    %c0_5 = arith.constant 0 : index
    %c0_6 = arith.constant 0 : index
    %5 = vector.load %arg2[%c1, %c0_5, %c0_6] : memref<2x8x32xf32, #tpu.memory_space<vmem>>, vector<1x8x32xf32>
    %6 = vector.shape_cast %5 : vector<1x8x32xf32> to vector<8x32xf32>
    %c0_7 = arith.constant 0 : index
    %c0_8 = arith.constant 0 : index
    %7 = vector.load %arg4[%c0_7, %c0_8] : memref<8x32xf32, #tpu.memory_space<vmem>>, vector<8x32xf32>
    %8 = arith.addf %6, %7 : vector<8x32xf32>
    %c16 = arith.constant 16 : index
    %c0_9 = arith.constant 0 : index
    %9 = vector.load %arg25[%c16, %c0_9] : memref<24x32xf32, #tpu.memory_space<vmem>>, vector<8x32xf32>
    tpu.vector_store %arg25[%c16, %c0_9], %8 {strides = array<i32>} : memref<24x32xf32, #tpu.memory_space<vmem>>, vector<8x32xf32>,
    %c0_10 = arith.constant 0 : index
    %c0_11 = arith.constant 0 : index
    %10 = vector.load %arg1[%c0_10, %c0_11] : memref<2x16xf32, #tpu.memory_space<vmem>>, vector<2x16xf32>
    %c0_12 = arith.constant 0 : index
    %c0_13 = arith.constant 0 : index
    %11 = vector.load %arg5[%c0_12, %c0_13] : memref<16x64xbf16, #tpu.memory_space<vmem>>, vector<16x64xbf16>
    %12 = arith.truncf %10 : vector<2x16xf32> to vector<2x16xbf16>
    %cst = arith.constant dense<0.000000e+00> : vector<2x64xf32>
    %13 = tpu.matmul %12, %11, %cst {dimension_numbers = #tpu.dot_dimension_numbers<[1], [0], [0], [1], [0, 0, 1, 1], [], []>} : vector<2x16xbf16>, vector<16x64xbf16>, vector<2x64xf32> -> vector<2x64xf32>
    %c0_14 = arith.constant 0 : index
    %c0_15 = arith.constant 0 : index
    %14 = vector.load %arg6[%c0_14, %c0_15] : memref<1x64xf32, #tpu.memory_space<vmem>>, vector<1x64xf32>
    %15 = vector.broadcast %14 : vector<1x64xf32> to vector<2x64xf32>
    %16 = arith.addf %13, %15 : vector<2x64xf32>
    %17 = math.tanh %16 : vector<2x64xf32>
    %c0_16 = arith.constant 0 : index
    %c0_17 = arith.constant 0 : index
    %c0_18 = arith.constant 0 : index
    %18 = vector.load %arg7[%c0_16, %c0_17, %c0_18] : memref<4x64x32xbf16, #tpu.memory_space<vmem>>, vector<1x64x32xbf16>
    %19 = vector.shape_cast %18 : vector<1x64x32xbf16> to vector<64x32xbf16>
    %20 = arith.truncf %17 : vector<2x64xf32> to vector<2x64xbf16>
    %cst_19 = arith.constant dense<0.000000e+00> : vector<2x32xf32>
    %21 = tpu.matmul %20, %19, %cst_19 {dimension_numbers = #tpu.dot_dimension_numbers<[1], [0], [0], [1], [0, 0, 1, 1], [], []>} : vector<2x64xbf16>, vector<64x32xbf16>, vector<2x32xf32> -> vector<2x32xf32>
    %c0_20 = arith.constant 0 : index
    %c0_21 = arith.constant 0 : index
    %c0_22 = arith.constant 0 : index
    %22 = vector.load %arg8[%c0_20, %c0_21, %c0_22] : memref<4x1x32xf32, #tpu.memory_space<vmem>>, vector<1x1x32xf32>
    %23 = vector.shape_cast %22 : vector<1x1x32xf32> to vector<1x32xf32>
    %24 = vector.broadcast %23 : vector<1x32xf32> to vector<2x32xf32>
    %25 = arith.addf %21, %24 : vector<2x32xf32>
    %26 = vector.extract_strided_slice %25 {offsets = [0, 0], sizes = [1, 32], strides = [1, 1]} : vector<2x32xf32> to vector<1x32xf32>
    %c0_23 = arith.constant 0 : index
    %c0_24 = arith.constant 0 : index
    %27 = vector.load %arg25[%c0_23, %c0_24] : memref<24x32xf32, #tpu.memory_space<vmem>>, vector<1x32xf32>
    tpu.vector_store %arg25[%c0_23, %c0_24], %26 {strides = array<i32>} : memref<24x32xf32, #tpu.memory_space<vmem>>, vector<1x32xf32>,
    %28 = vector.extract_strided_slice %25 {offsets = [1, 0], sizes = [1, 32], strides = [1, 1]} : vector<2x32xf32> to vector<1x32xf32>
    %c12 = arith.constant 12 : index
    %c0_25 = arith.constant 0 : index
    %29 = vector.load %arg25[%c12, %c0_25] : memref<24x32xf32, #tpu.memory_space<vmem>>, vector<1x32xf32>
    tpu.vector_store %arg25[%c12, %c0_25], %28 {strides = array<i32>} : memref<24x32xf32, #tpu.memory_space<vmem>>, vector<1x32xf32>,
    %c1_26 = arith.constant 1 : index
    %c0_27 = arith.constant 0 : index
    %c0_28 = arith.constant 0 : index
    %30 = vector.load %arg7[%c1_26, %c0_27, %c0_28] : memref<4x64x32xbf16, #tpu.memory_space<vmem>>, vector<1x64x32xbf16>
    %31 = vector.shape_cast %30 : vector<1x64x32xbf16> to vector<64x32xbf16>
    %32 = arith.truncf %17 : vector<2x64xf32> to vector<2x64xbf16>
    %cst_29 = arith.constant dense<0.000000e+00> : vector<2x32xf32>
    %33 = tpu.matmul %32, %31, %cst_29 {dimension_numbers = #tpu.dot_dimension_numbers<[1], [0], [0], [1], [0, 0, 1, 1], [], []>} : vector<2x64xbf16>, vector<64x32xbf16>, vector<2x32xf32> -> vector<2x32xf32>
    %c1_30 = arith.constant 1 : index
    %c0_31 = arith.constant 0 : index
    %c0_32 = arith.constant 0 : index
    %34 = vector.load %arg8[%c1_30, %c0_31, %c0_32] : memref<4x1x32xf32, #tpu.memory_space<vmem>>, vector<1x1x32xf32>
    %35 = vector.shape_cast %34 : vector<1x1x32xf32> to vector<1x32xf32>
    %36 = vector.broadcast %35 : vector<1x32xf32> to vector<2x32xf32>
    %37 = arith.addf %33, %36 : vector<2x32xf32>
    %38 = vector.extract_strided_slice %37 {offsets = [0, 0], sizes = [1, 32], strides = [1, 1]} : vector<2x32xf32> to vector<1x32xf32>
    %c1_33 = arith.constant 1 : index
    %c0_34 = arith.constant 0 : index
    %39 = vector.load %arg25[%c1_33, %c0_34] : memref<24x32xf32, #tpu.memory_space<vmem>>, vector<1x32xf32>
    tpu.vector_store %arg25[%c1_33, %c0_34], %38 {strides = array<i32>} : memref<24x32xf32, #tpu.memory_space<vmem>>, vector<1x32xf32>,
    %40 = vector.extract_strided_slice %37 {offsets = [1, 0], sizes = [1, 32], strides = [1, 1]} : vector<2x32xf32> to vector<1x32xf32>
    %c13 = arith.constant 13 : index
    %c0_35 = arith.constant 0 : index
    %41 = vector.load %arg25[%c13, %c0_35] : memref<24x32xf32, #tpu.memory_space<vmem>>, vector<1x32xf32>
    tpu.vector_store %arg25[%c13, %c0_35], %40 {strides = array<i32>} : memref<24x32xf32, #tpu.memory_space<vmem>>, vector<1x32xf32>,
    %c2 = arith.constant 2 : index
    %c0_36 = arith.constant 0 : index
    %c0_37 = arith.constant 0 : index
    %42 = vector.load %arg7[%c2, %c0_36, %c0_37] : memref<4x64x32xbf16, #tpu.memory_space<vmem>>, vector<1x64x32xbf16>
    %43 = vector.shape_cast %42 : vector<1x64x32xbf16> to vector<64x32xbf16>
    %44 = arith.truncf %17 : vector<2x64xf32> to vector<2x64xbf16>
    %cst_38 = arith.constant dense<0.000000e+00> : vector<2x32xf32>
    %45 = tpu.matmul %44, %43, %cst_38 {dimension_numbers = #tpu.dot_dimension_numbers<[1], [0], [0], [1], [0, 0, 1, 1], [], []>} : vector<2x64xbf16>, vector<64x32xbf16>, vector<2x32xf32> -> vector<2x32xf32>
    %c2_39 = arith.constant 2 : index
    %c0_40 = arith.constant 0 : index
    %c0_41 = arith.constant 0 : index
    %46 = vector.load %arg8[%c2_39, %c0_40, %c0_41] : memref<4x1x32xf32, #tpu.memory_space<vmem>>, vector<1x1x32xf32>
    %47 = vector.shape_cast %46 : vector<1x1x32xf32> to vector<1x32xf32>
    %48 = vector.broadcast %47 : vector<1x32xf32> to vector<2x32xf32>
    %49 = arith.addf %45, %48 : vector<2x32xf32>
    %50 = vector.extract_strided_slice %49 {offsets = [0, 0], sizes = [1, 32], strides = [1, 1]} : vector<2x32xf32> to vector<1x32xf32>
    %c2_42 = arith.constant 2 : index
    %c0_43 = arith.constant 0 : index
    %51 = vector.load %arg25[%c2_42, %c0_43] : memref<24x32xf32, #tpu.memory_space<vmem>>, vector<1x32xf32>
    tpu.vector_store %arg25[%c2_42, %c0_43], %50 {strides = array<i32>} : memref<24x32xf32, #tpu.memory_space<vmem>>, vector<1x32xf32>,
    %52 = vector.extract_strided_slice %49 {offsets = [1, 0], sizes = [1, 32], strides = [1, 1]} : vector<2x32xf32> to vector<1x32xf32>
    %c14 = arith.constant 14 : index
    %c0_44 = arith.constant 0 : index
    %53 = vector.load %arg25[%c14, %c0_44] : memref<24x32xf32, #tpu.memory_space<vmem>>, vector<1x32xf32>
    tpu.vector_store %arg25[%c14, %c0_44], %52 {strides = array<i32>} : memref<24x32xf32, #tpu.memory_space<vmem>>, vector<1x32xf32>,
    %c3 = arith.constant 3 : index
    %c0_45 = arith.constant 0 : index
    %c0_46 = arith.constant 0 : index
    %54 = vector.load %arg7[%c3, %c0_45, %c0_46] : memref<4x64x32xbf16, #tpu.memory_space<vmem>>, vector<1x64x32xbf16>
    %55 = vector.shape_cast %54 : vector<1x64x32xbf16> to vector<64x32xbf16>
    %56 = arith.truncf %17 : vector<2x64xf32> to vector<2x64xbf16>
    %cst_47 = arith.constant dense<0.000000e+00> : vector<2x32xf32>
    %57 = tpu.matmul %56, %55, %cst_47 {dimension_numbers = #tpu.dot_dimension_numbers<[1], [0], [0], [1], [0, 0, 1, 1], [], []>} : vector<2x64xbf16>, vector<64x32xbf16>, vector<2x32xf32> -> vector<2x32xf32>
    %c3_48 = arith.constant 3 : index
    %c0_49 = arith.constant 0 : index
    %c0_50 = arith.constant 0 : index
    %58 = vector.load %arg8[%c3_48, %c0_49, %c0_50] : memref<4x1x32xf32, #tpu.memory_space<vmem>>, vector<1x1x32xf32>
    %59 = vector.shape_cast %58 : vector<1x1x32xf32> to vector<1x32xf32>
    %60 = vector.broadcast %59 : vector<1x32xf32> to vector<2x32xf32>
    %61 = arith.addf %57, %60 : vector<2x32xf32>
    %62 = vector.extract_strided_slice %61 {offsets = [0, 0], sizes = [1, 32], strides = [1, 1]} : vector<2x32xf32> to vector<1x32xf32>
    %c3_51 = arith.constant 3 : index
    %c0_52 = arith.constant 0 : index
    %63 = vector.load %arg25[%c3_51, %c0_52] : memref<24x32xf32, #tpu.memory_space<vmem>>, vector<1x32xf32>
    tpu.vector_store %arg25[%c3_51, %c0_52], %62 {strides = array<i32>} : memref<24x32xf32, #tpu.memory_space<vmem>>, vector<1x32xf32>,
    %64 = vector.extract_strided_slice %61 {offsets = [1, 0], sizes = [1, 32], strides = [1, 1]} : vector<2x32xf32> to vector<1x32xf32>
    %c15 = arith.constant 15 : index
    %c0_53 = arith.constant 0 : index
    %65 = vector.load %arg25[%c15, %c0_53] : memref<24x32xf32, #tpu.memory_space<vmem>>, vector<1x32xf32>
    tpu.vector_store %arg25[%c15, %c0_53], %64 {strides = array<i32>} : memref<24x32xf32, #tpu.memory_space<vmem>>, vector<1x32xf32>,
    %c0_54 = arith.constant 0 : index
    %c0_55 = arith.constant 0 : index
    %66 = vector.load %arg25[%c0_54, %c0_55] : memref<24x32xf32, #tpu.memory_space<vmem>>, vector<24x32xf32>
    %67 = tpu.iota {dimensions = array<i32: 1>} : vector<2x12x12xi32>
    %68 = tpu.iota {dimensions = array<i32: 2>} : vector<2x12x12xi32>
    %69 = arith.cmpi sge, %67, %68 : vector<2x12x12xi32>
    %c0_56 = arith.constant 0 : index
    %c0_57 = arith.constant 0 : index
    %c0_58 = arith.constant 0 : index
    %70 = vector.load %arg3[%c0_56, %c0_57, %c0_58] : memref<2x1x12xf32, #tpu.memory_space<vmem>>, vector<2x1x12xf32>
    %cst_59 = arith.constant 5.000000e-01 : f32
    %71 = vector.broadcast %cst_59 : f32 to vector<2x1x12xf32>
    %72 = arith.cmpf ogt, %70, %71 : vector<2x1x12xf32>
    %73 = vector.broadcast %72 : vector<2x1x12xi1> to vector<2x12x12xi1>
    %74 = arith.andi %69, %73 : vector<2x12x12xi1>
    %cst_60 = arith.constant 0.000000e+00 : f32
    %cst_61 = arith.constant -1.000000e+09 : f32
    %75 = vector.broadcast %cst_60 : f32 to vector<2x12x12xf32>
    %76 = vector.broadcast %cst_61 : f32 to vector<2x12x12xf32>
    %77 = arith.select %74, %75, %76 : vector<2x12x12xi1>, vector<2x12x12xf32>
    %c0_62 = arith.constant 0 : index
    %c0_63 = arith.constant 0 : index
    %c0_64 = arith.constant 0 : index
    %78 = vector.load %arg9[%c0_62, %c0_63, %c0_64] : memref<2x1x32xf32, #tpu.memory_space<vmem>>, vector<1x1x32xf32>
    %79 = vector.shape_cast %78 : vector<1x1x32xf32> to vector<1x32xf32>
    %c0_65 = arith.constant 0 : index
    %c0_66 = arith.constant 0 : index
    %c0_67 = arith.constant 0 : index
    %80 = vector.load %arg10[%c0_65, %c0_66, %c0_67] : memref<2x1x32xf32, #tpu.memory_space<vmem>>, vector<1x1x32xf32>
    %81 = vector.shape_cast %80 : vector<1x1x32xf32> to vector<1x32xf32>
    %cst_68 = arith.constant dense<0.000000e+00> : vector<24xf32>
    %82 = vector.multi_reduction <add>, %66, %cst_68 [1] : vector<24x32xf32> to vector<24xf32>
    %83 = vector.shape_cast %82 : vector<24xf32> to vector<24x1xf32>
    %cst_69 = arith.constant 3.200000e+01 : f32
    %84 = vector.broadcast %cst_69 : f32 to vector<24x1xf32>
    %85 = arith.divf %83, %84 : vector<24x1xf32>
    %86 = vector.broadcast %85 : vector<24x1xf32> to vector<24x32xf32>
    %87 = arith.subf %66, %86 : vector<24x32xf32>
    %88 = arith.mulf %87, %87 : vector<24x32xf32>
    %cst_70 = arith.constant dense<0.000000e+00> : vector<24xf32>
    %89 = vector.multi_reduction <add>, %88, %cst_70 [1] : vector<24x32xf32> to vector<24xf32>
    %90 = vector.shape_cast %89 : vector<24xf32> to vector<24x1xf32>
    %cst_71 = arith.constant 3.200000e+01 : f32
    %91 = vector.broadcast %cst_71 : f32 to vector<24x1xf32>
    %92 = arith.divf %90, %91 : vector<24x1xf32>
    %cst_72 = arith.constant 9.99999974E-6 : f32
    %93 = vector.broadcast %cst_72 : f32 to vector<24x1xf32>
    %94 = arith.addf %92, %93 : vector<24x1xf32>
    %95 = math.rsqrt %94 : vector<24x1xf32>
    %96 = vector.broadcast %95 : vector<24x1xf32> to vector<24x32xf32>
    %97 = arith.mulf %87, %96 : vector<24x32xf32>
    %98 = vector.broadcast %79 : vector<1x32xf32> to vector<24x32xf32>
    %99 = arith.mulf %97, %98 : vector<24x32xf32>
    %100 = vector.broadcast %81 : vector<1x32xf32> to vector<24x32xf32>
    %101 = arith.addf %99, %100 : vector<24x32xf32>
    %c0_73 = arith.constant 0 : index
    %c0_74 = arith.constant 0 : index
    %c0_75 = arith.constant 0 : index
    %102 = vector.load %arg11[%c0_73, %c0_74, %c0_75] : memref<2x32x96xbf16, #tpu.memory_space<vmem>>, vector<1x32x96xbf16>
    %103 = vector.shape_cast %102 : vector<1x32x96xbf16> to vector<32x96xbf16>
    %104 = arith.truncf %101 : vector<24x32xf32> to vector<24x32xbf16>
    %cst_76 = arith.constant dense<0.000000e+00> : vector<24x96xf32>
    %105 = tpu.matmul %104, %103, %cst_76 {dimension_numbers = #tpu.dot_dimension_numbers<[1], [0], [0], [1], [0, 0, 1, 1], [], []>} : vector<24x32xbf16>, vector<32x96xbf16>, vector<24x96xf32> -> vector<24x96xf32>
    %c0_77 = arith.constant 0 : index
    %c0_78 = arith.constant 0 : index
    %c0_79 = arith.constant 0 : index
    %106 = vector.load %arg12[%c0_77, %c0_78, %c0_79] : memref<2x1x96xf32, #tpu.memory_space<vmem>>, vector<1x1x96xf32>
    %107 = vector.shape_cast %106 : vector<1x1x96xf32> to vector<1x96xf32>
    %108 = vector.broadcast %107 : vector<1x96xf32> to vector<24x96xf32>
    %109 = arith.addf %105, %108 : vector<24x96xf32>
    %110 = vector.extract_strided_slice %109 {offsets = [0, 0], sizes = [12, 96], strides = [1, 1]} : vector<24x96xf32> to vector<12x96xf32>
    %c0_80 = arith.constant 0 : index
    %c0_81 = arith.constant 0 : index
    %c0_82 = arith.constant 0 : index
    %111 = vector.load %arg26[%c0_80, %c0_81, %c0_82] : memref<2x12x96xf32, #tpu.memory_space<vmem>>, vector<1x12x96xf32>
    %112 = vector.shape_cast %111 : vector<1x12x96xf32> to vector<12x96xf32>
    %113 = vector.shape_cast %110 : vector<12x96xf32> to vector<1x12x96xf32>
    tpu.vector_store %arg26[%c0_80, %c0_81, %c0_82], %113 {strides = array<i32>} : memref<2x12x96xf32, #tpu.memory_space<vmem>>, vector<1x12x96xf32>,
    %114 = vector.extract_strided_slice %109 {offsets = [12, 0], sizes = [12, 96], strides = [1, 1]} : vector<24x96xf32> to vector<12x96xf32>
    %c1_83 = arith.constant 1 : index
    %c0_84 = arith.constant 0 : index
    %c0_85 = arith.constant 0 : index
    %115 = vector.load %arg26[%c1_83, %c0_84, %c0_85] : memref<2x12x96xf32, #tpu.memory_space<vmem>>, vector<1x12x96xf32>
    %116 = vector.shape_cast %115 : vector<1x12x96xf32> to vector<12x96xf32>
    %117 = vector.shape_cast %114 : vector<12x96xf32> to vector<1x12x96xf32>
    tpu.vector_store %arg26[%c1_83, %c0_84, %c0_85], %117 {strides = array<i32>} : memref<2x12x96xf32, #tpu.memory_space<vmem>>, vector<1x12x96xf32>,
    %c0_86 = arith.constant 0 : index
    %c0_87 = arith.constant 0 : index
    %c0_88 = arith.constant 0 : index
    %118 = vector.load %arg26[%c0_86, %c0_87, %c0_88] : memref<2x12x96xf32, #tpu.memory_space<vmem>>, vector<2x12x8xf32>
    %c0_89 = arith.constant 0 : index
    %c0_90 = arith.constant 0 : index
    %c32 = arith.constant 32 : index
    %119 = vector.load %arg26[%c0_89, %c0_90, %c32] : memref<2x12x96xf32, #tpu.memory_space<vmem>>, vector<2x12x8xf32>
    %c0_91 = arith.constant 0 : index
    %c0_92 = arith.constant 0 : index
    %c64 = arith.constant 64 : index
    %120 = vector.load %arg26[%c0_91, %c0_92, %c64] : memref<2x12x96xf32, #tpu.memory_space<vmem>>, vector<2x12x8xf32>
    %121 = arith.truncf %118 : vector<2x12x8xf32> to vector<2x12x8xbf16>
    %122 = arith.truncf %119 : vector<2x12x8xf32> to vector<2x12x8xbf16>
    "tpu.trace_start"() <{level = 10 : i32, message = "bqd,bkd->bqk"}> : () -> ()
    %cst_93 = arith.constant dense<0.000000e+00> : vector<2x12x12xf32>
    %123 = tpu.matmul %121, %122, %cst_93 {dimension_numbers = #tpu.dot_dimension_numbers<[2], [2], [1], [1], [0, 0, 0, 1, 1, 1], [0], [0]>} : vector<2x12x8xbf16>, vector<2x12x8xbf16>, vector<2x12x12xf32> -> vector<2x12x12xf32>
    "tpu.trace_stop"() : () -> ()
    %124 = arith.addf %123, %77 : vector<2x12x12xf32>
    %cst_94 = arith.constant dense<0xFF800000> : vector<2x12xf32>
    %125 = vector.multi_reduction <maximumf>, %124, %cst_94 [2] : vector<2x12x12xf32> to vector<2x12xf32>
    %126 = vector.shape_cast %125 : vector<2x12xf32> to vector<2x12x1xf32>
    %127 = vector.broadcast %126 : vector<2x12x1xf32> to vector<2x12x12xf32>
    %128 = arith.subf %124, %127 : vector<2x12x12xf32>
    %129 = math.exp %128 : vector<2x12x12xf32>
    %cst_95 = arith.constant dense<0.000000e+00> : vector<2x12xf32>
    %130 = vector.multi_reduction <add>, %129, %cst_95 [2] : vector<2x12x12xf32> to vector<2x12xf32>
    %131 = vector.shape_cast %130 : vector<2x12xf32> to vector<2x12x1xf32>
    %132 = tpu.reciprocal %131 {approx = true} : vector<2x12x1xf32> -> vector<2x12x1xf32>
    %133 = vector.broadcast %132 : vector<2x12x1xf32> to vector<2x12x12xf32>
    %134 = arith.mulf %129, %133 : vector<2x12x12xf32>
    %135 = arith.truncf %134 : vector<2x12x12xf32> to vector<2x12x12xbf16>
    %136 = arith.truncf %120 : vector<2x12x8xf32> to vector<2x12x8xbf16>
    "tpu.trace_start"() <{level = 10 : i32, message = "bqk,bkd->bqd"}> : () -> ()
    %cst_96 = arith.constant dense<0.000000e+00> : vector<2x12x8xf32>
    %137 = tpu.matmul %135, %136, %cst_96 {dimension_numbers = #tpu.dot_dimension_numbers<[2], [1], [1], [2], [0, 0, 0, 1, 1, 2], [0], [0]>} : vector<2x12x12xbf16>, vector<2x12x8xbf16>, vector<2x12x8xf32> -> vector<2x12x8xf32>
    "tpu.trace_stop"() : () -> ()
    %138 = vector.extract_strided_slice %137 {offsets = [0, 0, 0], sizes = [1, 12, 8], strides = [1, 1, 1]} : vector<2x12x8xf32> to vector<1x12x8xf32>
    %139 = vector.shape_cast %138 : vector<1x12x8xf32> to vector<12x8xf32>
    %c0_97 = arith.constant 0 : index
    %c0_98 = arith.constant 0 : index
    %140 = vector.load %arg27[%c0_97, %c0_98] : memref<24x32xf32, #tpu.memory_space<vmem>>, vector<12x8xf32>
    tpu.vector_store %arg27[%c0_97, %c0_98], %139 {strides = array<i32>} : memref<24x32xf32, #tpu.memory_space<vmem>>, vector<12x8xf32>,
    %141 = vector.extract_strided_slice %137 {offsets = [1, 0, 0], sizes = [1, 12, 8], strides = [1, 1, 1]} : vector<2x12x8xf32> to vector<1x12x8xf32>
    %142 = vector.shape_cast %141 : vector<1x12x8xf32> to vector<12x8xf32>
    %c12_99 = arith.constant 12 : index
    %c0_100 = arith.constant 0 : index
    %143 = vector.load %arg27[%c12_99, %c0_100] : memref<24x32xf32, #tpu.memory_space<vmem>>, vector<12x8xf32>
    tpu.vector_store %arg27[%c12_99, %c0_100], %142 {strides = array<i32>} : memref<24x32xf32, #tpu.memory_space<vmem>>, vector<12x8xf32>,
    %c0_101 = arith.constant 0 : index
    %c0_102 = arith.constant 0 : index
    %c8 = arith.constant 8 : index
    %144 = vector.load %arg26[%c0_101, %c0_102, %c8] : memref<2x12x96xf32, #tpu.memory_space<vmem>>, vector<2x12x8xf32>
    %c0_103 = arith.constant 0 : index
    %c0_104 = arith.constant 0 : index
    %c40 = arith.constant 40 : index
    %145 = vector.load %arg26[%c0_103, %c0_104, %c40] : memref<2x12x96xf32, #tpu.memory_space<vmem>>, vector<2x12x8xf32>
    %c0_105 = arith.constant 0 : index
    %c0_106 = arith.constant 0 : index
    %c72 = arith.constant 72 : index
    %146 = vector.load %arg26[%c0_105, %c0_106, %c72] : memref<2x12x96xf32, #tpu.memory_space<vmem>>, vector<2x12x8xf32>
    %147 = arith.truncf %144 : vector<2x12x8xf32> to vector<2x12x8xbf16>
    %148 = arith.truncf %145 : vector<2x12x8xf32> to vector<2x12x8xbf16>
    "tpu.trace_start"() <{level = 10 : i32, message = "bqd,bkd->bqk"}> : () -> ()
    %cst_107 = arith.constant dense<0.000000e+00> : vector<2x12x12xf32>
    %149 = tpu.matmul %147, %148, %cst_107 {dimension_numbers = #tpu.dot_dimension_numbers<[2], [2], [1], [1], [0, 0, 0, 1, 1, 1], [0], [0]>} : vector<2x12x8xbf16>, vector<2x12x8xbf16>, vector<2x12x12xf32> -> vector<2x12x12xf32>
    "tpu.trace_stop"() : () -> ()
    %150 = arith.addf %149, %77 : vector<2x12x12xf32>
    %cst_108 = arith.constant dense<0xFF800000> : vector<2x12xf32>
    %151 = vector.multi_reduction <maximumf>, %150, %cst_108 [2] : vector<2x12x12xf32> to vector<2x12xf32>
    %152 = vector.shape_cast %151 : vector<2x12xf32> to vector<2x12x1xf32>
    %153 = vector.broadcast %152 : vector<2x12x1xf32> to vector<2x12x12xf32>
    %154 = arith.subf %150, %153 : vector<2x12x12xf32>
    %155 = math.exp %154 : vector<2x12x12xf32>
    %cst_109 = arith.constant dense<0.000000e+00> : vector<2x12xf32>
    %156 = vector.multi_reduction <add>, %155, %cst_109 [2] : vector<2x12x12xf32> to vector<2x12xf32>
    %157 = vector.shape_cast %156 : vector<2x12xf32> to vector<2x12x1xf32>
    %158 = tpu.reciprocal %157 {approx = true} : vector<2x12x1xf32> -> vector<2x12x1xf32>
    %159 = vector.broadcast %158 : vector<2x12x1xf32> to vector<2x12x12xf32>
    %160 = arith.mulf %155, %159 : vector<2x12x12xf32>
    %161 = arith.truncf %160 : vector<2x12x12xf32> to vector<2x12x12xbf16>
    %162 = arith.truncf %146 : vector<2x12x8xf32> to vector<2x12x8xbf16>
    "tpu.trace_start"() <{level = 10 : i32, message = "bqk,bkd->bqd"}> : () -> ()
    %cst_110 = arith.constant dense<0.000000e+00> : vector<2x12x8xf32>
    %163 = tpu.matmul %161, %162, %cst_110 {dimension_numbers = #tpu.dot_dimension_numbers<[2], [1], [1], [2], [0, 0, 0, 1, 1, 2], [0], [0]>} : vector<2x12x12xbf16>, vector<2x12x8xbf16>, vector<2x12x8xf32> -> vector<2x12x8xf32>
    "tpu.trace_stop"() : () -> ()
    %164 = vector.extract_strided_slice %163 {offsets = [0, 0, 0], sizes = [1, 12, 8], strides = [1, 1, 1]} : vector<2x12x8xf32> to vector<1x12x8xf32>
    %165 = vector.shape_cast %164 : vector<1x12x8xf32> to vector<12x8xf32>
    %c0_111 = arith.constant 0 : index
    %c8_112 = arith.constant 8 : index
    %166 = vector.load %arg27[%c0_111, %c8_112] : memref<24x32xf32, #tpu.memory_space<vmem>>, vector<12x8xf32>
    tpu.vector_store %arg27[%c0_111, %c8_112], %165 {strides = array<i32>} : memref<24x32xf32, #tpu.memory_space<vmem>>, vector<12x8xf32>,
    %167 = vector.extract_strided_slice %163 {offsets = [1, 0, 0], sizes = [1, 12, 8], strides = [1, 1, 1]} : vector<2x12x8xf32> to vector<1x12x8xf32>
    %168 = vector.shape_cast %167 : vector<1x12x8xf32> to vector<12x8xf32>
    %c12_113 = arith.constant 12 : index
    %c8_114 = arith.constant 8 : index
    %169 = vector.load %arg27[%c12_113, %c8_114] : memref<24x32xf32, #tpu.memory_space<vmem>>, vector<12x8xf32>
    tpu.vector_store %arg27[%c12_113, %c8_114], %168 {strides = array<i32>} : memref<24x32xf32, #tpu.memory_space<vmem>>, vector<12x8xf32>,
    %c0_115 = arith.constant 0 : index
    %c0_116 = arith.constant 0 : index
    %c16_117 = arith.constant 16 : index
    %170 = vector.load %arg26[%c0_115, %c0_116, %c16_117] : memref<2x12x96xf32, #tpu.memory_space<vmem>>, vector<2x12x8xf32>
    %c0_118 = arith.constant 0 : index
    %c0_119 = arith.constant 0 : index
    %c48 = arith.constant 48 : index
    %171 = vector.load %arg26[%c0_118, %c0_119, %c48] : memref<2x12x96xf32, #tpu.memory_space<vmem>>, vector<2x12x8xf32>
    %c0_120 = arith.constant 0 : index
    %c0_121 = arith.constant 0 : index
    %c80 = arith.constant 80 : index
    %172 = vector.load %arg26[%c0_120, %c0_121, %c80] : memref<2x12x96xf32, #tpu.memory_space<vmem>>, vector<2x12x8xf32>
    %173 = arith.truncf %170 : vector<2x12x8xf32> to vector<2x12x8xbf16>
    %174 = arith.truncf %171 : vector<2x12x8xf32> to vector<2x12x8xbf16>
    "tpu.trace_start"() <{level = 10 : i32, message = "bqd,bkd->bqk"}> : () -> ()
    %cst_122 = arith.constant dense<0.000000e+00> : vector<2x12x12xf32>
    %175 = tpu.matmul %173, %174, %cst_122 {dimension_numbers = #tpu.dot_dimension_numbers<[2], [2], [1], [1], [0, 0, 0, 1, 1, 1], [0], [0]>} : vector<2x12x8xbf16>, vector<2x12x8xbf16>, vector<2x12x12xf32> -> vector<2x12x12xf32>
    "tpu.trace_stop"() : () -> ()
    %176 = arith.addf %175, %77 : vector<2x12x12xf32>
    %cst_123 = arith.constant dense<0xFF800000> : vector<2x12xf32>
    %177 = vector.multi_reduction <maximumf>, %176, %cst_123 [2] : vector<2x12x12xf32> to vector<2x12xf32>
    %178 = vector.shape_cast %177 : vector<2x12xf32> to vector<2x12x1xf32>
    %179 = vector.broadcast %178 : vector<2x12x1xf32> to vector<2x12x12xf32>
    %180 = arith.subf %176, %179 : vector<2x12x12xf32>
    %181 = math.exp %180 : vector<2x12x12xf32>
    %cst_124 = arith.constant dense<0.000000e+00> : vector<2x12xf32>
    %182 = vector.multi_reduction <add>, %181, %cst_124 [2] : vector<2x12x12xf32> to vector<2x12xf32>
    %183 = vector.shape_cast %182 : vector<2x12xf32> to vector<2x12x1xf32>
    %184 = tpu.reciprocal %183 {approx = true} : vector<2x12x1xf32> -> vector<2x12x1xf32>
    %185 = vector.broadcast %184 : vector<2x12x1xf32> to vector<2x12x12xf32>
    %186 = arith.mulf %181, %185 : vector<2x12x12xf32>
    %187 = arith.truncf %186 : vector<2x12x12xf32> to vector<2x12x12xbf16>
    %188 = arith.truncf %172 : vector<2x12x8xf32> to vector<2x12x8xbf16>
    "tpu.trace_start"() <{level = 10 : i32, message = "bqk,bkd->bqd"}> : () -> ()
    %cst_125 = arith.constant dense<0.000000e+00> : vector<2x12x8xf32>
    %189 = tpu.matmul %187, %188, %cst_125 {dimension_numbers = #tpu.dot_dimension_numbers<[2], [1], [1], [2], [0, 0, 0, 1, 1, 2], [0], [0]>} : vector<2x12x12xbf16>, vector<2x12x8xbf16>, vector<2x12x8xf32> -> vector<2x12x8xf32>
    "tpu.trace_stop"() : () -> ()
    %190 = vector.extract_strided_slice %189 {offsets = [0, 0, 0], sizes = [1, 12, 8], strides = [1, 1, 1]} : vector<2x12x8xf32> to vector<1x12x8xf32>
    %191 = vector.shape_cast %190 : vector<1x12x8xf32> to vector<12x8xf32>
    %c0_126 = arith.constant 0 : index
    %c16_127 = arith.constant 16 : index
    %192 = vector.load %arg27[%c0_126, %c16_127] : memref<24x32xf32, #tpu.memory_space<vmem>>, vector<12x8xf32>
    tpu.vector_store %arg27[%c0_126, %c16_127], %191 {strides = array<i32>} : memref<24x32xf32, #tpu.memory_space<vmem>>, vector<12x8xf32>,
    %193 = vector.extract_strided_slice %189 {offsets = [1, 0, 0], sizes = [1, 12, 8], strides = [1, 1, 1]} : vector<2x12x8xf32> to vector<1x12x8xf32>
    %194 = vector.shape_cast %193 : vector<1x12x8xf32> to vector<12x8xf32>
    %c12_128 = arith.constant 12 : index
    %c16_129 = arith.constant 16 : index
    %195 = vector.load %arg27[%c12_128, %c16_129] : memref<24x32xf32, #tpu.memory_space<vmem>>, vector<12x8xf32>
    tpu.vector_store %arg27[%c12_128, %c16_129], %194 {strides = array<i32>} : memref<24x32xf32, #tpu.memory_space<vmem>>, vector<12x8xf32>,
    %c0_130 = arith.constant 0 : index
    %c0_131 = arith.constant 0 : index
    %c24 = arith.constant 24 : index
    %196 = vector.load %arg26[%c0_130, %c0_131, %c24] : memref<2x12x96xf32, #tpu.memory_space<vmem>>, vector<2x12x8xf32>
    %c0_132 = arith.constant 0 : index
    %c0_133 = arith.constant 0 : index
    %c56 = arith.constant 56 : index
    %197 = vector.load %arg26[%c0_132, %c0_133, %c56] : memref<2x12x96xf32, #tpu.memory_space<vmem>>, vector<2x12x8xf32>
    %c0_134 = arith.constant 0 : index
    %c0_135 = arith.constant 0 : index
    %c88 = arith.constant 88 : index
    %198 = vector.load %arg26[%c0_134, %c0_135, %c88] : memref<2x12x96xf32, #tpu.memory_space<vmem>>, vector<2x12x8xf32>
    %199 = arith.truncf %196 : vector<2x12x8xf32> to vector<2x12x8xbf16>
    %200 = arith.truncf %197 : vector<2x12x8xf32> to vector<2x12x8xbf16>
    "tpu.trace_start"() <{level = 10 : i32, message = "bqd,bkd->bqk"}> : () -> ()
    %cst_136 = arith.constant dense<0.000000e+00> : vector<2x12x12xf32>
    %201 = tpu.matmul %199, %200, %cst_136 {dimension_numbers = #tpu.dot_dimension_numbers<[2], [2], [1], [1], [0, 0, 0, 1, 1, 1], [0], [0]>} : vector<2x12x8xbf16>, vector<2x12x8xbf16>, vector<2x12x12xf32> -> vector<2x12x12xf32>
    "tpu.trace_stop"() : () -> ()
    %202 = arith.addf %201, %77 : vector<2x12x12xf32>
    %cst_137 = arith.constant dense<0xFF800000> : vector<2x12xf32>
    %203 = vector.multi_reduction <maximumf>, %202, %cst_137 [2] : vector<2x12x12xf32> to vector<2x12xf32>
    %204 = vector.shape_cast %203 : vector<2x12xf32> to vector<2x12x1xf32>
    %205 = vector.broadcast %204 : vector<2x12x1xf32> to vector<2x12x12xf32>
    %206 = arith.subf %202, %205 : vector<2x12x12xf32>
    %207 = math.exp %206 : vector<2x12x12xf32>
    %cst_138 = arith.constant dense<0.000000e+00> : vector<2x12xf32>
    %208 = vector.multi_reduction <add>, %207, %cst_138 [2] : vector<2x12x12xf32> to vector<2x12xf32>
    %209 = vector.shape_cast %208 : vector<2x12xf32> to vector<2x12x1xf32>
    %210 = tpu.reciprocal %209 {approx = true} : vector<2x12x1xf32> -> vector<2x12x1xf32>
    %211 = vector.broadcast %210 : vector<2x12x1xf32> to vector<2x12x12xf32>
    %212 = arith.mulf %207, %211 : vector<2x12x12xf32>
    %213 = arith.truncf %212 : vector<2x12x12xf32> to vector<2x12x12xbf16>
    %214 = arith.truncf %198 : vector<2x12x8xf32> to vector<2x12x8xbf16>
    "tpu.trace_start"() <{level = 10 : i32, message = "bqk,bkd->bqd"}> : () -> ()
    %cst_139 = arith.constant dense<0.000000e+00> : vector<2x12x8xf32>
    %215 = tpu.matmul %213, %214, %cst_139 {dimension_numbers = #tpu.dot_dimension_numbers<[2], [1], [1], [2], [0, 0, 0, 1, 1, 2], [0], [0]>} : vector<2x12x12xbf16>, vector<2x12x8xbf16>, vector<2x12x8xf32> -> vector<2x12x8xf32>
    "tpu.trace_stop"() : () -> ()
    %216 = vector.extract_strided_slice %215 {offsets = [0, 0, 0], sizes = [1, 12, 8], strides = [1, 1, 1]} : vector<2x12x8xf32> to vector<1x12x8xf32>
    %217 = vector.shape_cast %216 : vector<1x12x8xf32> to vector<12x8xf32>
    %c0_140 = arith.constant 0 : index
    %c24_141 = arith.constant 24 : index
    %218 = vector.load %arg27[%c0_140, %c24_141] : memref<24x32xf32, #tpu.memory_space<vmem>>, vector<12x8xf32>
    tpu.vector_store %arg27[%c0_140, %c24_141], %217 {strides = array<i32>} : memref<24x32xf32, #tpu.memory_space<vmem>>, vector<12x8xf32>,
    %219 = vector.extract_strided_slice %215 {offsets = [1, 0, 0], sizes = [1, 12, 8], strides = [1, 1, 1]} : vector<2x12x8xf32> to vector<1x12x8xf32>
    %220 = vector.shape_cast %219 : vector<1x12x8xf32> to vector<12x8xf32>
    %c12_142 = arith.constant 12 : index
    %c24_143 = arith.constant 24 : index
    %221 = vector.load %arg27[%c12_142, %c24_143] : memref<24x32xf32, #tpu.memory_space<vmem>>, vector<12x8xf32>
    tpu.vector_store %arg27[%c12_142, %c24_143], %220 {strides = array<i32>} : memref<24x32xf32, #tpu.memory_space<vmem>>, vector<12x8xf32>,
    %c0_144 = arith.constant 0 : index
    %c0_145 = arith.constant 0 : index
    %222 = vector.load %arg27[%c0_144, %c0_145] : memref<24x32xf32, #tpu.memory_space<vmem>>, vector<24x32xf32>
    %c0_146 = arith.constant 0 : index
    %c0_147 = arith.constant 0 : index
    %c0_148 = arith.constant 0 : index
    %223 = vector.load %arg13[%c0_146, %c0_147, %c0_148] : memref<2x32x32xbf16, #tpu.memory_space<vmem>>, vector<1x32x32xbf16>
    %224 = vector.shape_cast %223 : vector<1x32x32xbf16> to vector<32x32xbf16>
    %225 = arith.truncf %222 : vector<24x32xf32> to vector<24x32xbf16>
    %cst_149 = arith.constant dense<0.000000e+00> : vector<24x32xf32>
    %226 = tpu.matmul %225, %224, %cst_149 {dimension_numbers = #tpu.dot_dimension_numbers<[1], [0], [0], [1], [0, 0, 1, 1], [], []>} : vector<24x32xbf16>, vector<32x32xbf16>, vector<24x32xf32> -> vector<24x32xf32>
    %227 = arith.addf %66, %226 : vector<24x32xf32>
    %c0_150 = arith.constant 0 : index
    %c0_151 = arith.constant 0 : index
    %c0_152 = arith.constant 0 : index
    %228 = vector.load %arg14[%c0_150, %c0_151, %c0_152] : memref<2x1x32xf32, #tpu.memory_space<vmem>>, vector<1x1x32xf32>
    %229 = vector.shape_cast %228 : vector<1x1x32xf32> to vector<1x32xf32>
    %230 = vector.broadcast %229 : vector<1x32xf32> to vector<24x32xf32>
    %231 = arith.addf %227, %230 : vector<24x32xf32>
    %c0_153 = arith.constant 0 : index
    %c0_154 = arith.constant 0 : index
    %c0_155 = arith.constant 0 : index
    %232 = vector.load %arg15[%c0_153, %c0_154, %c0_155] : memref<2x1x32xf32, #tpu.memory_space<vmem>>, vector<1x1x32xf32>
    %233 = vector.shape_cast %232 : vector<1x1x32xf32> to vector<1x32xf32>
    %c0_156 = arith.constant 0 : index
    %c0_157 = arith.constant 0 : index
    %c0_158 = arith.constant 0 : index
    %234 = vector.load %arg16[%c0_156, %c0_157, %c0_158] : memref<2x1x32xf32, #tpu.memory_space<vmem>>, vector<1x1x32xf32>
    %235 = vector.shape_cast %234 : vector<1x1x32xf32> to vector<1x32xf32>
    %cst_159 = arith.constant dense<0.000000e+00> : vector<24xf32>
    %236 = vector.multi_reduction <add>, %231, %cst_159 [1] : vector<24x32xf32> to vector<24xf32>
    %237 = vector.shape_cast %236 : vector<24xf32> to vector<24x1xf32>
    %cst_160 = arith.constant 3.200000e+01 : f32
    %238 = vector.broadcast %cst_160 : f32 to vector<24x1xf32>
    %239 = arith.divf %237, %238 : vector<24x1xf32>
    %240 = vector.broadcast %239 : vector<24x1xf32> to vector<24x32xf32>
    %241 = arith.subf %231, %240 : vector<24x32xf32>
    %242 = arith.mulf %241, %241 : vector<24x32xf32>
    %cst_161 = arith.constant dense<0.000000e+00> : vector<24xf32>
    %243 = vector.multi_reduction <add>, %242, %cst_161 [1] : vector<24x32xf32> to vector<24xf32>
    %244 = vector.shape_cast %243 : vector<24xf32> to vector<24x1xf32>
    %cst_162 = arith.constant 3.200000e+01 : f32
    %245 = vector.broadcast %cst_162 : f32 to vector<24x1xf32>
    %246 = arith.divf %244, %245 : vector<24x1xf32>
    %cst_163 = arith.constant 9.99999974E-6 : f32
    %247 = vector.broadcast %cst_163 : f32 to vector<24x1xf32>
    %248 = arith.addf %246, %247 : vector<24x1xf32>
    %249 = math.rsqrt %248 : vector<24x1xf32>
    %250 = vector.broadcast %249 : vector<24x1xf32> to vector<24x32xf32>
    %251 = arith.mulf %241, %250 : vector<24x32xf32>
    %252 = vector.broadcast %233 : vector<1x32xf32> to vector<24x32xf32>
    %253 = arith.mulf %251, %252 : vector<24x32xf32>
    %254 = vector.broadcast %235 : vector<1x32xf32> to vector<24x32xf32>
    %255 = arith.addf %253, %254 : vector<24x32xf32>
    %c0_164 = arith.constant 0 : index
    %c0_165 = arith.constant 0 : index
    %c0_166 = arith.constant 0 : index
    %256 = vector.load %arg17[%c0_164, %c0_165, %c0_166] : memref<2x32x128xbf16, #tpu.memory_space<vmem>>, vector<1x32x128xbf16>
    %257 = vector.shape_cast %256 : vector<1x32x128xbf16> to vector<32x128xbf16>
    %258 = arith.truncf %255 : vector<24x32xf32> to vector<24x32xbf16>
    %cst_167 = arith.constant dense<0.000000e+00> : vector<24x128xf32>
    %259 = tpu.matmul %258, %257, %cst_167 {dimension_numbers = #tpu.dot_dimension_numbers<[1], [0], [0], [1], [0, 0, 1, 1], [], []>} : vector<24x32xbf16>, vector<32x128xbf16>, vector<24x128xf32> -> vector<24x128xf32>
    %c0_168 = arith.constant 0 : index
    %c0_169 = arith.constant 0 : index
    %c0_170 = arith.constant 0 : index
    %260 = vector.load %arg18[%c0_168, %c0_169, %c0_170] : memref<2x1x128xf32, #tpu.memory_space<vmem>>, vector<1x1x128xf32>
    %261 = vector.shape_cast %260 : vector<1x1x128xf32> to vector<1x128xf32>
    %262 = vector.broadcast %261 : vector<1x128xf32> to vector<24x128xf32>
    %263 = arith.addf %259, %262 : vector<24x128xf32>
    %cst_171 = arith.constant 5.000000e-01 : f32
    %264 = vector.broadcast %cst_171 : f32 to vector<24x128xf32>
    %265 = arith.mulf %264, %263 : vector<24x128xf32>
    %cst_172 = arith.constant 4.471500e-02 : f32
    %266 = vector.broadcast %cst_172 : f32 to vector<24x128xf32>
    %267 = arith.mulf %266, %263 : vector<24x128xf32>
    %268 = arith.mulf %267, %263 : vector<24x128xf32>
    %269 = arith.mulf %268, %263 : vector<24x128xf32>
    %270 = arith.addf %263, %269 : vector<24x128xf32>
    %cst_173 = arith.constant 0.797884583 : f32
    %271 = vector.broadcast %cst_173 : f32 to vector<24x128xf32>
    %272 = arith.mulf %271, %270 : vector<24x128xf32>
    %273 = math.tanh %272 : vector<24x128xf32>
    %cst_174 = arith.constant 1.000000e+00 : f32
    %274 = vector.broadcast %cst_174 : f32 to vector<24x128xf32>
    %275 = arith.addf %274, %273 : vector<24x128xf32>
    %276 = arith.mulf %265, %275 : vector<24x128xf32>
    %c0_175 = arith.constant 0 : index
    %c0_176 = arith.constant 0 : index
    %c0_177 = arith.constant 0 : index
    %277 = vector.load %arg19[%c0_175, %c0_176, %c0_177] : memref<2x128x32xbf16, #tpu.memory_space<vmem>>, vector<1x128x32xbf16>
    %278 = vector.shape_cast %277 : vector<1x128x32xbf16> to vector<128x32xbf16>
    %279 = arith.truncf %276 : vector<24x128xf32> to vector<24x128xbf16>
    %cst_178 = arith.constant dense<0.000000e+00> : vector<24x32xf32>
    %280 = tpu.matmul %279, %278, %cst_178 {dimension_numbers = #tpu.dot_dimension_numbers<[1], [0], [0], [1], [0, 0, 1, 1], [], []>} : vector<24x128xbf16>, vector<128x32xbf16>, vector<24x32xf32> -> vector<24x32xf32>
    %281 = arith.addf %231, %280 : vector<24x32xf32>
    %c0_179 = arith.constant 0 : index
    %c0_180 = arith.constant 0 : index
    %c0_181 = arith.constant 0 : index
    %282 = vector.load %arg20[%c0_179, %c0_180, %c0_181] : memref<2x1x32xf32, #tpu.memory_space<vmem>>, vector<1x1x32xf32>
    %283 = vector.shape_cast %282 : vector<1x1x32xf32> to vector<1x32xf32>
    %284 = vector.broadcast %283 : vector<1x32xf32> to vector<24x32xf32>
    %285 = arith.addf %281, %284 : vector<24x32xf32>
    %c1_182 = arith.constant 1 : index
    %c0_183 = arith.constant 0 : index
    %c0_184 = arith.constant 0 : index
    %286 = vector.load %arg9[%c1_182, %c0_183, %c0_184] : memref<2x1x32xf32, #tpu.memory_space<vmem>>, vector<1x1x32xf32>
    %287 = vector.shape_cast %286 : vector<1x1x32xf32> to vector<1x32xf32>
    %c1_185 = arith.constant 1 : index
    %c0_186 = arith.constant 0 : index
    %c0_187 = arith.constant 0 : index
    %288 = vector.load %arg10[%c1_185, %c0_186, %c0_187] : memref<2x1x32xf32, #tpu.memory_space<vmem>>, vector<1x1x32xf32>
    %289 = vector.shape_cast %288 : vector<1x1x32xf32> to vector<1x32xf32>
    %cst_188 = arith.constant dense<0.000000e+00> : vector<24xf32>
    %290 = vector.multi_reduction <add>, %285, %cst_188 [1] : vector<24x32xf32> to vector<24xf32>
    %291 = vector.shape_cast %290 : vector<24xf32> to vector<24x1xf32>
    %cst_189 = arith.constant 3.200000e+01 : f32
    %292 = vector.broadcast %cst_189 : f32 to vector<24x1xf32>
    %293 = arith.divf %291, %292 : vector<24x1xf32>
    %294 = vector.broadcast %293 : vector<24x1xf32> to vector<24x32xf32>
    %295 = arith.subf %285, %294 : vector<24x32xf32>
    %296 = arith.mulf %295, %295 : vector<24x32xf32>
    %cst_190 = arith.constant dense<0.000000e+00> : vector<24xf32>
    %297 = vector.multi_reduction <add>, %296, %cst_190 [1] : vector<24x32xf32> to vector<24xf32>
    %298 = vector.shape_cast %297 : vector<24xf32> to vector<24x1xf32>
    %cst_191 = arith.constant 3.200000e+01 : f32
    %299 = vector.broadcast %cst_191 : f32 to vector<24x1xf32>
    %300 = arith.divf %298, %299 : vector<24x1xf32>
    %cst_192 = arith.constant 9.99999974E-6 : f32
    %301 = vector.broadcast %cst_192 : f32 to vector<24x1xf32>
    %302 = arith.addf %300, %301 : vector<24x1xf32>
    %303 = math.rsqrt %302 : vector<24x1xf32>
    %304 = vector.broadcast %303 : vector<24x1xf32> to vector<24x32xf32>
    %305 = arith.mulf %295, %304 : vector<24x32xf32>
    %306 = vector.broadcast %287 : vector<1x32xf32> to vector<24x32xf32>
    %307 = arith.mulf %305, %306 : vector<24x32xf32>
    %308 = vector.broadcast %289 : vector<1x32xf32> to vector<24x32xf32>
    %309 = arith.addf %307, %308 : vector<24x32xf32>
    %c1_193 = arith.constant 1 : index
    %c0_194 = arith.constant 0 : index
    %c0_195 = arith.constant 0 : index
    %310 = vector.load %arg11[%c1_193, %c0_194, %c0_195] : memref<2x32x96xbf16, #tpu.memory_space<vmem>>, vector<1x32x96xbf16>
    %311 = vector.shape_cast %310 : vector<1x32x96xbf16> to vector<32x96xbf16>
    %312 = arith.truncf %309 : vector<24x32xf32> to vector<24x32xbf16>
    %cst_196 = arith.constant dense<0.000000e+00> : vector<24x96xf32>
    %313 = tpu.matmul %312, %311, %cst_196 {dimension_numbers = #tpu.dot_dimension_numbers<[1], [0], [0], [1], [0, 0, 1, 1], [], []>} : vector<24x32xbf16>, vector<32x96xbf16>, vector<24x96xf32> -> vector<24x96xf32>
    %c1_197 = arith.constant 1 : index
    %c0_198 = arith.constant 0 : index
    %c0_199 = arith.constant 0 : index
    %314 = vector.load %arg12[%c1_197, %c0_198, %c0_199] : memref<2x1x96xf32, #tpu.memory_space<vmem>>, vector<1x1x96xf32>
    %315 = vector.shape_cast %314 : vector<1x1x96xf32> to vector<1x96xf32>
    %316 = vector.broadcast %315 : vector<1x96xf32> to vector<24x96xf32>
    %317 = arith.addf %313, %316 : vector<24x96xf32>
    %318 = vector.extract_strided_slice %317 {offsets = [0, 0], sizes = [12, 96], strides = [1, 1]} : vector<24x96xf32> to vector<12x96xf32>
    %c0_200 = arith.constant 0 : index
    %c0_201 = arith.constant 0 : index
    %c0_202 = arith.constant 0 : index
    %319 = vector.load %arg26[%c0_200, %c0_201, %c0_202] : memref<2x12x96xf32, #tpu.memory_space<vmem>>, vector<1x12x96xf32>
    %320 = vector.shape_cast %319 : vector<1x12x96xf32> to vector<12x96xf32>
    %321 = vector.shape_cast %318 : vector<12x96xf32> to vector<1x12x96xf32>
    tpu.vector_store %arg26[%c0_200, %c0_201, %c0_202], %321 {strides = array<i32>} : memref<2x12x96xf32, #tpu.memory_space<vmem>>, vector<1x12x96xf32>,
    %322 = vector.extract_strided_slice %317 {offsets = [12, 0], sizes = [12, 96], strides = [1, 1]} : vector<24x96xf32> to vector<12x96xf32>
    %c1_203 = arith.constant 1 : index
    %c0_204 = arith.constant 0 : index
    %c0_205 = arith.constant 0 : index
    %323 = vector.load %arg26[%c1_203, %c0_204, %c0_205] : memref<2x12x96xf32, #tpu.memory_space<vmem>>, vector<1x12x96xf32>
    %324 = vector.shape_cast %323 : vector<1x12x96xf32> to vector<12x96xf32>
    %325 = vector.shape_cast %322 : vector<12x96xf32> to vector<1x12x96xf32>
    tpu.vector_store %arg26[%c1_203, %c0_204, %c0_205], %325 {strides = array<i32>} : memref<2x12x96xf32, #tpu.memory_space<vmem>>, vector<1x12x96xf32>,
    %c0_206 = arith.constant 0 : index
    %c0_207 = arith.constant 0 : index
    %c0_208 = arith.constant 0 : index
    %326 = vector.load %arg26[%c0_206, %c0_207, %c0_208] : memref<2x12x96xf32, #tpu.memory_space<vmem>>, vector<2x12x8xf32>
    %c0_209 = arith.constant 0 : index
    %c0_210 = arith.constant 0 : index
    %c32_211 = arith.constant 32 : index
    %327 = vector.load %arg26[%c0_209, %c0_210, %c32_211] : memref<2x12x96xf32, #tpu.memory_space<vmem>>, vector<2x12x8xf32>
    %c0_212 = arith.constant 0 : index
    %c0_213 = arith.constant 0 : index
    %c64_214 = arith.constant 64 : index
    %328 = vector.load %arg26[%c0_212, %c0_213, %c64_214] : memref<2x12x96xf32, #tpu.memory_space<vmem>>, vector<2x12x8xf32>
    %329 = arith.truncf %326 : vector<2x12x8xf32> to vector<2x12x8xbf16>
    %330 = arith.truncf %327 : vector<2x12x8xf32> to vector<2x12x8xbf16>
    "tpu.trace_start"() <{level = 10 : i32, message = "bqd,bkd->bqk"}> : () -> ()
    %cst_215 = arith.constant dense<0.000000e+00> : vector<2x12x12xf32>
    %331 = tpu.matmul %329, %330, %cst_215 {dimension_numbers = #tpu.dot_dimension_numbers<[2], [2], [1], [1], [0, 0, 0, 1, 1, 1], [0], [0]>} : vector<2x12x8xbf16>, vector<2x12x8xbf16>, vector<2x12x12xf32> -> vector<2x12x12xf32>
    "tpu.trace_stop"() : () -> ()
    %332 = arith.addf %331, %77 : vector<2x12x12xf32>
    %cst_216 = arith.constant dense<0xFF800000> : vector<2x12xf32>
    %333 = vector.multi_reduction <maximumf>, %332, %cst_216 [2] : vector<2x12x12xf32> to vector<2x12xf32>
    %334 = vector.shape_cast %333 : vector<2x12xf32> to vector<2x12x1xf32>
    %335 = vector.broadcast %334 : vector<2x12x1xf32> to vector<2x12x12xf32>
    %336 = arith.subf %332, %335 : vector<2x12x12xf32>
    %337 = math.exp %336 : vector<2x12x12xf32>
    %cst_217 = arith.constant dense<0.000000e+00> : vector<2x12xf32>
    %338 = vector.multi_reduction <add>, %337, %cst_217 [2] : vector<2x12x12xf32> to vector<2x12xf32>
    %339 = vector.shape_cast %338 : vector<2x12xf32> to vector<2x12x1xf32>
    %340 = tpu.reciprocal %339 {approx = true} : vector<2x12x1xf32> -> vector<2x12x1xf32>
    %341 = vector.broadcast %340 : vector<2x12x1xf32> to vector<2x12x12xf32>
    %342 = arith.mulf %337, %341 : vector<2x12x12xf32>
    %343 = arith.truncf %342 : vector<2x12x12xf32> to vector<2x12x12xbf16>
    %344 = arith.truncf %328 : vector<2x12x8xf32> to vector<2x12x8xbf16>
    "tpu.trace_start"() <{level = 10 : i32, message = "bqk,bkd->bqd"}> : () -> ()
    %cst_218 = arith.constant dense<0.000000e+00> : vector<2x12x8xf32>
    %345 = tpu.matmul %343, %344, %cst_218 {dimension_numbers = #tpu.dot_dimension_numbers<[2], [1], [1], [2], [0, 0, 0, 1, 1, 2], [0], [0]>} : vector<2x12x12xbf16>, vector<2x12x8xbf16>, vector<2x12x8xf32> -> vector<2x12x8xf32>
    "tpu.trace_stop"() : () -> ()
    %346 = vector.extract_strided_slice %345 {offsets = [0, 0, 0], sizes = [1, 12, 8], strides = [1, 1, 1]} : vector<2x12x8xf32> to vector<1x12x8xf32>
    %347 = vector.shape_cast %346 : vector<1x12x8xf32> to vector<12x8xf32>
    %c0_219 = arith.constant 0 : index
    %c0_220 = arith.constant 0 : index
    %348 = vector.load %arg27[%c0_219, %c0_220] : memref<24x32xf32, #tpu.memory_space<vmem>>, vector<12x8xf32>
    tpu.vector_store %arg27[%c0_219, %c0_220], %347 {strides = array<i32>} : memref<24x32xf32, #tpu.memory_space<vmem>>, vector<12x8xf32>,
    %349 = vector.extract_strided_slice %345 {offsets = [1, 0, 0], sizes = [1, 12, 8], strides = [1, 1, 1]} : vector<2x12x8xf32> to vector<1x12x8xf32>
    %350 = vector.shape_cast %349 : vector<1x12x8xf32> to vector<12x8xf32>
    %c12_221 = arith.constant 12 : index
    %c0_222 = arith.constant 0 : index
    %351 = vector.load %arg27[%c12_221, %c0_222] : memref<24x32xf32, #tpu.memory_space<vmem>>, vector<12x8xf32>
    tpu.vector_store %arg27[%c12_221, %c0_222], %350 {strides = array<i32>} : memref<24x32xf32, #tpu.memory_space<vmem>>, vector<12x8xf32>,
    %c0_223 = arith.constant 0 : index
    %c0_224 = arith.constant 0 : index
    %c8_225 = arith.constant 8 : index
    %352 = vector.load %arg26[%c0_223, %c0_224, %c8_225] : memref<2x12x96xf32, #tpu.memory_space<vmem>>, vector<2x12x8xf32>
    %c0_226 = arith.constant 0 : index
    %c0_227 = arith.constant 0 : index
    %c40_228 = arith.constant 40 : index
    %353 = vector.load %arg26[%c0_226, %c0_227, %c40_228] : memref<2x12x96xf32, #tpu.memory_space<vmem>>, vector<2x12x8xf32>
    %c0_229 = arith.constant 0 : index
    %c0_230 = arith.constant 0 : index
    %c72_231 = arith.constant 72 : index
    %354 = vector.load %arg26[%c0_229, %c0_230, %c72_231] : memref<2x12x96xf32, #tpu.memory_space<vmem>>, vector<2x12x8xf32>
    %355 = arith.truncf %352 : vector<2x12x8xf32> to vector<2x12x8xbf16>
    %356 = arith.truncf %353 : vector<2x12x8xf32> to vector<2x12x8xbf16>
    "tpu.trace_start"() <{level = 10 : i32, message = "bqd,bkd->bqk"}> : () -> ()
    %cst_232 = arith.constant dense<0.000000e+00> : vector<2x12x12xf32>
    %357 = tpu.matmul %355, %356, %cst_232 {dimension_numbers = #tpu.dot_dimension_numbers<[2], [2], [1], [1], [0, 0, 0, 1, 1, 1], [0], [0]>} : vector<2x12x8xbf16>, vector<2x12x8xbf16>, vector<2x12x12xf32> -> vector<2x12x12xf32>
    "tpu.trace_stop"() : () -> ()
    %358 = arith.addf %357, %77 : vector<2x12x12xf32>
    %cst_233 = arith.constant dense<0xFF800000> : vector<2x12xf32>
    %359 = vector.multi_reduction <maximumf>, %358, %cst_233 [2] : vector<2x12x12xf32> to vector<2x12xf32>
    %360 = vector.shape_cast %359 : vector<2x12xf32> to vector<2x12x1xf32>
    %361 = vector.broadcast %360 : vector<2x12x1xf32> to vector<2x12x12xf32>
    %362 = arith.subf %358, %361 : vector<2x12x12xf32>
    %363 = math.exp %362 : vector<2x12x12xf32>
    %cst_234 = arith.constant dense<0.000000e+00> : vector<2x12xf32>
    %364 = vector.multi_reduction <add>, %363, %cst_234 [2] : vector<2x12x12xf32> to vector<2x12xf32>
    %365 = vector.shape_cast %364 : vector<2x12xf32> to vector<2x12x1xf32>
    %366 = tpu.reciprocal %365 {approx = true} : vector<2x12x1xf32> -> vector<2x12x1xf32>
    %367 = vector.broadcast %366 : vector<2x12x1xf32> to vector<2x12x12xf32>
    %368 = arith.mulf %363, %367 : vector<2x12x12xf32>
    %369 = arith.truncf %368 : vector<2x12x12xf32> to vector<2x12x12xbf16>
    %370 = arith.truncf %354 : vector<2x12x8xf32> to vector<2x12x8xbf16>
    "tpu.trace_start"() <{level = 10 : i32, message = "bqk,bkd->bqd"}> : () -> ()
    %cst_235 = arith.constant dense<0.000000e+00> : vector<2x12x8xf32>
    %371 = tpu.matmul %369, %370, %cst_235 {dimension_numbers = #tpu.dot_dimension_numbers<[2], [1], [1], [2], [0, 0, 0, 1, 1, 2], [0], [0]>} : vector<2x12x12xbf16>, vector<2x12x8xbf16>, vector<2x12x8xf32> -> vector<2x12x8xf32>
    "tpu.trace_stop"() : () -> ()
    %372 = vector.extract_strided_slice %371 {offsets = [0, 0, 0], sizes = [1, 12, 8], strides = [1, 1, 1]} : vector<2x12x8xf32> to vector<1x12x8xf32>
    %373 = vector.shape_cast %372 : vector<1x12x8xf32> to vector<12x8xf32>
    %c0_236 = arith.constant 0 : index
    %c8_237 = arith.constant 8 : index
    %374 = vector.load %arg27[%c0_236, %c8_237] : memref<24x32xf32, #tpu.memory_space<vmem>>, vector<12x8xf32>
    tpu.vector_store %arg27[%c0_236, %c8_237], %373 {strides = array<i32>} : memref<24x32xf32, #tpu.memory_space<vmem>>, vector<12x8xf32>,
    %375 = vector.extract_strided_slice %371 {offsets = [1, 0, 0], sizes = [1, 12, 8], strides = [1, 1, 1]} : vector<2x12x8xf32> to vector<1x12x8xf32>
    %376 = vector.shape_cast %375 : vector<1x12x8xf32> to vector<12x8xf32>
    %c12_238 = arith.constant 12 : index
    %c8_239 = arith.constant 8 : index
    %377 = vector.load %arg27[%c12_238, %c8_239] : memref<24x32xf32, #tpu.memory_space<vmem>>, vector<12x8xf32>
    tpu.vector_store %arg27[%c12_238, %c8_239], %376 {strides = array<i32>} : memref<24x32xf32, #tpu.memory_space<vmem>>, vector<12x8xf32>,
    %c0_240 = arith.constant 0 : index
    %c0_241 = arith.constant 0 : index
    %c16_242 = arith.constant 16 : index
    %378 = vector.load %arg26[%c0_240, %c0_241, %c16_242] : memref<2x12x96xf32, #tpu.memory_space<vmem>>, vector<2x12x8xf32>
    %c0_243 = arith.constant 0 : index
    %c0_244 = arith.constant 0 : index
    %c48_245 = arith.constant 48 : index
    %379 = vector.load %arg26[%c0_243, %c0_244, %c48_245] : memref<2x12x96xf32, #tpu.memory_space<vmem>>, vector<2x12x8xf32>
    %c0_246 = arith.constant 0 : index
    %c0_247 = arith.constant 0 : index
    %c80_248 = arith.constant 80 : index
    %380 = vector.load %arg26[%c0_246, %c0_247, %c80_248] : memref<2x12x96xf32, #tpu.memory_space<vmem>>, vector<2x12x8xf32>
    %381 = arith.truncf %378 : vector<2x12x8xf32> to vector<2x12x8xbf16>
    %382 = arith.truncf %379 : vector<2x12x8xf32> to vector<2x12x8xbf16>
    "tpu.trace_start"() <{level = 10 : i32, message = "bqd,bkd->bqk"}> : () -> ()
    %cst_249 = arith.constant dense<0.000000e+00> : vector<2x12x12xf32>
    %383 = tpu.matmul %381, %382, %cst_249 {dimension_numbers = #tpu.dot_dimension_numbers<[2], [2], [1], [1], [0, 0, 0, 1, 1, 1], [0], [0]>} : vector<2x12x8xbf16>, vector<2x12x8xbf16>, vector<2x12x12xf32> -> vector<2x12x12xf32>
    "tpu.trace_stop"() : () -> ()
    %384 = arith.addf %383, %77 : vector<2x12x12xf32>
    %cst_250 = arith.constant dense<0xFF800000> : vector<2x12xf32>
    %385 = vector.multi_reduction <maximumf>, %384, %cst_250 [2] : vector<2x12x12xf32> to vector<2x12xf32>
    %386 = vector.shape_cast %385 : vector<2x12xf32> to vector<2x12x1xf32>
    %387 = vector.broadcast %386 : vector<2x12x1xf32> to vector<2x12x12xf32>
    %388 = arith.subf %384, %387 : vector<2x12x12xf32>
    %389 = math.exp %388 : vector<2x12x12xf32>
    %cst_251 = arith.constant dense<0.000000e+00> : vector<2x12xf32>
    %390 = vector.multi_reduction <add>, %389, %cst_251 [2] : vector<2x12x12xf32> to vector<2x12xf32>
    %391 = vector.shape_cast %390 : vector<2x12xf32> to vector<2x12x1xf32>
    %392 = tpu.reciprocal %391 {approx = true} : vector<2x12x1xf32> -> vector<2x12x1xf32>
    %393 = vector.broadcast %392 : vector<2x12x1xf32> to vector<2x12x12xf32>
    %394 = arith.mulf %389, %393 : vector<2x12x12xf32>
    %395 = arith.truncf %394 : vector<2x12x12xf32> to vector<2x12x12xbf16>
    %396 = arith.truncf %380 : vector<2x12x8xf32> to vector<2x12x8xbf16>
    "tpu.trace_start"() <{level = 10 : i32, message = "bqk,bkd->bqd"}> : () -> ()
    %cst_252 = arith.constant dense<0.000000e+00> : vector<2x12x8xf32>
    %397 = tpu.matmul %395, %396, %cst_252 {dimension_numbers = #tpu.dot_dimension_numbers<[2], [1], [1], [2], [0, 0, 0, 1, 1, 2], [0], [0]>} : vector<2x12x12xbf16>, vector<2x12x8xbf16>, vector<2x12x8xf32> -> vector<2x12x8xf32>
    "tpu.trace_stop"() : () -> ()
    %398 = vector.extract_strided_slice %397 {offsets = [0, 0, 0], sizes = [1, 12, 8], strides = [1, 1, 1]} : vector<2x12x8xf32> to vector<1x12x8xf32>
    %399 = vector.shape_cast %398 : vector<1x12x8xf32> to vector<12x8xf32>
    %c0_253 = arith.constant 0 : index
    %c16_254 = arith.constant 16 : index
    %400 = vector.load %arg27[%c0_253, %c16_254] : memref<24x32xf32, #tpu.memory_space<vmem>>, vector<12x8xf32>
    tpu.vector_store %arg27[%c0_253, %c16_254], %399 {strides = array<i32>} : memref<24x32xf32, #tpu.memory_space<vmem>>, vector<12x8xf32>,
    %401 = vector.extract_strided_slice %397 {offsets = [1, 0, 0], sizes = [1, 12, 8], strides = [1, 1, 1]} : vector<2x12x8xf32> to vector<1x12x8xf32>
    %402 = vector.shape_cast %401 : vector<1x12x8xf32> to vector<12x8xf32>
    %c12_255 = arith.constant 12 : index
    %c16_256 = arith.constant 16 : index
    %403 = vector.load %arg27[%c12_255, %c16_256] : memref<24x32xf32, #tpu.memory_space<vmem>>, vector<12x8xf32>
    tpu.vector_store %arg27[%c12_255, %c16_256], %402 {strides = array<i32>} : memref<24x32xf32, #tpu.memory_space<vmem>>, vector<12x8xf32>,
    %c0_257 = arith.constant 0 : index
    %c0_258 = arith.constant 0 : index
    %c24_259 = arith.constant 24 : index
    %404 = vector.load %arg26[%c0_257, %c0_258, %c24_259] : memref<2x12x96xf32, #tpu.memory_space<vmem>>, vector<2x12x8xf32>
    %c0_260 = arith.constant 0 : index
    %c0_261 = arith.constant 0 : index
    %c56_262 = arith.constant 56 : index
    %405 = vector.load %arg26[%c0_260, %c0_261, %c56_262] : memref<2x12x96xf32, #tpu.memory_space<vmem>>, vector<2x12x8xf32>
    %c0_263 = arith.constant 0 : index
    %c0_264 = arith.constant 0 : index
    %c88_265 = arith.constant 88 : index
    %406 = vector.load %arg26[%c0_263, %c0_264, %c88_265] : memref<2x12x96xf32, #tpu.memory_space<vmem>>, vector<2x12x8xf32>
    %407 = arith.truncf %404 : vector<2x12x8xf32> to vector<2x12x8xbf16>
    %408 = arith.truncf %405 : vector<2x12x8xf32> to vector<2x12x8xbf16>
    "tpu.trace_start"() <{level = 10 : i32, message = "bqd,bkd->bqk"}> : () -> ()
    %cst_266 = arith.constant dense<0.000000e+00> : vector<2x12x12xf32>
    %409 = tpu.matmul %407, %408, %cst_266 {dimension_numbers = #tpu.dot_dimension_numbers<[2], [2], [1], [1], [0, 0, 0, 1, 1, 1], [0], [0]>} : vector<2x12x8xbf16>, vector<2x12x8xbf16>, vector<2x12x12xf32> -> vector<2x12x12xf32>
    "tpu.trace_stop"() : () -> ()
    %410 = arith.addf %409, %77 : vector<2x12x12xf32>
    %cst_267 = arith.constant dense<0xFF800000> : vector<2x12xf32>
    %411 = vector.multi_reduction <maximumf>, %410, %cst_267 [2] : vector<2x12x12xf32> to vector<2x12xf32>
    %412 = vector.shape_cast %411 : vector<2x12xf32> to vector<2x12x1xf32>
    %413 = vector.broadcast %412 : vector<2x12x1xf32> to vector<2x12x12xf32>
    %414 = arith.subf %410, %413 : vector<2x12x12xf32>
    %415 = math.exp %414 : vector<2x12x12xf32>
    %cst_268 = arith.constant dense<0.000000e+00> : vector<2x12xf32>
    %416 = vector.multi_reduction <add>, %415, %cst_268 [2] : vector<2x12x12xf32> to vector<2x12xf32>
    %417 = vector.shape_cast %416 : vector<2x12xf32> to vector<2x12x1xf32>
    %418 = tpu.reciprocal %417 {approx = true} : vector<2x12x1xf32> -> vector<2x12x1xf32>
    %419 = vector.broadcast %418 : vector<2x12x1xf32> to vector<2x12x12xf32>
    %420 = arith.mulf %415, %419 : vector<2x12x12xf32>
    %421 = arith.truncf %420 : vector<2x12x12xf32> to vector<2x12x12xbf16>
    %422 = arith.truncf %406 : vector<2x12x8xf32> to vector<2x12x8xbf16>
    "tpu.trace_start"() <{level = 10 : i32, message = "bqk,bkd->bqd"}> : () -> ()
    %cst_269 = arith.constant dense<0.000000e+00> : vector<2x12x8xf32>
    %423 = tpu.matmul %421, %422, %cst_269 {dimension_numbers = #tpu.dot_dimension_numbers<[2], [1], [1], [2], [0, 0, 0, 1, 1, 2], [0], [0]>} : vector<2x12x12xbf16>, vector<2x12x8xbf16>, vector<2x12x8xf32> -> vector<2x12x8xf32>
    "tpu.trace_stop"() : () -> ()
    %424 = vector.extract_strided_slice %423 {offsets = [0, 0, 0], sizes = [1, 12, 8], strides = [1, 1, 1]} : vector<2x12x8xf32> to vector<1x12x8xf32>
    %425 = vector.shape_cast %424 : vector<1x12x8xf32> to vector<12x8xf32>
    %c0_270 = arith.constant 0 : index
    %c24_271 = arith.constant 24 : index
    %426 = vector.load %arg27[%c0_270, %c24_271] : memref<24x32xf32, #tpu.memory_space<vmem>>, vector<12x8xf32>
    tpu.vector_store %arg27[%c0_270, %c24_271], %425 {strides = array<i32>} : memref<24x32xf32, #tpu.memory_space<vmem>>, vector<12x8xf32>,
    %427 = vector.extract_strided_slice %423 {offsets = [1, 0, 0], sizes = [1, 12, 8], strides = [1, 1, 1]} : vector<2x12x8xf32> to vector<1x12x8xf32>
    %428 = vector.shape_cast %427 : vector<1x12x8xf32> to vector<12x8xf32>
    %c12_272 = arith.constant 12 : index
    %c24_273 = arith.constant 24 : index
    %429 = vector.load %arg27[%c12_272, %c24_273] : memref<24x32xf32, #tpu.memory_space<vmem>>, vector<12x8xf32>
    tpu.vector_store %arg27[%c12_272, %c24_273], %428 {strides = array<i32>} : memref<24x32xf32, #tpu.memory_space<vmem>>, vector<12x8xf32>,
    %c0_274 = arith.constant 0 : index
    %c0_275 = arith.constant 0 : index
    %430 = vector.load %arg27[%c0_274, %c0_275] : memref<24x32xf32, #tpu.memory_space<vmem>>, vector<24x32xf32>
    %c1_276 = arith.constant 1 : index
    %c0_277 = arith.constant 0 : index
    %c0_278 = arith.constant 0 : index
    %431 = vector.load %arg13[%c1_276, %c0_277, %c0_278] : memref<2x32x32xbf16, #tpu.memory_space<vmem>>, vector<1x32x32xbf16>
    %432 = vector.shape_cast %431 : vector<1x32x32xbf16> to vector<32x32xbf16>
    %433 = arith.truncf %430 : vector<24x32xf32> to vector<24x32xbf16>
    %cst_279 = arith.constant dense<0.000000e+00> : vector<24x32xf32>
    %434 = tpu.matmul %433, %432, %cst_279 {dimension_numbers = #tpu.dot_dimension_numbers<[1], [0], [0], [1], [0, 0, 1, 1], [], []>} : vector<24x32xbf16>, vector<32x32xbf16>, vector<24x32xf32> -> vector<24x32xf32>
    %435 = arith.addf %285, %434 : vector<24x32xf32>
    %c1_280 = arith.constant 1 : index
    %c0_281 = arith.constant 0 : index
    %c0_282 = arith.constant 0 : index
    %436 = vector.load %arg14[%c1_280, %c0_281, %c0_282] : memref<2x1x32xf32, #tpu.memory_space<vmem>>, vector<1x1x32xf32>
    %437 = vector.shape_cast %436 : vector<1x1x32xf32> to vector<1x32xf32>
    %438 = vector.broadcast %437 : vector<1x32xf32> to vector<24x32xf32>
    %439 = arith.addf %435, %438 : vector<24x32xf32>
    %c1_283 = arith.constant 1 : index
    %c0_284 = arith.constant 0 : index
    %c0_285 = arith.constant 0 : index
    %440 = vector.load %arg15[%c1_283, %c0_284, %c0_285] : memref<2x1x32xf32, #tpu.memory_space<vmem>>, vector<1x1x32xf32>
    %441 = vector.shape_cast %440 : vector<1x1x32xf32> to vector<1x32xf32>
    %c1_286 = arith.constant 1 : index
    %c0_287 = arith.constant 0 : index
    %c0_288 = arith.constant 0 : index
    %442 = vector.load %arg16[%c1_286, %c0_287, %c0_288] : memref<2x1x32xf32, #tpu.memory_space<vmem>>, vector<1x1x32xf32>
    %443 = vector.shape_cast %442 : vector<1x1x32xf32> to vector<1x32xf32>
    %cst_289 = arith.constant dense<0.000000e+00> : vector<24xf32>
    %444 = vector.multi_reduction <add>, %439, %cst_289 [1] : vector<24x32xf32> to vector<24xf32>
    %445 = vector.shape_cast %444 : vector<24xf32> to vector<24x1xf32>
    %cst_290 = arith.constant 3.200000e+01 : f32
    %446 = vector.broadcast %cst_290 : f32 to vector<24x1xf32>
    %447 = arith.divf %445, %446 : vector<24x1xf32>
    %448 = vector.broadcast %447 : vector<24x1xf32> to vector<24x32xf32>
    %449 = arith.subf %439, %448 : vector<24x32xf32>
    %450 = arith.mulf %449, %449 : vector<24x32xf32>
    %cst_291 = arith.constant dense<0.000000e+00> : vector<24xf32>
    %451 = vector.multi_reduction <add>, %450, %cst_291 [1] : vector<24x32xf32> to vector<24xf32>
    %452 = vector.shape_cast %451 : vector<24xf32> to vector<24x1xf32>
    %cst_292 = arith.constant 3.200000e+01 : f32
    %453 = vector.broadcast %cst_292 : f32 to vector<24x1xf32>
    %454 = arith.divf %452, %453 : vector<24x1xf32>
    %cst_293 = arith.constant 9.99999974E-6 : f32
    %455 = vector.broadcast %cst_293 : f32 to vector<24x1xf32>
    %456 = arith.addf %454, %455 : vector<24x1xf32>
    %457 = math.rsqrt %456 : vector<24x1xf32>
    %458 = vector.broadcast %457 : vector<24x1xf32> to vector<24x32xf32>
    %459 = arith.mulf %449, %458 : vector<24x32xf32>
    %460 = vector.broadcast %441 : vector<1x32xf32> to vector<24x32xf32>
    %461 = arith.mulf %459, %460 : vector<24x32xf32>
    %462 = vector.broadcast %443 : vector<1x32xf32> to vector<24x32xf32>
    %463 = arith.addf %461, %462 : vector<24x32xf32>
    %c1_294 = arith.constant 1 : index
    %c0_295 = arith.constant 0 : index
    %c0_296 = arith.constant 0 : index
    %464 = vector.load %arg17[%c1_294, %c0_295, %c0_296] : memref<2x32x128xbf16, #tpu.memory_space<vmem>>, vector<1x32x128xbf16>
    %465 = vector.shape_cast %464 : vector<1x32x128xbf16> to vector<32x128xbf16>
    %466 = arith.truncf %463 : vector<24x32xf32> to vector<24x32xbf16>
    %cst_297 = arith.constant dense<0.000000e+00> : vector<24x128xf32>
    %467 = tpu.matmul %466, %465, %cst_297 {dimension_numbers = #tpu.dot_dimension_numbers<[1], [0], [0], [1], [0, 0, 1, 1], [], []>} : vector<24x32xbf16>, vector<32x128xbf16>, vector<24x128xf32> -> vector<24x128xf32>
    %c1_298 = arith.constant 1 : index
    %c0_299 = arith.constant 0 : index
    %c0_300 = arith.constant 0 : index
    %468 = vector.load %arg18[%c1_298, %c0_299, %c0_300] : memref<2x1x128xf32, #tpu.memory_space<vmem>>, vector<1x1x128xf32>
    %469 = vector.shape_cast %468 : vector<1x1x128xf32> to vector<1x128xf32>
    %470 = vector.broadcast %469 : vector<1x128xf32> to vector<24x128xf32>
    %471 = arith.addf %467, %470 : vector<24x128xf32>
    %cst_301 = arith.constant 5.000000e-01 : f32
    %472 = vector.broadcast %cst_301 : f32 to vector<24x128xf32>
    %473 = arith.mulf %472, %471 : vector<24x128xf32>
    %cst_302 = arith.constant 4.471500e-02 : f32
    %474 = vector.broadcast %cst_302 : f32 to vector<24x128xf32>
    %475 = arith.mulf %474, %471 : vector<24x128xf32>
    %476 = arith.mulf %475, %471 : vector<24x128xf32>
    %477 = arith.mulf %476, %471 : vector<24x128xf32>
    %478 = arith.addf %471, %477 : vector<24x128xf32>
    %cst_303 = arith.constant 0.797884583 : f32
    %479 = vector.broadcast %cst_303 : f32 to vector<24x128xf32>
    %480 = arith.mulf %479, %478 : vector<24x128xf32>
    %481 = math.tanh %480 : vector<24x128xf32>
    %cst_304 = arith.constant 1.000000e+00 : f32
    %482 = vector.broadcast %cst_304 : f32 to vector<24x128xf32>
    %483 = arith.addf %482, %481 : vector<24x128xf32>
    %484 = arith.mulf %473, %483 : vector<24x128xf32>
    %c1_305 = arith.constant 1 : index
    %c0_306 = arith.constant 0 : index
    %c0_307 = arith.constant 0 : index
    %485 = vector.load %arg19[%c1_305, %c0_306, %c0_307] : memref<2x128x32xbf16, #tpu.memory_space<vmem>>, vector<1x128x32xbf16>
    %486 = vector.shape_cast %485 : vector<1x128x32xbf16> to vector<128x32xbf16>
    %487 = arith.truncf %484 : vector<24x128xf32> to vector<24x128xbf16>
    %cst_308 = arith.constant dense<0.000000e+00> : vector<24x32xf32>
    %488 = tpu.matmul %487, %486, %cst_308 {dimension_numbers = #tpu.dot_dimension_numbers<[1], [0], [0], [1], [0, 0, 1, 1], [], []>} : vector<24x128xbf16>, vector<128x32xbf16>, vector<24x32xf32> -> vector<24x32xf32>
    %489 = arith.addf %439, %488 : vector<24x32xf32>
    %c1_309 = arith.constant 1 : index
    %c0_310 = arith.constant 0 : index
    %c0_311 = arith.constant 0 : index
    %490 = vector.load %arg20[%c1_309, %c0_310, %c0_311] : memref<2x1x32xf32, #tpu.memory_space<vmem>>, vector<1x1x32xf32>
    %491 = vector.shape_cast %490 : vector<1x1x32xf32> to vector<1x32xf32>
    %492 = vector.broadcast %491 : vector<1x32xf32> to vector<24x32xf32>
    %493 = arith.addf %489, %492 : vector<24x32xf32>
    %c0_312 = arith.constant 0 : index
    %c0_313 = arith.constant 0 : index
    %494 = vector.load %arg21[%c0_312, %c0_313] : memref<1x32xf32, #tpu.memory_space<vmem>>, vector<1x32xf32>
    %c0_314 = arith.constant 0 : index
    %c0_315 = arith.constant 0 : index
    %495 = vector.load %arg22[%c0_314, %c0_315] : memref<1x32xf32, #tpu.memory_space<vmem>>, vector<1x32xf32>
    %cst_316 = arith.constant dense<0.000000e+00> : vector<24xf32>
    %496 = vector.multi_reduction <add>, %493, %cst_316 [1] : vector<24x32xf32> to vector<24xf32>
    %497 = vector.shape_cast %496 : vector<24xf32> to vector<24x1xf32>
    %cst_317 = arith.constant 3.200000e+01 : f32
    %498 = vector.broadcast %cst_317 : f32 to vector<24x1xf32>
    %499 = arith.divf %497, %498 : vector<24x1xf32>
    %500 = vector.broadcast %499 : vector<24x1xf32> to vector<24x32xf32>
    %501 = arith.subf %493, %500 : vector<24x32xf32>
    %502 = arith.mulf %501, %501 : vector<24x32xf32>
    %cst_318 = arith.constant dense<0.000000e+00> : vector<24xf32>
    %503 = vector.multi_reduction <add>, %502, %cst_318 [1] : vector<24x32xf32> to vector<24xf32>
    %504 = vector.shape_cast %503 : vector<24xf32> to vector<24x1xf32>
    %cst_319 = arith.constant 3.200000e+01 : f32
    %505 = vector.broadcast %cst_319 : f32 to vector<24x1xf32>
    %506 = arith.divf %504, %505 : vector<24x1xf32>
    %cst_320 = arith.constant 9.99999974E-6 : f32
    %507 = vector.broadcast %cst_320 : f32 to vector<24x1xf32>
    %508 = arith.addf %506, %507 : vector<24x1xf32>
    %509 = math.rsqrt %508 : vector<24x1xf32>
    %510 = vector.broadcast %509 : vector<24x1xf32> to vector<24x32xf32>
    %511 = arith.mulf %501, %510 : vector<24x32xf32>
    %512 = vector.broadcast %494 : vector<1x32xf32> to vector<24x32xf32>
    %513 = arith.mulf %511, %512 : vector<24x32xf32>
    %514 = vector.broadcast %495 : vector<1x32xf32> to vector<24x32xf32>
    %515 = arith.addf %513, %514 : vector<24x32xf32>
    %c0_321 = arith.constant 0 : index
    %c0_322 = arith.constant 0 : index
    %516 = vector.load %arg23[%c0_321, %c0_322] : memref<32x128xbf16, #tpu.memory_space<vmem>>, vector<32x128xbf16>
    %517 = arith.truncf %515 : vector<24x32xf32> to vector<24x32xbf16>
    %cst_323 = arith.constant dense<0.000000e+00> : vector<24x128xf32>
    %518 = tpu.matmul %517, %516, %cst_323 {dimension_numbers = #tpu.dot_dimension_numbers<[1], [0], [0], [1], [0, 0, 1, 1], [], []>} : vector<24x32xbf16>, vector<32x128xbf16>, vector<24x128xf32> -> vector<24x128xf32>
    %c0_324 = arith.constant 0 : index
    %c0_325 = arith.constant 0 : index
    %519 = vector.load %arg24[%c0_324, %c0_325] : memref<24x128xf32, #tpu.memory_space<vmem>>, vector<24x128xf32>
    tpu.vector_store %arg24[%c0_324, %c0_325], %518 {strides = array<i32>} : memref<24x128xf32, #tpu.memory_space<vmem>>, vector<24x128xf32>,
    return
  }
  func.func @transform_0(%arg0: i32) -> (i32, i32) {
    %c0_i32 = arith.constant 0 : i32
    %c0_i32_0 = arith.constant 0 : i32
    return %arg0, %c0_i32 : i32, i32
  }
  func.func @transform_1(%arg0: i32) -> (i32, i32, i32) {
    %c0_i32 = arith.constant 0 : i32
    %c0_i32_0 = arith.constant 0 : i32
    %c0_i32_1 = arith.constant 0 : i32
    return %arg0, %c0_i32, %c0_i32_0 : i32, i32, i32
  }
  func.func @transform_2(%arg0: i32) -> (i32, i32, i32) {
    %c0_i32 = arith.constant 0 : i32
    %c0_i32_0 = arith.constant 0 : i32
    %c0_i32_1 = arith.constant 0 : i32
    return %arg0, %c0_i32, %c0_i32_0 : i32, i32, i32
  }
  func.func @transform_3(%arg0: i32) -> (i32, i32) {
    %c0_i32 = arith.constant 0 : i32
    %c0_i32_0 = arith.constant 0 : i32
    %c0_i32_1 = arith.constant 0 : i32
    return %c0_i32, %c0_i32_0 : i32, i32
  }
  func.func @transform_4(%arg0: i32) -> (i32, i32) {
    %c0_i32 = arith.constant 0 : i32
    %c0_i32_0 = arith.constant 0 : i32
    %c0_i32_1 = arith.constant 0 : i32
    return %c0_i32, %c0_i32_0 : i32, i32
  }
  func.func @transform_5(%arg0: i32) -> (i32, i32) {
    %c0_i32 = arith.constant 0 : i32
    %c0_i32_0 = arith.constant 0 : i32
    %c0_i32_1 = arith.constant 0 : i32
    return %c0_i32, %c0_i32_0 : i32, i32
  }
  func.func @transform_6(%arg0: i32) -> (i32, i32, i32) {
    %c0_i32 = arith.constant 0 : i32
    %c0_i32_0 = arith.constant 0 : i32
    %c0_i32_1 = arith.constant 0 : i32
    %c0_i32_2 = arith.constant 0 : i32
    return %c0_i32, %c0_i32_0, %c0_i32_1 : i32, i32, i32
  }
  func.func @transform_7(%arg0: i32) -> (i32, i32, i32) {
    %c0_i32 = arith.constant 0 : i32
    %c0_i32_0 = arith.constant 0 : i32
    %c0_i32_1 = arith.constant 0 : i32
    %c0_i32_2 = arith.constant 0 : i32
    return %c0_i32, %c0_i32_0, %c0_i32_1 : i32, i32, i32
  }
  func.func @transform_8(%arg0: i32) -> (i32, i32, i32) {
    %c0_i32 = arith.constant 0 : i32
    %c0_i32_0 = arith.constant 0 : i32
    %c0_i32_1 = arith.constant 0 : i32
    %c0_i32_2 = arith.constant 0 : i32
    return %c0_i32, %c0_i32_0, %c0_i32_1 : i32, i32, i32
  }
  func.func @transform_9(%arg0: i32) -> (i32, i32, i32) {
    %c0_i32 = arith.constant 0 : i32
    %c0_i32_0 = arith.constant 0 : i32
    %c0_i32_1 = arith.constant 0 : i32
    %c0_i32_2 = arith.constant 0 : i32
    return %c0_i32, %c0_i32_0, %c0_i32_1 : i32, i32, i32
  }
  func.func @transform_10(%arg0: i32) -> (i32, i32, i32) {
    %c0_i32 = arith.constant 0 : i32
    %c0_i32_0 = arith.constant 0 : i32
    %c0_i32_1 = arith.constant 0 : i32
    %c0_i32_2 = arith.constant 0 : i32
    return %c0_i32, %c0_i32_0, %c0_i32_1 : i32, i32, i32
  }
  func.func @transform_11(%arg0: i32) -> (i32, i32, i32) {
    %c0_i32 = arith.constant 0 : i32
    %c0_i32_0 = arith.constant 0 : i32
    %c0_i32_1 = arith.constant 0 : i32
    %c0_i32_2 = arith.constant 0 : i32
    return %c0_i32, %c0_i32_0, %c0_i32_1 : i32, i32, i32
  }
  func.func @transform_12(%arg0: i32) -> (i32, i32, i32) {
    %c0_i32 = arith.constant 0 : i32
    %c0_i32_0 = arith.constant 0 : i32
    %c0_i32_1 = arith.constant 0 : i32
    %c0_i32_2 = arith.constant 0 : i32
    return %c0_i32, %c0_i32_0, %c0_i32_1 : i32, i32, i32
  }
  func.func @transform_13(%arg0: i32) -> (i32, i32, i32) {
    %c0_i32 = arith.constant 0 : i32
    %c0_i32_0 = arith.constant 0 : i32
    %c0_i32_1 = arith.constant 0 : i32
    %c0_i32_2 = arith.constant 0 : i32
    return %c0_i32, %c0_i32_0, %c0_i32_1 : i32, i32, i32
  }
  func.func @transform_14(%arg0: i32) -> (i32, i32, i32) {
    %c0_i32 = arith.constant 0 : i32
    %c0_i32_0 = arith.constant 0 : i32
    %c0_i32_1 = arith.constant 0 : i32
    %c0_i32_2 = arith.constant 0 : i32
    return %c0_i32, %c0_i32_0, %c0_i32_1 : i32, i32, i32
  }
  func.func @transform_15(%arg0: i32) -> (i32, i32, i32) {
    %c0_i32 = arith.constant 0 : i32
    %c0_i32_0 = arith.constant 0 : i32
    %c0_i32_1 = arith.constant 0 : i32
    %c0_i32_2 = arith.constant 0 : i32
    return %c0_i32, %c0_i32_0, %c0_i32_1 : i32, i32, i32
  }
  func.func @transform_16(%arg0: i32) -> (i32, i32, i32) {
    %c0_i32 = arith.constant 0 : i32
    %c0_i32_0 = arith.constant 0 : i32
    %c0_i32_1 = arith.constant 0 : i32
    %c0_i32_2 = arith.constant 0 : i32
    return %c0_i32, %c0_i32_0, %c0_i32_1 : i32, i32, i32
  }
  func.func @transform_17(%arg0: i32) -> (i32, i32, i32) {
    %c0_i32 = arith.constant 0 : i32
    %c0_i32_0 = arith.constant 0 : i32
    %c0_i32_1 = arith.constant 0 : i32
    %c0_i32_2 = arith.constant 0 : i32
    return %c0_i32, %c0_i32_0, %c0_i32_1 : i32, i32, i32
  }
  func.func @transform_18(%arg0: i32) -> (i32, i32, i32) {
    %c0_i32 = arith.constant 0 : i32
    %c0_i32_0 = arith.constant 0 : i32
    %c0_i32_1 = arith.constant 0 : i32
    %c0_i32_2 = arith.constant 0 : i32
    return %c0_i32, %c0_i32_0, %c0_i32_1 : i32, i32, i32
  }
  func.func @transform_19(%arg0: i32) -> (i32, i32, i32) {
    %c0_i32 = arith.constant 0 : i32
    %c0_i32_0 = arith.constant 0 : i32
    %c0_i32_1 = arith.constant 0 : i32
    %c0_i32_2 = arith.constant 0 : i32
    return %c0_i32, %c0_i32_0, %c0_i32_1 : i32, i32, i32
  }
  func.func @transform_20(%arg0: i32) -> (i32, i32) {
    %c0_i32 = arith.constant 0 : i32
    %c0_i32_0 = arith.constant 0 : i32
    %c0_i32_1 = arith.constant 0 : i32
    return %c0_i32, %c0_i32_0 : i32, i32
  }
  func.func @transform_21(%arg0: i32) -> (i32, i32) {
    %c0_i32 = arith.constant 0 : i32
    %c0_i32_0 = arith.constant 0 : i32
    %c0_i32_1 = arith.constant 0 : i32
    return %c0_i32, %c0_i32_0 : i32, i32
  }
  func.func @transform_22(%arg0: i32) -> (i32, i32) {
    %c0_i32 = arith.constant 0 : i32
    %c0_i32_0 = arith.constant 0 : i32
    %c0_i32_1 = arith.constant 0 : i32
    return %c0_i32, %c0_i32_0 : i32, i32
  }
  func.func @transform_23(%arg0: i32) -> (i32, i32) {
    %c0_i32 = arith.constant 0 : i32
    %c0_i32_0 = arith.constant 0 : i32
    return %arg0, %c0_i32 : i32, i32
  }
}

</mosaic_0001>

<bundles_post_ra>
// kernel: tpu_custom_call.1
= control target key start
LH: loop header
LB: loop body
LE: loop exit
PB: predicated region body
PF: predicated region fallthrough
CT: control target
= control target key end

     0   :  { %s4558_s0 = inlined_call_operand.vmem [shape: f32[2,16], index: 0, kind: input, shape index: {}]   ;;  %s4559_s1 = inlined_call_operand.vmem [shape: f32[2,8,32], index: 1, kind: input, shape index: {}]   ;;  %s4560_s2 = inlined_call_operand.vmem [shape: f32[2,1,12], index: 2, kind: input, shape index: {}]   ;;  %s4561_s3 = inlined_call_operand.vmem [shape: f32[8,32], index: 3, kind: input, shape index: {}]   ;;  %s4562_s4 = inlined_call_operand.vmem [shape: bf16[16,64], index: 4, kind: input, shape index: {}]   ;;  %s4563_s5 = inlined_call_operand.vmem [shape: f32[1,64], index: 5, kind: input, shape index: {}]   ;;  %s4564_s6 = inlined_call_operand.vmem [shape: bf16[4,64,32], index: 6, kind: input, shape index: {}]   ;;  %s4565_s7 = inlined_call_operand.vmem [shape: f32[4,1,32], index: 7, kind: input, shape index: {}]   ;;  %s4566_s8 = inlined_call_operand.vmem [shape: f32[2,1,32], index: 8, kind: input, shape index: {}]   ;;  %s4567_s9 = inlined_call_operand.vmem [shape: f32[2,1,32], index: 9, kind: input, shape index: {}]   ;;  %s4568_s10 = inlined_call_operand.vmem [shape: bf16[2,32,96], index: 10, kind: input, shape index: {}]   ;;  %s4569_s11 = inlined_call_operand.vmem [shape: f32[2,1,96], index: 11, kind: input, shape index: {}]   ;;  %s4570_s12 = inlined_call_operand.vmem [shape: bf16[2,32,32], index: 12, kind: input, shape index: {}]   ;;  %s4571_s13 = inlined_call_operand.vmem [shape: f32[2,1,32], index: 13, kind: input, shape index: {}]   ;;  %s4572_s14 = inlined_call_operand.vmem [shape: f32[2,1,32], index: 14, kind: input, shape index: {}]   ;;  %s4573_s15 = inlined_call_operand.vmem [shape: f32[2,1,32], index: 15, kind: input, shape index: {}]   ;;  %s4574_s16 = inlined_call_operand.vmem [shape: bf16[2,32,128], index: 16, kind: input, shape index: {}]   ;;  %s4575_s17 = inlined_call_operand.vmem [shape: f32[2,1,128], index: 17, kind: input, shape index: {}]   ;;  %s4576_s18 = inlined_call_operand.vmem [shape: bf16[2,128,32], index: 18, kind: input, shape index: {}]   ;;  %s4577_s19 = inlined_call_operand.vmem [shape: f32[2,1,32], index: 19, kind: input, shape index: {}]   ;;  %s4578_s20 = inlined_call_operand.vmem [shape: f32[1,32], index: 20, kind: input, shape index: {}]   ;;  %s4579_s21 = inlined_call_operand.vmem [shape: f32[1,32], index: 21, kind: input, shape index: {}]   ;;  %s4580_s22 = inlined_call_operand.vmem [shape: bf16[32,128], index: 22, kind: input, shape index: {}]   ;;  %s4581_s23 = inlined_call_operand.hbm [shape: f32[24,128], index: 23, kind: output, shape index: {}]  }
   0x1   :  { %4610 = sst [smem:[#allocation8_spill]] %s4558_s0 }
   0x2   :  { %4611 = sst [smem:[#allocation9_spill]] %s4559_s1 }
   0x3   :  { %4612 = sst [smem:[#allocation10_spill]] %s4560_s2 }
   0x4   :  { %4613 = sst [smem:[#allocation11_spill]] %s4561_s3 }
   0x5   :  { %4614 = sst [smem:[#allocation12_spill]] %s4562_s4 }
   0x6   :  { %4615 = sst [smem:[#allocation13_spill]] %s4563_s5 }
   0x7   :  { %4616 = sst [smem:[#allocation14_spill]] %s4564_s6 }
   0x8   :  { %4617 = sst [smem:[#allocation15_spill]] %s4565_s7 }
   0x9   :  { %4618 = sst [smem:[#allocation16_spill]] %s4575_s17 }
   0xa   :  { %s4619_s24 = sld [smem:[#allocation12_spill]]  ;;  %vm100_vm0 = vcmask 130048  }
   0xb   :  { %s4620_s17 = sld [smem:[#allocation8_spill]] }
   0xc   :  { %s4621_s2 = sld [smem:[#allocation14_spill]] }
  0x10   :  { %v3171_v0 = vld [vmem:[%s4619_s24] sm:$0xff] }
  0x11   :  { %v86_v1 = vld [vmem:[%s4620_s17] sm:$0x3]  ;;  %111 = vmatpush.bf16.msra.mxu0 %v3171_v0 }
  0x12   :  { %v3175_v2 = vld [vmem:[%s4621_s2 + $0x18] sm:$0xff]  ;;  %v89_v3 = vpack.c.bf16 %v86_v1, %v86_v1 }
  0x13   :  { %v3179_v4 = vld [vmem:[%s4621_s2 + $0x38] sm:$0xff]  ;;  %163 = vmatpush.bf16.msra.mxu1 %v3175_v2 }
  0x14   :  { %v3183_v5 = vld [vmem:[%s4621_s2 + $0x58] sm:$0xff]  ;;  %2873 = vmatmul.msk.bf16.vlgmr.msra.gmra.mxu0 %vm100_vm0, %v89_v3 }
  0x15   :  { %218 = vmatpush.bf16.msrb.mxu0 %v3179_v4  ;;  %271 = vmatpush.bf16.msra.mxu3 %v3183_v5 }
  0x16   :  { %28 = vsyncpa [#allocation6], 0  ;;  %v3174_v6 = vld [vmem:[%s4621_s2 + $0x10] sm:$0xff]  ;;  %v3173_v9 = vld [vmem:[%s4621_s2 + $0x8] sm:$0xff]  ;;  %s4622_s7 = sld [smem:[#allocation13_spill]]  ;;  %vm155_vm1 = vcmask 523264  }
  0x17   :  { %v3178_v7 = vld [vmem:[%s4621_s2 + $0x30] sm:$0xff]  ;;  %164 = vmatpush.bf16.msra.mxu1 %v3174_v6  ;;  %v3177_v10 = vld [vmem:[%s4621_s2 + $0x28] sm:$0xff]  ;;  %v3172_v12 = vld [vmem:[%s4621_s2] sm:$0xff]  ;;  %s4623_s29 = sld [smem:[#allocation9_spill]]  ;;  %vm79_vm2 = vcmask 261120   ;;  %vm172_vm3 = vcmask 253952  }
  0x18   :  { %v3182_v8 = vld [vmem:[%s4621_s2 + $0x50] sm:$0xff]  ;;  %v3181_v11 = vld [vmem:[%s4621_s2 + $0x48] sm:$0xff]  ;;  %v3176_v13 = vld [vmem:[%s4621_s2 + $0x20] sm:$0xff]  ;;  %s4624_s0 = sld [smem:[#allocation11_spill]]  ;;  %vm174_vm4 = vcmask 254977   ;;  %v3463_v52 = vmov 32.0  }
  0x19   :  { %219 = vmatpush.bf16.msrb.mxu0 %v3178_v7  ;;  %272 = vmatpush.bf16.msra.mxu3 %v3182_v8  ;;  %v3180_v14 = vld [vmem:[%s4621_s2 + $0x40] sm:$0xff]  ;;  %v3187_v15 = vld [vmem:[%s4621_s2 + $0x78] sm:$0xff]  ;;  %v3186_v16 = vld [vmem:[%s4621_s2 + $0x70] sm:$0xff]  ;;  %s4625_s24 = sld [smem:[#allocation15_spill]]  ;;  %vm496_vm15 = vcmask 785408   ;;  %vm498_vm0 = vcmask 781312  }
  0x1a   :  { %v3185_v17 = vld [vmem:[%s4621_s2 + $0x68] sm:$0xff]  ;;  %v3184_v18 = vld [vmem:[%s4621_s2 + $0x60] sm:$0xff]  ;;  %s4606_s1 = smov 64   ;;  %s3465_s26 = smov 96  }
  0x1b   :  { %165 = vmatpush.bf16.msra.mxu1 %v3173_v9  ;;  %s3468_s28 = smov 88   ;;  %s3469_s17 = smov 120  }
  0x1c   :  { %v3237_v19 = vld [vmem:[%s4622_s7] ss:$0 sm:$0xff]  ;;  %s4626_s7 = sld [smem:[#allocation10_spill]]  ;;  %s4604_s2 = smov 72  }
  0x1d   :  { %220 = vmatpush.bf16.msrb.mxu0 %v3177_v10  ;;  %273 = vmatpush.bf16.msra.mxu3 %v3181_v11  ;;  %v76_v25 = vld [vmem:[%s4623_s29] sm:$0xff]  ;;  %v2868_v35 = vld [vmem:[%s4623_s29 + $0x8] sm:$0xff]  ;;  %s4608_s29 = smov 112   ;;  %s3472_s3 = smov 80  }
  0x1e   :  { %v77_v26 = vld [vmem:[%s4624_s0] sm:$0xff]  ;;  %s3473_s0 = smov 104   ;;  %s4600_s25 = smov 48  }
  0x1f   :  { %166 = vmatpush.bf16.msra.mxu1 %v3172_v12  ;;  %v78_v27 = vadd.f32 %v77_v26, %v76_v25  ;;  %v3238_v28 = vld [vmem:[%s4625_s24] ss:$0 sm:$0xff]  ;;  %v3239_v29 = vld [vmem:[%s4625_s24 + $0x1] ss:$0 sm:$0xff]  ;;  %v3240_v34 = vld [vmem:[%s4625_s24 + $0x2] ss:$0 sm:$0xff]  ;;  %v84_v36 = vadd.f32 %v2868_v35, %v77_v26 }
  0x20   :  { %v3241_v41 = vld [vmem:[%s4625_s24 + $0x3] ss:$0 sm:$0xff]  ;;  %v3189_v12 = vld [vmem:[%s4568_s10 + $0x8] sm:$0xff]  ;;  %s4602_s24 = smov 56   ;;  %s4598_s5 = smov 40  }
  0x21   :  { %221 = vmatpush.bf16.msrb.mxu0 %v3176_v13  ;;  %274 = vmatpush.bf16.msra.mxu3 %v3180_v14  ;;  %80 = vst.msk [vmem:[#allocation2 + $0x4] sm:$0xff] %vm79_vm2, %v78_v27  ;;  %s4596_s6 = smov 8   ;;  %s4589_s27 = smov 16  }
  0x22   :  { %85 = vst.msk [vmem:[#allocation2 + $0x10] sm:$0xff] %vm79_vm2, %v84_v36 }
  0x23   :  { %484 = vmatpush.bf16.msrb.mxu1 %v3189_v12  ;;  %v338_v12 = vlaneseq }
  0x25   :  { %324 = vmatpush.bf16.msra.mxu0 %v3187_v15  ;;  %v3188_v15 = vld [vmem:[%s4568_s10] sm:$0xff] }
  0x27   :  { %485 = vmatpush.bf16.msrb.mxu1 %v3188_v15  ;;  %v3742_v15 = vshrl.u32 %v338_v12, 7 }
  0x29   :  { %325 = vmatpush.bf16.msra.mxu0 %v3186_v16  ;;  %v337_v42 = vld [vmem:[#allocation2 + $0x10] sm:$0xff] }
  0x2a   :  { %v371_v44 = vsel %vm79_vm2, %v337_v42, 0.0 }
  0x2b   :  { %372 = vadd.xlane.f32.xlu2 %v371_v44  ;;  %v3243_v44 = vld [vmem:[%s4567_s9] ss:$0 sm:$0xff] }
  0x2d   :  { %326 = vmatpush.bf16.msra.mxu0 %v3185_v17 }
  0x31   :  { %327 = vmatpush.bf16.msra.mxu0 %v3184_v18 }
  0x91   :  { %v113_v20 = vpop.f32.mrf.mxu0 }
  0x92   :  { %v114_v21 = vadd.f32 %v3237_v19, %v113_v20 }
  0x94   :  { %3260 = vtanh.f32 %v114_v21 }
  0x95   :  { %3262 = vrcp.f32 %v3463_v52 }
  0x99   :  { %v115_v22 = vpop.f32.mrf.mxu0 }
  0x9a   :  { %v3261_v23 = vpop.eup %3260 }
  0x9b   :  { %v126_v24 = vpack.c.bf16 %v3261_v23, %v3261_v23  ;;  %v3263_v53 = vpop.eup %3262 }
  0x9c   :  { %v375_v54 = vmul.f32 32.0, %v3263_v53  ;;  %vm379_vm5 = vweird.f32 %v3263_v53 }
  0x9d   :  { %2890 = vmatmul.msk.bf16.vlgmr.msra.gmra.mxu1 %vm155_vm1, %v126_v24  ;;  %2916 = vmatmul.msk.bf16.vlgmr.msrb.gmra.mxu0 %vm155_vm1, %v126_v24 }
  0x9e   :  { %2942 = vmatmul.msk.bf16.vlgmr.msra.gmra.mxu3 %vm155_vm1, %v126_v24  ;;  %v376_v55 = vsub.f32 1.0, %v375_v54  ;;  %v373_v59 = vpop.xlane.xlu2 %372 }
  0xa0   :  { %v377_v56 = vmul.f32 %v3263_v53, %v376_v55  ;;  %v3244_v55 = vld [vmem:[%s4569_s11] ss:$0 sm:$0xff] }
  0xa2   :  { %v378_v57 = vadd.f32 %v3263_v53, %v377_v56 }
  0xa4   :  { %v3693_v58 = vsel %vm379_vm5, %v3263_v53, %v378_v57 }
  0xa5   :  { %v383_v60 = vmul.f32 %v3693_v58, %v373_v59 }
  0xa7   :  { %v3696_v61 = vsub.f32 %v337_v42, %v383_v60 }
  0xa9   :  { %v389_v62 = vmul.f32 %v3696_v61, %v3696_v61 }
  0xab   :  { %v396_v63 = vsel %vm79_vm2, %v389_v62, 0.0 }
  0xad   :  { %2968 = vmatmul.msk.bf16.vlgmr.msra.gmra.mxu0 %vm155_vm1, %v126_v24  ;;  %vm501_vm1 = vcmask 785412  }
 0x11a   :  { %v168_v30 = vpop.f32.mrf.mxu1  ;;  %v223_v31 = vpop.f32.mrf.mxu0 }
 0x11b   :  { %v169_v32 = vadd.f32 %v3238_v28, %v168_v30  ;;  %v224_v33 = vadd.f32 %v3239_v29, %v223_v31 }
 0x11d   :  { %173 = vst.msk [vmem:[#allocation2] sm:$0x1] %vm172_vm3, %v169_v32 }
 0x11e   :  { %175 = vst.msk [vmem:[#allocation2 + $0xb] sm:$0x2] %vm174_vm4, %v169_v32 }
 0x11f   :  { %227 = vst.msk [vmem:[#allocation2 + $0x1] sm:$0x1] %vm172_vm3, %v224_v33 }
 0x120   :  { %228 = vst.msk [vmem:[#allocation2 + $0xc] sm:$0x2] %vm174_vm4, %v224_v33 }
 0x121   :  { %v276_v37 = vpop.f32.mrf.mxu3 }
 0x122   :  { %v277_v38 = vadd.f32 %v3240_v34, %v276_v37  ;;  %v170_v39 = vpop.f32.mrf.mxu1  ;;  %v225_v40 = vpop.f32.mrf.mxu0 }
 0x124   :  { %280 = vst.msk [vmem:[#allocation2 + $0x2] sm:$0x1] %vm172_vm3, %v277_v38 }
 0x125   :  { %281 = vst.msk [vmem:[#allocation2 + $0xd] sm:$0x2] %vm174_vm4, %v277_v38  ;;  %v3242_v38 = vld [vmem:[%s4566_s8] ss:$0 sm:$0xff] }
 0x129   :  { %v278_v43 = vpop.f32.mrf.mxu3 }
 0x12a   :  { %v329_v45 = vpop.f32.mrf.mxu0 }
 0x12b   :  { %v330_v46 = vadd.f32 %v3241_v41, %v329_v45 }
 0x12d   :  { %333 = vst.msk [vmem:[#allocation2 + $0x3] sm:$0x1] %vm172_vm3, %v330_v46  ;;  %vm519_vm3 = vcmask 64512  }
 0x12e   :  { %334 = vst.msk [vmem:[#allocation2 + $0xe] sm:$0x2] %vm174_vm4, %v330_v46  ;;  %vm627_vm4 = vcmask 1045504  }
 0x132   :  { %v331_v47 = vpop.f32.mrf.mxu0 }
 0x134   :  { %v335_v48 = vld [vmem:[#allocation2] sm:$0xff] }
 0x135   :  { %v365_v49 = vsel %vm79_vm2, %v335_v48, 0.0  ;;  %v336_v50 = vld [vmem:[#allocation2 + $0x8] sm:$0xff] }
 0x136   :  { %366 = vadd.xlane.f32.xlu0 %v365_v49  ;;  %v368_v51 = vsel %vm79_vm2, %v336_v50, 0.0 }
 0x13e   :  { %369 = vadd.xlane.f32.xlu0 %v368_v51 }
 0x146   :  { %397 = vadd.xlane.f32.xlu0 %v396_v63 }
 0x1a9   :  { %v367_v0 = vpop.xlane.xlu0 %366 }
 0x1aa   :  { %v381_v1 = vmul.f32 %v3693_v58, %v367_v0 }
 0x1ac   :  { %v384_v2 = vsub.f32 %v335_v48, %v381_v1 }
 0x1ae   :  { %v387_v3 = vmul.f32 %v384_v2, %v384_v2 }
 0x1b0   :  { %v390_v4 = vsel %vm79_vm2, %v387_v3, 0.0 }
 0x1b1   :  { %391 = vadd.xlane.f32.xlu1 %v390_v4  ;;  %v370_v5 = vpop.xlane.xlu0 %369 }
 0x1b2   :  { %v382_v6 = vmul.f32 %v3693_v58, %v370_v5 }
 0x1b4   :  { %v385_v7 = vsub.f32 %v336_v50, %v382_v6 }
 0x1b6   :  { %v388_v8 = vmul.f32 %v385_v7, %v385_v7 }
 0x1b8   :  { %v393_v9 = vsel %vm79_vm2, %v388_v8, 0.0 }
 0x1b9   :  { %394 = vadd.xlane.f32.xlu1 %v393_v9  ;;  %v398_v10 = vpop.xlane.xlu0 %397 }
 0x1ba   :  { %v401_v11 = vmul.f32 %v398_v10, %v3693_v58 }
 0x1bc   :  { %v404_v17 = vadd.f32 1e-05, %v401_v11  ;;  %v345_v11 = vld [vmem:[%s4626_s7] sm:$0x1] }
 0x1bd   :  { %vm347_vm5 = vcmp.gt.f32.partialorder %v345_v11, 0.5 }
 0x1be   :  { %vm431_vm12 = vweird.f32 %v404_v17 }
 0x224   :  { %v392_v13 = vpop.xlane.xlu1 %391 }
 0x225   :  { %v399_v14 = vmul.f32 %v392_v13, %v3693_v58  ;;  %v3466_v13 = vmov 0  }
 0x227   :  { %v402_v16 = vadd.f32 1e-05, %v399_v14  ;;  %v349_v14 = vsel %vm347_vm5, 1, %v3466_v13 }
 0x229   :  { %3264 = vrsqrt.f32 %v402_v16  ;;  %vm411_vm7 = vweird.f32 %v402_v16 }
 0x22a   :  { %3266 = vrsqrt.f32 %v404_v17 }
 0x22c   :  { %v395_v18 = vpop.xlane.xlu1 %394 }
 0x22d   :  { %v400_v19 = vmul.f32 %v395_v18, %v3693_v58  ;;  %v3752_v18 = vadd.s32 8, %v3742_v15 }
 0x22f   :  { %v3265_v20 = vpop.eup %3264  ;;  %v403_v21 = vadd.f32 1e-05, %v400_v19  ;;  %v3467_v19 = vmov -1e+09  }
 0x230   :  { %v406_v22 = vmul.f32 %v3265_v20, %v402_v16  ;;  %v3267_v23 = vpop.eup %3266  ;;  %vm412_vm6 = vweird.f32 %v3265_v20  ;;  %v3744_v16 = vand.u32 127, %v338_v12 }
 0x231   :  { %3268 = vrsqrt.f32 %v403_v21  ;;  %v426_v26 = vmul.f32 %v3267_v23, %v404_v17  ;;  %vm413_vm8 = vmor %vm411_vm7, %vm412_vm6  ;;  %vm421_vm10 = vweird.f32 %v403_v21  ;;  %vm432_vm13 = vweird.f32 %v3267_v23 }
 0x232   :  { %v407_v24 = vmul.f32 %v3265_v20, %v406_v22  ;;  %vm433_vm14 = vmor %vm431_vm12, %vm432_vm13  ;;  %v351_v17 = vperm.slane %v349_v14, 0  ;;  %vm343_vm6 = vcmp.ge.s32.totalorder %v3742_v15, %v3744_v16  ;;  %vm571_vm12 = vcmask 93184  }
 0x233   :  { %v427_v31 = vmul.f32 %v3267_v23, %v426_v26 }
 0x234   :  { %v408_v25 = vmul.f32 0.5, %v407_v24  ;;  %vm353_vm7 = vcmp.eq.s32.totalorder %v351_v17, 1 }
 0x235   :  { %v428_v35 = vmul.f32 0.5, %v427_v31 }
 0x236   :  { %v409_v27 = vsub.f32 1.5, %v408_v25 }
 0x237   :  { %v3269_v28 = vpop.eup %3268  ;;  %v429_v40 = vsub.f32 1.5, %v428_v35 }
 0x238   :  { %v410_v29 = vmul.f32 %v3265_v20, %v409_v27  ;;  %v416_v30 = vmul.f32 %v3269_v28, %v403_v21  ;;  %vm422_vm9 = vweird.f32 %v3269_v28 }
 0x239   :  { %vm423_vm11 = vmor %vm421_vm10, %vm422_vm9  ;;  %v430_v45 = vmul.f32 %v3267_v23, %v429_v40  ;;  %vm567_vm9 = vcmask 97280   ;;  %vm344_vm10 = vcmp.ge.s32.totalorder %v3752_v18, %v3744_v16 }
 0x23a   :  { %v417_v32 = vmul.f32 %v3269_v28, %v416_v30  ;;  %v414_v33 = vsel %vm413_vm8, %v3265_v20, %v410_v29  ;;  %vm355_vm8 = vmand %vm343_vm6, %vm353_vm7 }
 0x23b   :  { %v435_v37 = vmul.f32 %v414_v33, %v384_v2  ;;  %v434_v49 = vsel %vm433_vm14, %v3267_v23, %v430_v45  ;;  %v3755_v20 = vsel %vm355_vm8, 0.0, %v3467_v19  ;;  %vm853_vm8 = vcmask 130112  }
 0x23c   :  { %v418_v34 = vmul.f32 0.5, %v417_v32  ;;  %v437_v51 = vmul.f32 %v434_v49, %v3696_v61 }
 0x23d   :  { %v441_v43 = vmul.f32 %v3242_v38, %v435_v37 }
 0x23e   :  { %v419_v36 = vsub.f32 1.5, %v418_v34  ;;  %v443_v52 = vmul.f32 %v3242_v38, %v437_v51 }
 0x23f   :  { %v447_v47 = vadd.f32 %v3243_v44, %v441_v43 }
 0x240   :  { %v420_v39 = vmul.f32 %v3269_v28, %v419_v36  ;;  %v449_v53 = vadd.f32 %v3243_v44, %v443_v52 }
 0x242   :  { %v424_v41 = vsel %vm423_vm11, %v3269_v28, %v420_v39  ;;  %v455_v54 = vpack.c.bf16 %v449_v53, %v449_v53  ;;  %vm356_vm11 = vmand %vm344_vm10, %vm353_vm7 }
 0x243   :  { %v436_v42 = vmul.f32 %v424_v41, %v385_v7  ;;  %v3765_v24 = vsel %vm356_vm11, 0.0, %v3467_v19  ;;  %vm4595_vm11 = vcmask 195712  }
 0x245   :  { %v442_v46 = vmul.f32 %v3242_v38, %v436_v42 }
 0x247   :  { %v448_v48 = vadd.f32 %v3243_v44, %v442_v46 }
 0x249   :  { %v454_v50 = vpack.c.bf16 %v448_v48, %v447_v47 }
 0x24b   :  { %2977 = vmatmul.msk.bf16.vlgmr.msrb.gmra.mxu1 %vm79_vm2, %v454_v50 }
 0x25b   :  { %2978 = vmatmul.msk.bf16.gmra.mxu1 %vm79_vm2, %v455_v54 }
 0x2c8   :  { %v487_v56 = vpop.f32.mrf.mxu1 }
 0x2c9   :  { %v488_v57 = vadd.f32 %v3244_v55, %v487_v56 }
 0x2cb   :  { %497 = vst.msk [vmem:[#allocation3] sm:$0xff] %vm496_vm15, %v488_v57 }
 0x2d0   :  { %v489_v59 = vpop.f32.mrf.mxu1 }
 0x2d1   :  { %v490_v60 = vadd.f32 %v3244_v55, %v489_v59 }
 0x2d2   :  { %v504_v61 = vld [vmem:[#allocation3] sm:$0xff] }
 0x2d3   :  { %499 = vst.msk [vmem:[#allocation3 + $0x8] sm:$0xf] %vm498_vm0, %v490_v60  ;;  %v508_v0 = vpack.c.bf16 %v504_v61, %v504_v61 }
 0x2d4   :  { %502 = vst.msk [vmem:[#allocation3 + $0xc] sm:$0xf0] %vm501_vm1, %v490_v60 }
 0x2d5   :  { %v3730_v3 = vunpack.c.l.b16 %v508_v0 }
 0x2d8   :  { %v492_v62 = vpop.f32.mrf.mxu1 }
 0x2d9   :  { %v493_v63 = vadd.f32 %v3244_v55, %v492_v62 }
 0x2da   :  { %v505_v1 = vld [vmem:[#allocation3 + $0x8] sm:$0xf] }
 0x2db   :  { %503 = vst.msk [vmem:[#allocation3 + $0x14] sm:$0xff] %vm496_vm15, %v493_v63  ;;  %v509_v2 = vpack.c.bf16 %v505_v1, %v505_v1  ;;  %v678_v36 = vld [vmem:[#allocation3 + $0x8] sm:$0xf] }
 0x2dc   :  { %v682_v39 = vpack.c.bf16 %v678_v36, %v678_v36  ;;  %v868_v43 = vld [vmem:[#allocation3 + $0x8] sm:$0xf] }
 0x2dd   :  { %v515_v4 = vunpack.c.l.b16 %v509_v2  ;;  %v872_v44 = vpack.c.bf16 %v868_v43, %v868_v43  ;;  %v1058_v46 = vld [vmem:[#allocation3 + $0x8] sm:$0xf] }
 0x2de   :  { %v688_v41 = vunpack.c.l.b16 %v682_v39  ;;  %v1062_v48 = vpack.c.bf16 %v1058_v46, %v1058_v46 }
 0x2df   :  { %v516_v5 = vpack.c.b16 %v515_v4, %v3730_v3  ;;  %v878_v45 = vunpack.c.l.b16 %v872_v44 }
 0x2e0   :  { %v494_v6 = vpop.f32.mrf.mxu1  ;;  %v3778_v42 = vpack.c.b16 %v688_v41, %v3730_v3  ;;  %v1068_v49 = vunpack.c.l.b16 %v1062_v48 }
 0x2e1   :  { %622 = vrot.lane.b32.xlu0 %v516_v5, %s4606_s1  ;;  %517 = vrot.lane.b32.xlu2 %v516_v5, %s3465_s26  ;;  %v3787_v47 = vpack.c.b16 %v878_v45, %v3730_v3 }
 0x2e2   :  { %v506_v28 = vld [vmem:[#allocation3 + $0x10] sm:$0xff]  ;;  %v507_v29 = vld [vmem:[#allocation3 + $0x18] sm:$0xf]  ;;  %v3792_v51 = vpack.c.b16 %v1068_v49, %v3730_v3 }
 0x2e3   :  { %v510_v30 = vpack.c.bf16 %v506_v28, %v506_v28  ;;  %v511_v31 = vpack.c.bf16 %v507_v29, %v507_v29  ;;  %v680_v32 = vld [vmem:[#allocation3 + $0x18] sm:$0xf] }
 0x2e4   :  { %v684_v33 = vpack.c.bf16 %v680_v32, %v680_v32  ;;  %v1060_v50 = vld [vmem:[#allocation3 + $0x18] sm:$0xf] }
 0x2e5   :  { %v542_v34 = vunpack.c.l.b16 %v510_v30  ;;  %v543_v35 = vunpack.c.l.b16 %v511_v31  ;;  %v1064_v52 = vpack.c.bf16 %v1060_v50, %v1060_v50  ;;  %v870_v6 = vld [vmem:[#allocation3 + $0x18] sm:$0xf] }
 0x2e6   :  { %v717_v37 = vunpack.c.l.b16 %v684_v33 }
 0x2e7   :  { %v3769_v38 = vpack.c.b16 %v543_v35, %v542_v34  ;;  %v1097_v53 = vunpack.c.l.b16 %v1064_v52 }
 0x2e8   :  { %v3773_v40 = vpack.c.b16 %v717_v37, %v542_v34 }
 0x2e9   :  { %v3796_v54 = vpack.c.b16 %v1097_v53, %v542_v34 }
 0x33b   :  { %v518_v7 = vpop.permute.xlu2 %517 }
 0x33c   :  { %v524_v8 = vsel %vm519_vm3, %v518_v7, 0  ;;  %v874_v7 = vpack.c.bf16 %v870_v6, %v870_v6 }
 0x33d   :  { %533 = vmatpush.bf16.xpose.msra.mxu2 %v524_v8 }
 0x344   :  { %2979 = vmatmul.msk.bf16.vlgmr.msra.gmra.mxu2 %vm519_vm3, %v516_v5 }
 0x353   :  { %v623_v9 = vpop.permute.xlu0 %622 }
 0x354   :  { %v629_v10 = vsel %vm627_vm4, %v623_v9, 0 }
 0x355   :  { %638 = vmatpush.bf16.msrb.mxu0 %v629_v10  ;;  %v907_v10 = vunpack.c.l.b16 %v874_v7 }
 0x357   :  { %v3809_v11 = vpack.c.b16 %v907_v10, %v542_v34 }
 0x3c7   :  { %v535_v21 = vpop.f32.mrf.mxu2 }
 0x3c8   :  { %v536_v22 = vadd.f32 %v535_v21, %v3755_v20 }
 0x3ca   :  { %v568_v23 = vsel %vm567_vm9, %v536_v22, -inf }
 0x3cb   :  { %569 = vmax.xlane.f32.xlu1 %v568_v23 }
 0x3cf   :  { %v537_v25 = vpop.f32.mrf.mxu2 }
 0x3d0   :  { %v538_v26 = vadd.f32 %v537_v25, %v3765_v24 }
 0x3d2   :  { %v572_v27 = vsel %vm571_vm12, %v538_v26, -inf }
 0x3d3   :  { %573 = vmax.xlane.f32.xlu0 %v572_v27  ;;  %v346_v27 = vld [vmem:[%s4626_s7 + $0x1] sm:$0x1]  ;;  %s4587_s7 = smov 24  }
 0x3d4   :  { %vm348_vm13 = vcmp.gt.f32.partialorder %v346_v27, 0.5 }
 0x3d5   :  { %v350_v39 = vsel %vm348_vm13, 1, %v3466_v13  ;;  %vm4593_vm13 = vcmask 191616  }
 0x3d6   :  { %v352_v44 = vperm.slane %v350_v39, 0 }
 0x3d8   :  { %vm354_vm14 = vcmp.eq.s32.totalorder %v352_v44, 1 }
 0x3d9   :  { %vm357_vm5 = vmand %vm343_vm6, %vm354_vm14  ;;  %vm673_vm6 = vcmask 60416  }
 0x3da   :  { %v3833_v46 = vsel %vm357_vm5, 0.0, %v3467_v19  ;;  %vm358_vm7 = vmand %vm344_vm10, %vm354_vm14  ;;  %vm4594_vm10 = vcmask 126016   ;;  %vm4592_vm14 = vcmask 261312   ;;  %vm4591_vm5 = vcmask 257216  }
 0x3db   :  { %v3846_v15 = vsel %vm358_vm7, 0.0, %v3467_v19 }
 0x3e4   :  { %545 = vrot.lane.b32.xlu1 %v3769_v38, %s3465_s26 }
 0x3e7   :  { %721 = vrot.lane.b32.xlu0 %v3773_v40, %s3468_s28 }
 0x3ec   :  { %692 = vrot.lane.b32.xlu1 %v3778_v42, %s3468_s28 }
 0x3f4   :  { %690 = vrot.lane.b32.xlu1 %v3778_v42, %s3469_s17 }
 0x3fc   :  { %719 = vrot.lane.b32.xlu1 %v3773_v40, %s3469_s17 }
 0x404   :  { %880 = vrot.lane.b32.xlu1 %v3787_v47, %s4608_s29 }
 0x40c   :  { %1072 = vrot.lane.b32.xlu1 %v3792_v51, %s4604_s2 }
 0x414   :  { %1101 = vrot.lane.b32.xlu1 %v3796_v54, %s4604_s2  ;;  %s4636_s2 = smov 24  }
 0x43e   :  { %v570_v55 = vpop.xlane.xlu1 %569 }
 0x43f   :  { %v581_v56 = vsub.f32 %v536_v22, %v570_v55 }
 0x441   :  { %v585_v57 = vmul.f32 1.442695, %v581_v56 }
 0x443   :  { %3270 = vpow2.f32 %v585_v57 }
 0x446   :  { %v574_v59 = vpop.xlane.xlu0 %573 }
 0x447   :  { %v582_v60 = vsub.f32 %v538_v26, %v574_v59 }
 0x449   :  { %v3271_v61 = vpop.eup %3270  ;;  %v587_v62 = vmul.f32 1.442695, %v582_v60 }
 0x44a   :  { %v593_v63 = vsel %vm567_vm9, %v3271_v61, 0.0 }
 0x44b   :  { %3272 = vpow2.f32 %v587_v62  ;;  %594 = vadd.xlane.f32.xlu0 %v593_v63 }
 0x451   :  { %v3273_v0 = vpop.eup %3272 }
 0x452   :  { %v596_v1 = vsel %vm571_vm12, %v3273_v0, 0.0 }
 0x453   :  { %597 = vadd.xlane.f32.xlu2 %v596_v1 }
 0x456   :  { %v546_v2 = vpop.permute.xlu1 %545 }
 0x457   :  { %v551_v3 = vsel %vm519_vm3, %v546_v2, 0 }
 0x458   :  { %560 = vmatpush.bf16.xpose.msrb.mxu3 %v551_v3 }
 0x459   :  { %v722_v4 = vpop.permute.xlu0 %721 }
 0x45a   :  { %v727_v5 = vsel %vm519_vm3, %v722_v4, 0 }
 0x45b   :  { %736 = vmatpush.bf16.xpose.msra.mxu0 %v727_v5 }
 0x45e   :  { %v693_v8 = vpop.permute.xlu1 %692 }
 0x45f   :  { %v698_v9 = vsel %vm519_vm3, %v693_v8, 0  ;;  %882 = vrot.lane.b32.xlu0 %v3787_v47, %s3472_s3  ;;  %2980 = vmatmul.msk.bf16.vlgmr.msrb.gmra.mxu3 %vm519_vm3, %v3769_v38 }
 0x460   :  { %707 = vmatpush.bf16.xpose.msra.mxu3 %v698_v9 }
 0x466   :  { %v691_v12 = vpop.permute.xlu1 %690 }
 0x467   :  { %909 = vrot.lane.b32.xlu0 %v3809_v11, %s4608_s29  ;;  %s4627_s29 = sld [smem:[#allocation16_spill]] }
 0x46b   :  { %911 = vrot.lane.b32.xlu2 %v3809_v11, %s3472_s3 }
 0x46e   :  { %v720_v14 = vpop.permute.xlu1 %719 }
 0x46f   :  { %1070 = vrot.lane.b32.xlu0 %v3792_v51, %s3473_s0  ;;  %2983 = vmatmul.msk.bf16.vlgmr.msra.gmra.mxu3 %vm519_vm3, %v691_v12 }
 0x476   :  { %v881_v21 = vpop.permute.xlu1 %880 }
 0x477   :  { %1099 = vrot.lane.b32.xlu0 %v3796_v54, %s3473_s0 }
 0x47e   :  { %v1073_v30 = vpop.permute.xlu1 %1072 }
 0x47f   :  { %v1078_v36 = vsel %vm519_vm3, %v1073_v30, 0 }
 0x486   :  { %v1102_v48 = vpop.permute.xlu1 %1101 }
 0x487   :  { %v1107_v52 = vsel %vm519_vm3, %v1102_v48, 0 }
 0x4be   :  { %v595_v17 = vpop.xlane.xlu0 %594 }
 0x4bf   :  { %3274 = vrcp.f32 %v595_v17 }
 0x4c5   :  { %v3275_v23 = vpop.eup %3274 }
 0x4c6   :  { %v598_v22 = vpop.xlane.xlu2 %597  ;;  %v609_v25 = vmul.f32 %v3275_v23, %v3271_v61 }
 0x4c7   :  { %3276 = vrcp.f32 %v598_v22 }
 0x4c8   :  { %v613_v28 = vpack.c.bf16 %v609_v25, %v609_v25 }
 0x4ca   :  { %v619_v33 = vunpack.c.l.b16 %v613_v28 }
 0x4cd   :  { %v3277_v26 = vpop.eup %3276 }
 0x4ce   :  { %v610_v29 = vmul.f32 %v3277_v26, %v3273_v0  ;;  %v912_v37 = vpop.permute.xlu2 %911 }
 0x4cf   :  { %v917_v43 = vsel %vm519_vm3, %v912_v37, 0 }
 0x4d0   :  { %v614_v31 = vpack.c.bf16 %v610_v29, %v610_v29 }
 0x4d1   :  { %v883_v32 = vpop.permute.xlu0 %882 }
 0x4d2   :  { %v620_v34 = vunpack.c.l.b16 %v614_v31  ;;  %v888_v35 = vsel %vm519_vm3, %v883_v32, 0 }
 0x4d3   :  { %897 = vmatpush.bf16.xpose.msrb.mxu3 %v888_v35 }
 0x4d4   :  { %v621_v41 = vpack.c.b16 %v620_v34, %v619_v33 }
 0x4d6   :  { %2981 = vmatmul.msk.bf16.vlgmr.msrb.gmra.mxu0 %vm567_vm9, %v621_v41 }
 0x4d7   :  { %926 = vmatpush.bf16.xpose.msrb.mxu0 %v917_v43 }
 0x4d9   :  { %v910_v45 = vpop.permute.xlu0 %909 }
 0x4da   :  { %2987 = vmatmul.msk.bf16.vlgmr.msrb.gmra.mxu3 %vm519_vm3, %v881_v21 }
 0x4db   :  { %1087 = vmatpush.bf16.xpose.msra.mxu3 %v1078_v36 }
 0x4e1   :  { %v1071_v53 = vpop.permute.xlu0 %1070 }
 0x4e2   :  { %v562_v13 = vpop.f32.mrf.mxu3 }
 0x4e3   :  { %v3836_v49 = vadd.f32 %v562_v13, %v3833_v46 }
 0x4e5   :  { %v575_v50 = vsel %vm567_vm9, %v3836_v49, -inf }
 0x4e6   :  { %576 = vmax.xlane.f32.xlu1 %v575_v50  ;;  %2984 = vmatmul.msk.bf16.vlgmr.msra.gmra.mxu0 %vm519_vm3, %v720_v14 }
 0x4e7   :  { %1116 = vmatpush.bf16.xpose.msra.mxu0 %v1107_v52 }
 0x4e9   :  { %v1100_v62 = vpop.permute.xlu0 %1099 }
 0x4ea   :  { %v564_v55 = vpop.f32.mrf.mxu3  ;;  %2991 = vmatmul.msk.bf16.vlgmr.msra.gmra.mxu3 %vm519_vm3, %v1071_v53 }
 0x4eb   :  { %v565_v56 = vadd.f32 %v564_v55, %v3846_v15 }
 0x4ed   :  { %v578_v57 = vsel %vm571_vm12, %v565_v56, -inf }
 0x4ee   :  { %579 = vmax.xlane.f32.xlu2 %v578_v57 }
 0x4f2   :  { %v709_v16 = vpop.f32.mrf.mxu3 }
 0x4f3   :  { %v710_v18 = vadd.f32 %v709_v16, %v3755_v20 }
 0x4f5   :  { %v743_v59 = vsel %vm567_vm9, %v710_v18, -inf }
 0x4f6   :  { %744 = vmax.xlane.f32.xlu0 %v743_v59  ;;  %2988 = vmatmul.msk.bf16.vlgmr.msrb.gmra.mxu0 %vm519_vm3, %v910_v45 }
 0x4fa   :  { %v711_v60 = vpop.f32.mrf.mxu3 }
 0x4fb   :  { %v712_v19 = vadd.f32 %v711_v60, %v3765_v24 }
 0x4fd   :  { %v746_v61 = vsel %vm571_vm12, %v712_v19, -inf }
 0x4fe   :  { %747 = vmax.xlane.f32.xlu2 %v746_v61 }
 0x506   :  { %2992 = vmatmul.msk.bf16.vlgmr.msra.gmra.mxu0 %vm519_vm3, %v1100_v62 }
 0x553   :  { %v640_v63 = vpop.f32.mrf.mxu0 }
 0x554   :  { %672 = vst.msk [vmem:[#allocation4] sm:$0xff] %vm519_vm3, %v640_v63 }
 0x559   :  { %v577_v31 = vpop.xlane.xlu1 %576 }
 0x55b   :  { %v642_v0 = vpop.f32.mrf.mxu0 }
 0x55c   :  { %674 = vst.msk [vmem:[#allocation4 + $0x8] sm:$0xf] %vm673_vm6, %v642_v0 }
 0x55d   :  { %v899_v1 = vpop.f32.mrf.mxu3 }
 0x55e   :  { %v3860_v2 = vadd.f32 %v899_v1, %v3755_v20 }
 0x560   :  { %v933_v3 = vsel %vm567_vm9, %v3860_v2, -inf }
 0x561   :  { %934 = vmax.xlane.f32.xlu2 %v933_v3  ;;  %v580_v21 = vpop.xlane.xlu2 %579 }
 0x562   :  { %v584_v22 = vsub.f32 %v565_v56, %v580_v21 }
 0x563   :  { %v738_v17 = vpop.f32.mrf.mxu0 }
 0x564   :  { %v591_v23 = vmul.f32 1.442695, %v584_v22  ;;  %v739_v39 = vadd.f32 %v738_v17, %v3833_v46 }
 0x565   :  { %v901_v4 = vpop.f32.mrf.mxu3 }
 0x566   :  { %v3865_v5 = vadd.f32 %v901_v4, %v3765_v24  ;;  %3278 = vpow2.f32 %v591_v23  ;;  %v749_v13 = vsel %vm567_vm9, %v739_v39, -inf }
 0x568   :  { %v936_v6 = vsel %vm571_vm12, %v3865_v5, -inf }
 0x569   :  { %937 = vmax.xlane.f32.xlu1 %v936_v6  ;;  %v745_v35 = vpop.xlane.xlu0 %744 }
 0x56a   :  { %v755_v36 = vsub.f32 %v710_v18, %v745_v35 }
 0x56b   :  { %v740_v25 = vpop.f32.mrf.mxu0 }
 0x56c   :  { %v3885_v29 = vpop.eup %3278  ;;  %v759_v41 = vmul.f32 1.442695, %v755_v36  ;;  %v3912_v55 = vadd.f32 %v740_v25, %v3846_v15 }
 0x56d   :  { %v1089_v7 = vpop.f32.mrf.mxu3 }
 0x56e   :  { %v3870_v8 = vadd.f32 %v1089_v7, %v3755_v20  ;;  %v752_v56 = vsel %vm571_vm12, %v3912_v55, -inf }
 0x570   :  { %v1123_v9 = vsel %vm567_vm9, %v3870_v8, -inf }
 0x571   :  { %1124 = vmax.xlane.f32.xlu1 %v1123_v9  ;;  %v748_v26 = vpop.xlane.xlu2 %747 }
 0x572   :  { %v756_v27 = vsub.f32 %v712_v19, %v748_v26 }
 0x573   :  { %v928_v30 = vpop.f32.mrf.mxu0 }
 0x574   :  { %v761_v28 = vmul.f32 1.442695, %v756_v27  ;;  %v3932_v4 = vadd.f32 %v928_v30, %v3833_v46 }
 0x575   :  { %v1091_v10 = vpop.f32.mrf.mxu3 }
 0x576   :  { %v3875_v12 = vadd.f32 %v1091_v10, %v3765_v24  ;;  %3280 = vpow2.f32 %v761_v28 }
 0x578   :  { %v1126_v14 = vsel %vm571_vm12, %v3875_v12, -inf }
 0x579   :  { %823 = vrot.lane.b32.xlu2 %v3773_v40, %s4602_s24  ;;  %1127 = vmax.xlane.f32.xlu0 %v1126_v14  ;;  %v602_v40 = vsel %vm571_vm12, %v3885_v29, 0.0 }
 0x57c   :  { %v3890_v32 = vpop.eup %3280 }
 0x57d   :  { %v770_v34 = vsel %vm571_vm12, %v3890_v32, 0.0 }
 0x58a   :  { %650 = vrot.lane.b32.xlu1 %v3769_v38, %s4606_s1  ;;  %v583_v38 = vsub.f32 %v3836_v49, %v577_v31  ;;  %s4635_s1 = smov 16  }
 0x58c   :  { %v589_v33 = vmul.f32 1.442695, %v583_v38 }
 0x58d   :  { %796 = vrot.lane.b32.xlu0 %v3778_v42, %s4602_s24  ;;  %v930_v42 = vpop.f32.mrf.mxu0 }
 0x58e   :  { %3282 = vpow2.f32 %v589_v33  ;;  %v931_v37 = vadd.f32 %v930_v42, %v3846_v15 }
 0x58f   :  { %3284 = vpow2.f32 %v759_v41 }
 0x590   :  { %v942_v43 = vsel %vm571_vm12, %v931_v37, -inf }
 0x594   :  { %v3897_v45 = vpop.eup %3282 }
 0x595   :  { %v1118_v44 = vpop.f32.mrf.mxu0  ;;  %v599_v49 = vsel %vm567_vm9, %v3897_v45, 0.0  ;;  %v3907_v52 = vpop.eup %3284 }
 0x596   :  { %v3901_v48 = vadd.f32 %v1118_v44, %v3833_v46  ;;  %v767_v53 = vsel %vm567_vm9, %v3907_v52, 0.0 }
 0x598   :  { %v1129_v50 = vsel %vm567_vm9, %v3901_v48, -inf }
 0x59d   :  { %v1120_v63 = vpop.f32.mrf.mxu0 }
 0x59e   :  { %v3923_v0 = vadd.f32 %v1120_v63, %v3846_v15 }
 0x5a2   :  { %603 = vadd.xlane.f32.xlu2 %v602_v40 }
 0x5aa   :  { %771 = vadd.xlane.f32.xlu2 %v770_v34 }
 0x5b2   :  { %943 = vmax.xlane.f32.xlu2 %v942_v43 }
 0x5b4   :  { %750 = vmax.xlane.f32.xlu1 %v749_v13 }
 0x5b7   :  { %600 = vadd.xlane.f32.xlu0 %v599_v49 }
 0x5ba   :  { %1130 = vmax.xlane.f32.xlu2 %v1129_v50 }
 0x5bf   :  { %768 = vadd.xlane.f32.xlu0 %v767_v53 }
 0x5c7   :  { %753 = vmax.xlane.f32.xlu0 %v752_v56 }
 0x5d4   :  { %v935_v57 = vpop.xlane.xlu2 %934 }
 0x5d5   :  { %v945_v16 = vsub.f32 %v3860_v2, %v935_v57  ;;  %v1132_v2 = vsel %vm571_vm12, %v3923_v0, -inf }
 0x5d7   :  { %v949_v18 = vmul.f32 1.442695, %v945_v16 }
 0x5d9   :  { %3286 = vpow2.f32 %v949_v18 }
 0x5dc   :  { %v938_v59 = vpop.xlane.xlu1 %937  ;;  %v824_v9 = vpop.permute.xlu2 %823 }
 0x5dd   :  { %v946_v60 = vsub.f32 %v3865_v5, %v938_v59  ;;  %v939_v5 = vsel %vm567_vm9, %v3932_v4, -inf  ;;  %v829_v17 = vsel %vm627_vm4, %v824_v9, 0 }
 0x5df   :  { %v3918_v19 = vpop.eup %3286  ;;  %v951_v61 = vmul.f32 1.442695, %v946_v60 }
 0x5e0   :  { %v957_v62 = vsel %vm567_vm9, %v3918_v19, 0.0 }
 0x5e1   :  { %3288 = vpow2.f32 %v951_v61  ;;  %958 = vadd.xlane.f32.xlu1 %v957_v62 }
 0x5e4   :  { %v3936_v6 = vpop.xlane.xlu1 %1124 }
 0x5e7   :  { %v3925_v1 = vpop.eup %3288 }
 0x5e8   :  { %v960_v3 = vsel %vm571_vm12, %v3925_v1, 0.0 }
 0x5e9   :  { %1133 = vmax.xlane.f32.xlu1 %v1132_v2  ;;  %961 = vadd.xlane.f32.xlu0 %v960_v3 }
 0x5ec   :  { %v3938_v7 = vpop.xlane.xlu0 %1127 }
 0x5f1   :  { %940 = vmax.xlane.f32.xlu0 %v939_v5 }
 0x5fc   :  { %v651_v10 = vpop.permute.xlu1 %650 }
 0x5fd   :  { %v656_v14 = vsel %vm627_vm4, %v651_v10, 0 }
 0x5fe   :  { %665 = vmatpush.bf16.msrb.mxu2 %v656_v14 }
 0x5ff   :  { %v797_v21 = vpop.permute.xlu0 %796 }
 0x600   :  { %v802_v22 = vsel %vm627_vm4, %v797_v21, 0 }
 0x601   :  { %811 = vmatpush.bf16.msra.mxu1 %v802_v22 }
 0x602   :  { %838 = vmatpush.bf16.msra.mxu2 %v829_v17 }
 0x615   :  { %v604_v23 = vpop.xlane.xlu2 %603 }
 0x616   :  { %3290 = vrcp.f32 %v604_v23 }
 0x61c   :  { %v3291_v42 = vpop.eup %3290 }
 0x61d   :  { %v772_v25 = vpop.xlane.xlu2 %771  ;;  %v612_v33 = vmul.f32 %v3291_v42, %v3885_v29 }
 0x625   :  { %v944_v26 = vpop.xlane.xlu2 %943 }
 0x626   :  { %v948_v27 = vsub.f32 %v931_v37, %v944_v26  ;;  %v616_v37 = vpack.c.bf16 %v612_v33, %v612_v33 }
 0x627   :  { %v751_v28 = vpop.xlane.xlu1 %750 }
 0x628   :  { %v955_v30 = vmul.f32 1.442695, %v948_v27  ;;  %v757_v40 = vsub.f32 %v739_v39, %v751_v28  ;;  %v648_v29 = vunpack.c.l.b16 %v616_v37  ;;  %v1135_v28 = vsub.f32 %v3870_v8, %v3936_v6 }
 0x62a   :  { %3292 = vpow2.f32 %v955_v30  ;;  %v763_v31 = vmul.f32 1.442695, %v757_v40  ;;  %v601_v38 = vpop.xlane.xlu0 %600 }
 0x62b   :  { %3294 = vrcp.f32 %v601_v38  ;;  %v1139_v38 = vmul.f32 1.442695, %v1135_v28 }
 0x62c   :  { %3296 = vpow2.f32 %v763_v31 }
 0x62d   :  { %3298 = vrcp.f32 %v772_v25  ;;  %v1131_v10 = vpop.xlane.xlu2 %1130 }
 0x62e   :  { %v1137_v22 = vsub.f32 %v3901_v48, %v1131_v10 }
 0x630   :  { %v3944_v34 = vpop.eup %3292  ;;  %v1143_v30 = vmul.f32 1.442695, %v1137_v22 }
 0x631   :  { %v3295_v35 = vpop.eup %3294  ;;  %v966_v36 = vsel %vm571_vm12, %v3944_v34, 0.0 }
 0x632   :  { %v3948_v41 = vpop.eup %3296  ;;  %v611_v39 = vmul.f32 %v3295_v35, %v3897_v45  ;;  %967 = vadd.xlane.f32.xlu1 %v966_v36  ;;  %v769_v43 = vpop.xlane.xlu0 %768 }
 0x633   :  { %v3299_v44 = vpop.eup %3298  ;;  %3300 = vrcp.f32 %v769_v43  ;;  %v773_v13 = vsel %vm567_vm9, %v3948_v41, 0.0 }
 0x634   :  { %v615_v49 = vpack.c.bf16 %v611_v39, %v611_v39  ;;  %774 = vadd.xlane.f32.xlu0 %v773_v13  ;;  %v784_v50 = vmul.f32 %v3299_v44, %v3890_v32 }
 0x636   :  { %v647_v53 = vunpack.c.l.b16 %v615_v49  ;;  %v788_v16 = vpack.c.bf16 %v784_v50, %v784_v50 }
 0x638   :  { %v649_v56 = vpack.c.b16 %v648_v29, %v647_v53  ;;  %v794_v62 = vunpack.c.l.b16 %v788_v16 }
 0x639   :  { %v3301_v57 = vpop.eup %3300 }
 0x63a   :  { %v783_v18 = vmul.f32 %v3301_v57, %v3907_v52  ;;  %2982 = vmatmul.msk.bf16.vlgmr.msrb.gmra.mxu2 %vm567_vm9, %v649_v56  ;;  %v754_v45 = vpop.xlane.xlu0 %753 }
 0x63b   :  { %v758_v59 = vsub.f32 %v3912_v55, %v754_v45 }
 0x63c   :  { %v787_v60 = vpack.c.bf16 %v783_v18, %v783_v18 }
 0x63d   :  { %v765_v61 = vmul.f32 1.442695, %v758_v59 }
 0x63e   :  { %v793_v63 = vunpack.c.l.b16 %v787_v60 }
 0x63f   :  { %3302 = vpow2.f32 %v765_v61 }
 0x640   :  { %v795_v2 = vpack.c.b16 %v794_v62, %v793_v63 }
 0x642   :  { %2985 = vmatmul.msk.bf16.vlgmr.msra.gmra.mxu1 %vm567_vm9, %v795_v2 }
 0x645   :  { %v3958_v32 = vpop.eup %3302 }
 0x646   :  { %v776_v3 = vsel %vm571_vm12, %v3958_v32, 0.0 }
 0x647   :  { %777 = vadd.xlane.f32.xlu2 %v776_v3 }
 0x648   :  { %1013 = vrot.lane.b32.xlu0 %v3809_v11, %s4600_s25 }
 0x64b   :  { %986 = vrot.lane.b32.xlu1 %v3787_v47, %s4600_s25  ;;  %s4634_s25 = smov 8  }
 0x654   :  { %v959_v52 = vpop.xlane.xlu1 %958 }
 0x655   :  { %3304 = vrcp.f32 %v959_v52 }
 0x65b   :  { %v3305_v5 = vpop.eup %3304 }
 0x65c   :  { %v962_v55 = vpop.xlane.xlu0 %961  ;;  %v1134_v9 = vpop.xlane.xlu1 %1133  ;;  %v973_v14 = vmul.f32 %v3305_v5, %v3918_v19 }
 0x65d   :  { %3306 = vrcp.f32 %v962_v55  ;;  %v1138_v17 = vsub.f32 %v3923_v0, %v1134_v9 }
 0x65e   :  { %v977_v23 = vpack.c.bf16 %v973_v14, %v973_v14 }
 0x65f   :  { %v1145_v25 = vmul.f32 1.442695, %v1138_v17 }
 0x660   :  { %v983_v31 = vunpack.c.l.b16 %v977_v23 }
 0x661   :  { %3308 = vpow2.f32 %v1145_v25 }
 0x663   :  { %v3307_v21 = vpop.eup %3306 }
 0x664   :  { %v974_v11 = vmul.f32 %v3307_v21, %v3925_v1  ;;  %v941_v26 = vpop.xlane.xlu0 %940  ;;  %v1136_v1 = vsub.f32 %v3875_v12, %v3938_v7 }
 0x665   :  { %v947_v47 = vsub.f32 %v3932_v4, %v941_v26 }
 0x666   :  { %v978_v27 = vpack.c.bf16 %v974_v11, %v974_v11  ;;  %v1141_v6 = vmul.f32 1.442695, %v1136_v1 }
 0x667   :  { %v953_v40 = vmul.f32 1.442695, %v947_v47  ;;  %v3973_v48 = vpop.eup %3308 }
 0x668   :  { %v984_v19 = vunpack.c.l.b16 %v978_v27  ;;  %v1156_v8 = vsel %vm571_vm12, %v3973_v48, 0.0 }
 0x669   :  { %3310 = vpow2.f32 %v953_v40 }
 0x66a   :  { %v985_v0 = vpack.c.b16 %v984_v19, %v983_v31  ;;  %3312 = vpow2.f32 %v1143_v30 }
 0x66b   :  { %3314 = vpow2.f32 %v1139_v38 }
 0x66c   :  { %3316 = vpow2.f32 %v1141_v6 }
 0x66f   :  { %v3311_v42 = vpop.eup %3310 }
 0x670   :  { %v963_v4 = vsel %vm567_vm9, %v3311_v42, 0.0  ;;  %v3978_v33 = vpop.eup %3312 }
 0x671   :  { %964 = vadd.xlane.f32.xlu2 %v963_v4  ;;  %v1153_v35 = vsel %vm567_vm9, %v3978_v33, 0.0  ;;  %v3984_v36 = vpop.eup %3314 }
 0x672   :  { %1157 = vadd.xlane.f32.xlu0 %v1156_v8  ;;  %v1147_v12 = vsel %vm567_vm9, %v3984_v36, 0.0  ;;  %v3988_v7 = vpop.eup %3316 }
 0x673   :  { %v1150_v37 = vsel %vm571_vm12, %v3988_v7, 0.0 }
 0x675   :  { %1154 = vadd.xlane.f32.xlu1 %v1153_v35 }
 0x679   :  { %1148 = vadd.xlane.f32.xlu2 %v1147_v12 }
 0x681   :  { %1151 = vadd.xlane.f32.xlu2 %v1150_v37 }
 0x699   :  { %1176 = vrot.lane.b32.xlu2 %v3792_v51, %s4598_s5 }
 0x6a1   :  { %1203 = vrot.lane.b32.xlu2 %v3796_v54, %s4598_s5 }
 0x6a5   :  { %v968_v43 = vpop.xlane.xlu1 %967 }
 0x6a7   :  { %v775_v39 = vpop.xlane.xlu0 %774 }
 0x6a8   :  { %3318 = vrcp.f32 %v775_v39 }
 0x6ae   :  { %v3319_v49 = vpop.eup %3318 }
 0x6af   :  { %v785_v56 = vmul.f32 %v3319_v49, %v3948_v41 }
 0x6b1   :  { %v789_v16 = vpack.c.bf16 %v785_v56, %v785_v56 }
 0x6b3   :  { %v820_v60 = vunpack.c.l.b16 %v789_v16 }
 0x6ba   :  { %v778_v44 = vpop.xlane.xlu2 %777  ;;  %v1014_v13 = vpop.permute.xlu0 %1013 }
 0x6bb   :  { %3320 = vrcp.f32 %v778_v44  ;;  %v1019_v29 = vsel %vm627_vm4, %v1014_v13, 0 }
 0x6bc   :  { %1028 = vmatpush.bf16.msrb.mxu2 %v1019_v29  ;;  %3322 = vrcp.f32 %v968_v43 }
 0x6bd   :  { %v987_v50 = vpop.permute.xlu1 %986  ;;  %v667_v53 = vpop.f32.mrf.mxu2 }
 0x6be   :  { %v992_v57 = vsel %vm627_vm4, %v987_v50, 0  ;;  %675 = vst.msk [vmem:[#allocation4 + $0xc] sm:$0xff] %vm519_vm3, %v667_v53 }
 0x6bf   :  { %v813_v51 = vpop.f32.mrf.mxu1  ;;  %1001 = vmatpush.bf16.msrb.mxu1 %v992_v57 }
 0x6c0   :  { %847 = vrot.lane.b32.xlu2 %v813_v51, %s4596_s6 }
 0x6c1   :  { %v3321_v54 = vpop.eup %3320 }
 0x6c2   :  { %v786_v18 = vmul.f32 %v3321_v54, %v3958_v32  ;;  %2989 = vmatmul.msk.bf16.vlgmr.msrb.gmra.mxu1 %vm567_vm9, %v985_v0  ;;  %v3323_v2 = vpop.eup %3322 }
 0x6c3   :  { %v976_v32 = vmul.f32 %v3323_v2, %v3944_v34 }
 0x6c4   :  { %v790_v45 = vpack.c.bf16 %v786_v18, %v786_v18  ;;  %v3191_v18 = vld [vmem:[%s4570_s12 + $0x8] sm:$0xff] }
 0x6c5   :  { %v669_v59 = vpop.f32.mrf.mxu2  ;;  %v980_v52 = vpack.c.bf16 %v976_v32, %v976_v32  ;;  %1280 = vmatpush.bf16.msrb.mxu3 %v3191_v18 }
 0x6c6   :  { %v821_v61 = vunpack.c.l.b16 %v790_v45  ;;  %676 = vst.msk [vmem:[#allocation4 + $0x14] sm:$0xf] %vm673_vm6, %v669_v59  ;;  %v3190_v45 = vld [vmem:[%s4570_s12] sm:$0xff] }
 0x6c7   :  { %v815_v41 = vpop.f32.mrf.mxu1  ;;  %v1011_v14 = vunpack.c.l.b16 %v980_v52 }
 0x6c8   :  { %v822_v62 = vpack.c.b16 %v821_v61, %v820_v60  ;;  %849 = vrot.lane.b32.xlu1 %v815_v41, %s4596_s6 }
 0x6c9   :  { %1281 = vmatpush.bf16.msrb.mxu3 %v3190_v45 }
 0x6ca   :  { %2986 = vmatmul.msk.bf16.vlgmr.msra.gmra.mxu2 %vm567_vm9, %v822_v62 }
 0x6e4   :  { %v965_v63 = vpop.xlane.xlu2 %964 }
 0x6e5   :  { %3324 = vrcp.f32 %v965_v63  ;;  %v1158_v21 = vpop.xlane.xlu0 %1157 }
 0x6e8   :  { %v1155_v10 = vpop.xlane.xlu1 %1154 }
 0x6eb   :  { %v3325_v3 = vpop.eup %3324 }
 0x6ec   :  { %v975_v55 = vmul.f32 %v3325_v3, %v3311_v42  ;;  %v1149_v5 = vpop.xlane.xlu2 %1148 }
 0x6ed   :  { %3326 = vrcp.f32 %v1149_v5  ;;  %v3245_v5 = vld [vmem:[%s4571_s13] ss:$0 sm:$0xff] }
 0x6ee   :  { %v979_v9 = vpack.c.bf16 %v975_v55, %v975_v55  ;;  %3328 = vrcp.f32 %v1155_v10  ;;  %v3434_v10 = vld [vmem:[#allocation2] sm:$0xff] }
 0x6ef   :  { %3330 = vrcp.f32 %v1158_v21 }
 0x6f0   :  { %v1010_v17 = vunpack.c.l.b16 %v979_v9 }
 0x6f2   :  { %v1012_v22 = vpack.c.b16 %v1011_v14, %v1010_v17 }
 0x6f3   :  { %v3327_v25 = vpop.eup %3326 }
 0x6f4   :  { %v1152_v23 = vpop.xlane.xlu2 %1151  ;;  %2990 = vmatmul.msk.bf16.vlgmr.msrb.gmra.mxu2 %vm567_vm9, %v1012_v22  ;;  %v3329_v11 = vpop.eup %3328  ;;  %v1163_v34 = vmul.f32 %v3327_v25, %v3984_v36 }
 0x6f5   :  { %3332 = vrcp.f32 %v1152_v23  ;;  %v3331_v26 = vpop.eup %3330  ;;  %v1165_v27 = vmul.f32 %v3329_v11, %v3978_v33  ;;  %v3435_v23 = vld [vmem:[#allocation2 + $0x8] sm:$0xff] }
 0x6f6   :  { %v1167_v28 = vpack.c.bf16 %v1163_v34, %v1163_v34  ;;  %v1166_v31 = vmul.f32 %v3331_v26, %v3973_v48 }
 0x6f7   :  { %v1169_v38 = vpack.c.bf16 %v1165_v27, %v1165_v27 }
 0x6f8   :  { %v1173_v42 = vunpack.c.l.b16 %v1167_v28  ;;  %v1170_v4 = vpack.c.bf16 %v1166_v31, %v1166_v31 }
 0x6f9   :  { %v1200_v6 = vunpack.c.l.b16 %v1169_v38 }
 0x6fa   :  { %v1201_v33 = vunpack.c.l.b16 %v1170_v4 }
 0x6fb   :  { %v3333_v47 = vpop.eup %3332 }
 0x6fc   :  { %v1164_v30 = vmul.f32 %v3333_v47, %v3988_v7  ;;  %v1177_v40 = vpop.permute.xlu2 %1176  ;;  %v1202_v12 = vpack.c.b16 %v1201_v33, %v1200_v6  ;;  %v3436_v47 = vld [vmem:[#allocation2 + $0x10] sm:$0xff] }
 0x6fd   :  { %v1182_v19 = vsel %vm627_vm4, %v1177_v40, 0 }
 0x6fe   :  { %v1168_v0 = vpack.c.bf16 %v1164_v30, %v1164_v30  ;;  %1191 = vmatpush.bf16.msra.mxu1 %v1182_v19 }
 0x700   :  { %v1174_v1 = vunpack.c.l.b16 %v1168_v0 }
 0x702   :  { %v1175_v8 = vpack.c.b16 %v1174_v1, %v1173_v42 }
 0x704   :  { %2993 = vmatmul.msk.bf16.vlgmr.msra.gmra.mxu1 %vm567_vm9, %v1175_v8  ;;  %v1204_v35 = vpop.permute.xlu2 %1203 }
 0x705   :  { %v1209_v36 = vsel %vm627_vm4, %v1204_v35, 0 }
 0x706   :  { %1218 = vmatpush.bf16.msra.mxu2 %v1209_v36 }
 0x709   :  { %2994 = vmatmul.msk.bf16.vlgmr.msra.gmra.mxu2 %vm567_vm9, %v1202_v12 }
 0x71a   :  { %v848_v48 = vpop.permute.xlu2 %847 }
 0x71b   :  { %854 = vst.msk [vmem:[#allocation4] sm:$0xff] %vm853_vm8, %v848_v48 }
 0x73a   :  { %v850_v7 = vpop.permute.xlu1 %849 }
 0x73b   :  { %856 = vst.msk [vmem:[#allocation4 + $0x8] sm:$0xf] %vm4594_vm10, %v850_v7 }
 0x73f   :  { %v1003_v37 = vpop.f32.mrf.mxu1 }
 0x740   :  { %1037 = vrot.lane.b32.xlu2 %v1003_v37, %s4589_s27 }
 0x747   :  { %v1005_v39 = vpop.f32.mrf.mxu1 }
 0x748   :  { %1039 = vrot.lane.b32.xlu2 %v1005_v39, %s4589_s27 }
 0x74d   :  { %v840_v43 = vpop.f32.mrf.mxu2 }
 0x74e   :  { %859 = vrot.lane.b32.xlu0 %v840_v43, %s4596_s6  ;;  %v3193_v43 = vld [vmem:[%s4574_s16 + $0x8] sm:$0xff] }
 0x74f   :  { %1416 = vmatpush.bf16.msrb.mxu0 %v3193_v43 }
 0x755   :  { %v842_v44 = vpop.f32.mrf.mxu2 }
 0x777   :  { %v1030_v13 = vpop.f32.mrf.mxu2 }
 0x778   :  { %1049 = vrot.lane.b32.xlu2 %v1030_v13, %s4589_s27  ;;  %v3192_v13 = vld [vmem:[%s4574_s16] sm:$0xff] }
 0x779   :  { %1417 = vmatpush.bf16.msrb.mxu0 %v3192_v13 }
 0x77f   :  { %v1032_v29 = vpop.f32.mrf.mxu2 }
 0x781   :  { %v1193_v49 = vpop.f32.mrf.mxu1 }
 0x782   :  { %1227 = vrot.lane.b32.xlu0 %v1193_v49, %s4587_s7 }
 0x789   :  { %v1195_v50 = vpop.f32.mrf.mxu1 }
 0x78a   :  { %1229 = vrot.lane.b32.xlu1 %v1195_v50, %s4587_s7  ;;  %861 = vrot.lane.b32.xlu0 %v842_v44, %s4596_s6 }
 0x78c   :  { %v1220_v53 = vpop.f32.mrf.mxu2 }
 0x78d   :  { %1239 = vrot.lane.b32.xlu2 %v1220_v53, %s4587_s7 }
 0x792   :  { %1051 = vrot.lane.b32.xlu1 %v1032_v29, %s4589_s27 }
 0x794   :  { %v1222_v56 = vpop.f32.mrf.mxu2 }
 0x795   :  { %1241 = vrot.lane.b32.xlu2 %v1222_v56, %s4587_s7 }
 0x79a   :  { %v1038_v57 = vpop.permute.xlu2 %1037 }
 0x79b   :  { %1044 = vst.msk [vmem:[#allocation4] sm:$0xff] %vm4595_vm11, %v1038_v57 }
 0x7a2   :  { %v1040_v51 = vpop.permute.xlu2 %1039 }
 0x7a3   :  { %1046 = vst.msk [vmem:[#allocation4 + $0x8] sm:$0xf] %vm4593_vm13, %v1040_v51 }
 0x7c0   :  { %v860_v54 = vpop.permute.xlu0 %859 }
 0x7c1   :  { %865 = vst.msk [vmem:[#allocation4 + $0xc] sm:$0xff] %vm853_vm8, %v860_v54 }
 0x7d2   :  { %v1050_v16 = vpop.permute.xlu2 %1049 }
 0x7d3   :  { %1055 = vst.msk [vmem:[#allocation4 + $0xc] sm:$0xff] %vm4595_vm11, %v1050_v16 }
 0x7e7   :  { %v1240_v59 = vpop.permute.xlu2 %1239 }
 0x7e8   :  { %1245 = vst.msk [vmem:[#allocation4 + $0xc] sm:$0xff] %vm4592_vm14, %v1240_v59 }
 0x7ef   :  { %v1242_v32 = vpop.permute.xlu2 %1241 }
 0x7f4   :  { %v1228_v60 = vpop.permute.xlu0 %1227 }
 0x7f5   :  { %1234 = vst.msk [vmem:[#allocation4] sm:$0xff] %vm4592_vm14, %v1228_v60 }
 0x7fc   :  { %v1230_v61 = vpop.permute.xlu1 %1229  ;;  %v862_v41 = vpop.permute.xlu0 %861  ;;  %v1247_v63 = vld [vmem:[#allocation4] sm:$0xff] }
 0x7fd   :  { %1236 = vst.msk [vmem:[#allocation4 + $0x8] sm:$0xf] %vm4591_vm5, %v1230_v61 }
 0x7fe   :  { %866 = vst.msk [vmem:[#allocation4 + $0x14] sm:$0xf] %vm4594_vm10, %v862_v41 }
 0x804   :  { %v1052_v62 = vpop.permute.xlu1 %1051  ;;  %v1248_v2 = vld [vmem:[#allocation4 + $0x8] sm:$0xff] }
 0x805   :  { %1056 = vst.msk [vmem:[#allocation4 + $0x14] sm:$0xf] %vm4593_vm13, %v1052_v62  ;;  %v1254_v3 = vpack.c.bf16 %v1248_v2, %v1247_v63 }
 0x806   :  { %1246 = vst.msk [vmem:[#allocation4 + $0x14] sm:$0xf] %vm4591_vm5, %v1242_v32 }
 0x807   :  { %3003 = vmatmul.msk.bf16.vlgmr.msrb.gmra.mxu3 %vm79_vm2, %v1254_v3  ;;  %v3246_v3 = vld [vmem:[%s4572_s14] ss:$0 sm:$0xff] }
 0x80d   :  { %v1249_v52 = vld [vmem:[#allocation4 + $0x10] sm:$0xff] }
 0x80e   :  { %v1255_v55 = vpack.c.bf16 %v1249_v52, %v1249_v52 }
 0x817   :  { %3004 = vmatmul.msk.bf16.gmra.mxu3 %vm79_vm2, %v1255_v55 }
 0x88a   :  { %v1283_v9 = vpop.f32.mrf.mxu3 }
 0x88b   :  { %v1292_v14 = vadd.f32 %v3434_v10, %v1283_v9 }
 0x88d   :  { %v4049_v17 = vadd.f32 %v3245_v5, %v1292_v14  ;;  %v3247_v14 = vld [vmem:[%s4573_s15] ss:$0 sm:$0xff] }
 0x88f   :  { %v1304_v21 = vsel %vm79_vm2, %v4049_v17, 0.0 }
 0x890   :  { %1305 = vadd.xlane.f32.xlu0 %v1304_v21 }
 0x892   :  { %v1285_v22 = vpop.f32.mrf.mxu3 }
 0x893   :  { %v1293_v25 = vadd.f32 %v3435_v23, %v1285_v22 }
 0x895   :  { %v4053_v11 = vadd.f32 %v3245_v5, %v1293_v25 }
 0x897   :  { %v1307_v34 = vsel %vm79_vm2, %v4053_v11, 0.0 }
 0x898   :  { %1308 = vadd.xlane.f32.xlu1 %v1307_v34 }
 0x89a   :  { %v1288_v26 = vpop.f32.mrf.mxu3 }
 0x89b   :  { %v1294_v27 = vadd.f32 %v3436_v47, %v1288_v26 }
 0x89d   :  { %v4057_v28 = vadd.f32 %v3245_v5, %v1294_v27 }
 0x89f   :  { %v1310_v30 = vsel %vm79_vm2, %v4057_v28, 0.0 }
 0x8a0   :  { %1311 = vadd.xlane.f32.xlu2 %v1310_v30 }
 0x8a2   :  { %v1290_v40 = vpop.f32.mrf.mxu3 }
 0x903   :  { %v1306_v31 = vpop.xlane.xlu0 %1305 }
 0x904   :  { %v1313_v19 = vmul.f32 %v1306_v31, %v3693_v58 }
 0x906   :  { %v1316_v0 = vsub.f32 %v4049_v17, %v1313_v19 }
 0x908   :  { %v1319_v38 = vmul.f32 %v1316_v0, %v1316_v0 }
 0x90a   :  { %v1322_v42 = vsel %vm79_vm2, %v1319_v38, 0.0 }
 0x90b   :  { %v1309_v1 = vpop.xlane.xlu1 %1308  ;;  %1323 = vadd.xlane.f32.xlu0 %v1322_v42  ;;  %v3201_v42 = vld [vmem:[%s4576_s18 + $0x38] sm:$0xff] }
 0x90c   :  { %v1314_v4 = vmul.f32 %v1309_v1, %v3693_v58  ;;  %1521 = vmatpush.bf16.msrb.mxu1 %v3201_v42  ;;  %v3200_v1 = vld [vmem:[%s4576_s18 + $0x30] sm:$0xff] }
 0x90e   :  { %v1317_v8 = vsub.f32 %v4053_v11, %v1314_v4  ;;  %v3199_v4 = vld [vmem:[%s4576_s18 + $0x28] sm:$0xff] }
 0x910   :  { %v1320_v6 = vmul.f32 %v1317_v8, %v1317_v8  ;;  %1522 = vmatpush.bf16.msrb.mxu1 %v3200_v1 }
 0x912   :  { %v1325_v35 = vsel %vm79_vm2, %v1320_v6, 0.0  ;;  %v3197_v6 = vld [vmem:[%s4576_s18 + $0x18] sm:$0xff] }
 0x913   :  { %1326 = vadd.xlane.f32.xlu1 %v1325_v35  ;;  %v1312_v33 = vpop.xlane.xlu2 %1311  ;;  %v3196_v35 = vld [vmem:[%s4576_s18 + $0x10] sm:$0xff] }
 0x914   :  { %v1315_v36 = vmul.f32 %v1312_v33, %v3693_v58  ;;  %1523 = vmatpush.bf16.msrb.mxu1 %v3199_v4  ;;  %v3195_v33 = vld [vmem:[%s4576_s18 + $0x8] sm:$0xff] }
 0x916   :  { %v1318_v12 = vsub.f32 %v4057_v28, %v1315_v36  ;;  %v3248_v36 = vld [vmem:[%s4627_s29] ss:$0 sm:$0xff] }
 0x918   :  { %v1321_v48 = vmul.f32 %v1318_v12, %v1318_v12 }
 0x91a   :  { %v1328_v7 = vsel %vm79_vm2, %v1321_v48, 0.0 }
 0x91b   :  { %1329 = vadd.xlane.f32.xlu2 %v1328_v7 }
 0x97e   :  { %v1324_v37 = vpop.xlane.xlu0 %1323 }
 0x97f   :  { %v1331_v39 = vmul.f32 %v1324_v37, %v3693_v58 }
 0x981   :  { %v1334_v44 = vadd.f32 1e-05, %v1331_v39 }
 0x983   :  { %3334 = vrsqrt.f32 %v1334_v44  ;;  %vm1343_vm5 = vweird.f32 %v1334_v44 }
 0x986   :  { %v1327_v49 = vpop.xlane.xlu1 %1326 }
 0x987   :  { %v1332_v29 = vmul.f32 %v1327_v49, %v3693_v58 }
 0x989   :  { %v3335_v50 = vpop.eup %3334  ;;  %v1335_v53 = vadd.f32 1e-05, %v1332_v29 }
 0x98a   :  { %v1338_v56 = vmul.f32 %v3335_v50, %v1334_v44  ;;  %vm1344_vm7 = vweird.f32 %v3335_v50 }
 0x98b   :  { %3336 = vrsqrt.f32 %v1335_v53  ;;  %vm1345_vm14 = vmor %vm1343_vm5, %vm1344_vm7  ;;  %vm1353_vm10 = vweird.f32 %v1335_v53 }
 0x98c   :  { %v1339_v57 = vmul.f32 %v3335_v50, %v1338_v56 }
 0x98e   :  { %v1340_v51 = vmul.f32 0.5, %v1339_v57  ;;  %v1330_v54 = vpop.xlane.xlu2 %1329 }
 0x98f   :  { %v1333_v16 = vmul.f32 %v1330_v54, %v3693_v58 }
 0x990   :  { %v1341_v18 = vsub.f32 1.5, %v1340_v51 }
 0x991   :  { %v3337_v45 = vpop.eup %3336  ;;  %v1336_v59 = vadd.f32 1e-05, %v1333_v16 }
 0x992   :  { %v1342_v60 = vmul.f32 %v3335_v50, %v1341_v18  ;;  %v1348_v61 = vmul.f32 %v3337_v45, %v1335_v53  ;;  %vm1354_vm13 = vweird.f32 %v3337_v45 }
 0x993   :  { %3338 = vrsqrt.f32 %v1336_v59  ;;  %vm1355_vm11 = vmor %vm1353_vm10, %vm1354_vm13  ;;  %vm1363_vm5 = vweird.f32 %v1336_v59 }
 0x994   :  { %v1349_v41 = vmul.f32 %v3337_v45, %v1348_v61  ;;  %v1346_v62 = vsel %vm1345_vm14, %v3335_v50, %v1342_v60 }
 0x995   :  { %v1367_v52 = vmul.f32 %v1346_v62, %v1316_v0 }
 0x996   :  { %v1350_v63 = vmul.f32 0.5, %v1349_v41 }
 0x997   :  { %v1373_v21 = vmul.f32 %v3246_v3, %v1367_v52 }
 0x998   :  { %v1351_v2 = vsub.f32 1.5, %v1350_v63 }
 0x999   :  { %v3339_v32 = vpop.eup %3338  ;;  %v1379_v26 = vadd.f32 %v3247_v14, %v1373_v21 }
 0x99a   :  { %v1352_v55 = vmul.f32 %v3337_v45, %v1351_v2  ;;  %v1358_v5 = vmul.f32 %v3339_v32, %v1336_v59  ;;  %vm1364_vm14 = vweird.f32 %v3339_v32 }
 0x99b   :  { %vm1365_vm7 = vmor %vm1363_vm5, %vm1364_vm14 }
 0x99c   :  { %v1356_v9 = vsel %vm1355_vm11, %v3337_v45, %v1352_v55  ;;  %v1359_v10 = vmul.f32 %v3339_v32, %v1358_v5 }
 0x99d   :  { %v1368_v22 = vmul.f32 %v1356_v9, %v1317_v8  ;;  %v3198_v8 = vld [vmem:[%s4576_s18 + $0x20] sm:$0xff] }
 0x99e   :  { %v1360_v23 = vmul.f32 0.5, %v1359_v10  ;;  %1524 = vmatpush.bf16.msrb.mxu1 %v3198_v8 }
 0x99f   :  { %v1374_v25 = vmul.f32 %v3246_v3, %v1368_v22 }
 0x9a0   :  { %v1361_v34 = vsub.f32 1.5, %v1360_v23 }
 0x9a1   :  { %v1380_v47 = vadd.f32 %v3247_v14, %v1374_v25  ;;  %v3249_v25 = vld [vmem:[%s4577_s19] ss:$0 sm:$0xff] }
 0x9a2   :  { %v1362_v27 = vmul.f32 %v3339_v32, %v1361_v34  ;;  %1525 = vmatpush.bf16.msrb.mxu1 %v3197_v6 }
 0x9a3   :  { %v1386_v30 = vpack.c.bf16 %v1380_v47, %v1379_v26 }
 0x9a4   :  { %v1366_v40 = vsel %vm1365_vm7, %v3339_v32, %v1362_v27 }
 0x9a5   :  { %3013 = vmatmul.msk.bf16.vlgmr.msrb.gmra.mxu0 %vm79_vm2, %v1386_v30  ;;  %v1369_v31 = vmul.f32 %v1366_v40, %v1318_v12  ;;  %v3194_v12 = vld [vmem:[%s4576_s18] sm:$0xff] }
 0x9a6   :  { %1526 = vmatpush.bf16.msrb.mxu1 %v3196_v35 }
 0x9a7   :  { %v1375_v19 = vmul.f32 %v3246_v3, %v1369_v31 }
 0x9a9   :  { %v1381_v0 = vadd.f32 %v3247_v14, %v1375_v19 }
 0x9aa   :  { %1527 = vmatpush.bf16.msrb.mxu1 %v3195_v33 }
 0x9ab   :  { %v1387_v38 = vpack.c.bf16 %v1381_v0, %v1381_v0 }
 0x9ae   :  { %1528 = vmatpush.bf16.msrb.mxu1 %v3194_v12 }
 0x9b5   :  { %3014 = vmatmul.msk.bf16.gmra.mxu0 %vm79_vm2, %v1387_v38 }
 0xa22   :  { %v1419_v48 = vpop.f32.mrf.mxu0 }
 0xa23   :  { %v1420_v7 = vadd.f32 %v3248_v36, %v1419_v48 }
 0xa25   :  { %v1431_v37 = vmul.f32 0.044715, %v1420_v7  ;;  %v1428_v32 = vmul.f32 0.5, %v1420_v7 }
 0xa27   :  { %v1434_v39 = vmul.f32 %v1431_v37, %v1420_v7 }
 0xa29   :  { %v1437_v43 = vmul.f32 %v1434_v39, %v1420_v7 }
 0xa2a   :  { %v1421_v44 = vpop.f32.mrf.mxu0 }
 0xa2b   :  { %v1440_v13 = vadd.f32 %v1437_v43, %v1420_v7  ;;  %v1422_v49 = vadd.f32 %v3248_v36, %v1421_v44 }
 0xa2d   :  { %v1432_v29 = vmul.f32 0.044715, %v1422_v49  ;;  %v1443_v50 = vmul.f32 0.7978846, %v1440_v13  ;;  %v1429_v3 = vmul.f32 0.5, %v1422_v49 }
 0xa2f   :  { %v1435_v53 = vmul.f32 %v1432_v29, %v1422_v49  ;;  %3340 = vtanh.f32 %v1443_v50  ;;  %v3203_v29 = vld [vmem:[%s4568_s10 + $0x18] sm:$0xff] }
 0xa30   :  { %1667 = vmatpush.bf16.msrb.mxu2 %v3203_v29 }
 0xa31   :  { %v1438_v56 = vmul.f32 %v1435_v53, %v1422_v49  ;;  %v3202_v53 = vld [vmem:[%s4568_s10 + $0x10] sm:$0xff] }
 0xa32   :  { %v1424_v57 = vpop.f32.mrf.mxu0 }
 0xa33   :  { %v1441_v51 = vadd.f32 %v1438_v56, %v1422_v49  ;;  %v1425_v54 = vadd.f32 %v3248_v36, %v1424_v57 }
 0xa34   :  { %1668 = vmatpush.bf16.msrb.mxu2 %v3202_v53 }
 0xa35   :  { %v1444_v16 = vmul.f32 0.7978846, %v1441_v51  ;;  %v1433_v18 = vmul.f32 0.044715, %v1425_v54  ;;  %v3341_v59 = vpop.eup %3340  ;;  %v1430_v21 = vmul.f32 0.5, %v1425_v54 }
 0xa36   :  { %v1449_v62 = vadd.f32 1.0, %v3341_v59 }
 0xa37   :  { %3342 = vtanh.f32 %v1444_v16  ;;  %v1436_v45 = vmul.f32 %v1433_v18, %v1425_v54 }
 0xa38   :  { %v1452_v55 = vmul.f32 %v1449_v62, %v1428_v32 }
 0xa39   :  { %v1439_v60 = vmul.f32 %v1436_v45, %v1425_v54 }
 0xa3a   :  { %v1426_v61 = vpop.f32.mrf.mxu0 }
 0xa3b   :  { %v1442_v41 = vadd.f32 %v1439_v60, %v1425_v54 }
 0xa3d   :  { %v3343_v63 = vpop.eup %3342  ;;  %v1445_v2 = vmul.f32 0.7978846, %v1442_v41 }
 0xa3e   :  { %v1450_v52 = vadd.f32 1.0, %v3343_v63 }
 0xa3f   :  { %3344 = vtanh.f32 %v1445_v2 }
 0xa40   :  { %v1453_v5 = vmul.f32 %v1450_v52, %v1429_v3 }
 0xa42   :  { %v1471_v9 = vpack.c.bf16 %v1453_v5, %v1452_v55 }
 0xa44   :  { %1529 = vmatmul.bf16.vlgmr.msrb.gmra.mxu1 %v1471_v9  ;;  %v3250_v9 = vld [vmem:[%s4566_s8 + $0x1] ss:$0 sm:$0xff] }
 0xa45   :  { %v3345_v10 = vpop.eup %3344 }
 0xa46   :  { %v1451_v14 = vadd.f32 1.0, %v3345_v10 }
 0xa48   :  { %v1454_v22 = vmul.f32 %v1451_v14, %v1430_v21 }
 0xa4a   :  { %v1472_v23 = vpack.c.bf16 %v1454_v22, %v1454_v22 }
 0xa54   :  { %1534 = vmatmul.bf16.gmra.mxu1 %v1472_v23 }
 0xac1   :  { %v1530_v34 = vpop.f32.mrf.mxu1 }
 0xac2   :  { %v1539_v26 = vadd.f32 %v1530_v34, %v4049_v17 }
 0xac4   :  { %v4118_v47 = vadd.f32 %v3249_v25, %v1539_v26 }
 0xac6   :  { %v1553_v27 = vsel %vm79_vm2, %v4118_v47, 0.0 }
 0xac7   :  { %1554 = vadd.xlane.f32.xlu0 %v1553_v27 }
 0xac9   :  { %v1532_v30 = vpop.f32.mrf.mxu1 }
 0xaca   :  { %v1540_v40 = vadd.f32 %v1532_v30, %v4053_v11 }
 0xacc   :  { %v4123_v31 = vadd.f32 %v3249_v25, %v1540_v40 }
 0xace   :  { %v1556_v19 = vsel %vm79_vm2, %v4123_v31, 0.0 }
 0xacf   :  { %1557 = vadd.xlane.f32.xlu1 %v1556_v19 }
 0xad1   :  { %v1535_v0 = vpop.f32.mrf.mxu1 }
 0xad2   :  { %v1541_v38 = vadd.f32 %v1535_v0, %v4057_v28 }
 0xad4   :  { %v4128_v42 = vadd.f32 %v3249_v25, %v1541_v38  ;;  %v3251_v25 = vld [vmem:[%s4567_s9 + $0x1] ss:$0 sm:$0xff] }
 0xad6   :  { %v1559_v17 = vsel %vm79_vm2, %v4128_v42, 0.0 }
 0xad7   :  { %1560 = vadd.xlane.f32.xlu2 %v1559_v17 }
 0xad9   :  { %v1537_v1 = vpop.f32.mrf.mxu1 }
 0xb3a   :  { %v1555_v4 = vpop.xlane.xlu0 %1554 }
 0xb3b   :  { %v1562_v8 = vmul.f32 %v1555_v4, %v3693_v58 }
 0xb3d   :  { %v1565_v11 = vsub.f32 %v4118_v47, %v1562_v8 }
 0xb3f   :  { %v1568_v6 = vmul.f32 %v1565_v11, %v1565_v11 }
 0xb41   :  { %v1571_v35 = vsel %vm79_vm2, %v1568_v6, 0.0 }
 0xb42   :  { %1572 = vadd.xlane.f32.xlu0 %v1571_v35  ;;  %v1558_v33 = vpop.xlane.xlu1 %1557  ;;  %v3252_v35 = vld [vmem:[%s4569_s11 + $0x1] ss:$0 sm:$0xff]  ;;  %s4628_s11 = smov 112  }
 0xb43   :  { %v1563_v36 = vmul.f32 %v1558_v33, %v3693_v58 }
 0xb45   :  { %v1566_v28 = vsub.f32 %v4123_v31, %v1563_v36 }
 0xb47   :  { %v1569_v12 = vmul.f32 %v1566_v28, %v1566_v28 }
 0xb49   :  { %v1574_v48 = vsel %vm79_vm2, %v1569_v12, 0.0 }
 0xb4a   :  { %1575 = vadd.xlane.f32.xlu1 %v1574_v48  ;;  %v1561_v7 = vpop.xlane.xlu2 %1560 }
 0xb4b   :  { %v1564_v37 = vmul.f32 %v1561_v7, %v3693_v58 }
 0xb4d   :  { %v1567_v39 = vsub.f32 %v4128_v42, %v1564_v37 }
 0xb4f   :  { %v1570_v43 = vmul.f32 %v1567_v39, %v1567_v39 }
 0xb51   :  { %v1577_v44 = vsel %vm79_vm2, %v1570_v43, 0.0 }
 0xb52   :  { %1578 = vadd.xlane.f32.xlu2 %v1577_v44 }
 0xbb5   :  { %v1573_v13 = vpop.xlane.xlu0 %1572 }
 0xbb6   :  { %v1580_v49 = vmul.f32 %v1573_v13, %v3693_v58 }
 0xbb8   :  { %v1583_v50 = vadd.f32 1e-05, %v1580_v49 }
 0xbba   :  { %3346 = vrsqrt.f32 %v1583_v50  ;;  %vm1592_vm11 = vweird.f32 %v1583_v50 }
 0xbbd   :  { %v1576_v56 = vpop.xlane.xlu1 %1575 }
 0xbbe   :  { %v1581_v57 = vmul.f32 %v1576_v56, %v3693_v58 }
 0xbc0   :  { %v3347_v51 = vpop.eup %3346  ;;  %v1584_v54 = vadd.f32 1e-05, %v1581_v57 }
 0xbc1   :  { %v1587_v16 = vmul.f32 %v3347_v51, %v1583_v50  ;;  %vm1593_vm10 = vweird.f32 %v3347_v51 }
 0xbc2   :  { %3348 = vrsqrt.f32 %v1584_v54  ;;  %vm1594_vm13 = vmor %vm1592_vm11, %vm1593_vm10  ;;  %vm1602_vm5 = vweird.f32 %v1584_v54 }
 0xbc3   :  { %v1588_v18 = vmul.f32 %v3347_v51, %v1587_v16 }
 0xbc5   :  { %v1589_v45 = vmul.f32 0.5, %v1588_v18  ;;  %v1579_v59 = vpop.xlane.xlu2 %1578 }
 0xbc6   :  { %v1582_v60 = vmul.f32 %v1579_v59, %v3693_v58 }
 0xbc7   :  { %v1590_v61 = vsub.f32 1.5, %v1589_v45 }
 0xbc8   :  { %v3349_v41 = vpop.eup %3348  ;;  %v1585_v62 = vadd.f32 1e-05, %v1582_v60 }
 0xbc9   :  { %v1591_v63 = vmul.f32 %v3347_v51, %v1590_v61  ;;  %v1597_v2 = vmul.f32 %v3349_v41, %v1584_v54  ;;  %vm1603_vm14 = vweird.f32 %v3349_v41 }
 0xbca   :  { %3350 = vrsqrt.f32 %v1585_v62  ;;  %vm1604_vm7 = vmor %vm1602_vm5, %vm1603_vm14  ;;  %vm1612_vm11 = vweird.f32 %v1585_v62 }
 0xbcb   :  { %v1598_v32 = vmul.f32 %v3349_v41, %v1597_v2  ;;  %v1595_v3 = vsel %vm1594_vm13, %v3347_v51, %v1591_v63 }
 0xbcc   :  { %v1616_v10 = vmul.f32 %v1595_v3, %v1565_v11 }
 0xbcd   :  { %v1599_v52 = vmul.f32 0.5, %v1598_v32 }
 0xbce   :  { %v1622_v34 = vmul.f32 %v3250_v9, %v1616_v10 }
 0xbcf   :  { %v1600_v55 = vsub.f32 1.5, %v1599_v52 }
 0xbd0   :  { %v3351_v5 = vpop.eup %3350  ;;  %v1628_v19 = vadd.f32 %v3251_v25, %v1622_v34 }
 0xbd1   :  { %v1601_v14 = vmul.f32 %v3349_v41, %v1600_v55  ;;  %v1607_v21 = vmul.f32 %v3351_v5, %v1585_v62  ;;  %vm1613_vm10 = vweird.f32 %v3351_v5 }
 0xbd2   :  { %vm1614_vm13 = vmor %vm1612_vm11, %vm1613_vm10 }
 0xbd3   :  { %v1605_v22 = vsel %vm1604_vm7, %v3349_v41, %v1601_v14  ;;  %v1608_v23 = vmul.f32 %v3351_v5, %v1607_v21 }
 0xbd4   :  { %v1617_v26 = vmul.f32 %v1605_v22, %v1566_v28 }
 0xbd5   :  { %v1609_v27 = vmul.f32 0.5, %v1608_v23 }
 0xbd6   :  { %v1623_v30 = vmul.f32 %v3250_v9, %v1617_v26 }
 0xbd7   :  { %v1610_v40 = vsub.f32 1.5, %v1609_v27 }
 0xbd8   :  { %v1629_v0 = vadd.f32 %v3251_v25, %v1623_v30 }
 0xbd9   :  { %v1611_v38 = vmul.f32 %v3351_v5, %v1610_v40 }
 0xbda   :  { %v1636_v17 = vpack.c.bf16 %v1629_v0, %v1628_v19 }
 0xbdb   :  { %v1615_v1 = vsel %vm1614_vm13, %v3351_v5, %v1611_v38 }
 0xbdc   :  { %3062 = vmatmul.msk.bf16.vlgmr.msrb.gmra.mxu2 %vm79_vm2, %v1636_v17  ;;  %v1618_v4 = vmul.f32 %v1615_v1, %v1567_v39 }
 0xbde   :  { %v1624_v8 = vmul.f32 %v3250_v9, %v1618_v4 }
 0xbe0   :  { %v1630_v11 = vadd.f32 %v3251_v25, %v1624_v8 }
 0xbe2   :  { %v1637_v6 = vpack.c.bf16 %v1630_v11, %v1630_v11 }
 0xbec   :  { %3063 = vmatmul.msk.bf16.gmra.mxu2 %vm79_vm2, %v1637_v6 }
 0xc5f   :  { %v1670_v33 = vpop.f32.mrf.mxu2 }
 0xc60   :  { %v1671_v36 = vadd.f32 %v3252_v35, %v1670_v33 }
 0xc62   :  { %1679 = vst.msk [vmem:[#allocation3] sm:$0xff] %vm496_vm15, %v1671_v36 }
 0xc67   :  { %v1672_v28 = vpop.f32.mrf.mxu2 }
 0xc68   :  { %v1673_v12 = vadd.f32 %v3252_v35, %v1672_v28 }
 0xc69   :  { %v1683_v48 = vld [vmem:[#allocation3] sm:$0xff] }
 0xc6a   :  { %1680 = vst.msk [vmem:[#allocation3 + $0x8] sm:$0xf] %vm498_vm0, %v1673_v12  ;;  %v1687_v39 = vpack.c.bf16 %v1683_v48, %v1683_v48  ;;  %vm4638_vm0 = vcmask 126016  }
 0xc6b   :  { %1681 = vst.msk [vmem:[#allocation3 + $0xc] sm:$0xf0] %vm501_vm1, %v1673_v12 }
 0xc6c   :  { %v1693_v29 = vunpack.c.l.b16 %v1687_v39 }
 0xc6f   :  { %v1675_v7 = vpop.f32.mrf.mxu2 }
 0xc70   :  { %v1676_v37 = vadd.f32 %v3252_v35, %v1675_v7 }
 0xc71   :  { %v1684_v43 = vld [vmem:[#allocation3 + $0x8] sm:$0xf] }
 0xc72   :  { %v1852_v44 = vld [vmem:[#allocation3 + $0x8] sm:$0xf]  ;;  %1682 = vst.msk [vmem:[#allocation3 + $0x14] sm:$0xff] %vm496_vm15, %v1676_v37  ;;  %v1688_v13 = vpack.c.bf16 %v1684_v43, %v1684_v43  ;;  %vm4637_vm15 = vcmask 195712  }
 0xc73   :  { %v1856_v49 = vpack.c.bf16 %v1852_v44, %v1852_v44  ;;  %v2040_v2 = vld [vmem:[#allocation3 + $0x8] sm:$0xf]  ;;  %vm4639_vm1 = vmmov %vm4637_vm15 }
 0xc74   :  { %v1694_v50 = vunpack.c.l.b16 %v1688_v13  ;;  %v2044_v55 = vpack.c.bf16 %v2040_v2, %v2040_v2  ;;  %v2228_v10 = vld [vmem:[#allocation3 + $0x8] sm:$0xf] }
 0xc75   :  { %v1862_v53 = vunpack.c.l.b16 %v1856_v49  ;;  %v2232_v21 = vpack.c.bf16 %v2228_v10, %v2228_v10 }
 0xc76   :  { %v1695_v56 = vpack.c.b16 %v1694_v50, %v1693_v29  ;;  %v2050_v9 = vunpack.c.l.b16 %v2044_v55 }
 0xc77   :  { %v1863_v57 = vpack.c.b16 %v1862_v53, %v1693_v29  ;;  %v1677_v51 = vpop.f32.mrf.mxu2  ;;  %v2238_v23 = vunpack.c.l.b16 %v2232_v21 }
 0xc78   :  { %1696 = vrot.lane.b32.xlu0 %v1695_v56, %s3465_s26  ;;  %v4172_v22 = vpack.c.b16 %v2050_v9, %v1693_v29 }
 0xc79   :  { %1866 = vrot.lane.b32.xlu2 %v1863_v57, %s3468_s28  ;;  %v1853_v54 = vld [vmem:[#allocation3 + $0x10] sm:$0xff]  ;;  %v1854_v16 = vld [vmem:[#allocation3 + $0x18] sm:$0xf]  ;;  %v4179_v34 = vpack.c.b16 %v2238_v23, %v1693_v29 }
 0xc7a   :  { %v1686_v18 = vld [vmem:[#allocation3 + $0x18] sm:$0xf]  ;;  %v1857_v45 = vpack.c.bf16 %v1853_v54, %v1853_v54  ;;  %v1858_v59 = vpack.c.bf16 %v1854_v16, %v1854_v16 }
 0xc7b   :  { %v1690_v60 = vpack.c.bf16 %v1686_v18, %v1686_v18  ;;  %v2042_v61 = vld [vmem:[#allocation3 + $0x18] sm:$0xf] }
 0xc7c   :  { %v1890_v41 = vunpack.c.l.b16 %v1857_v45  ;;  %v1891_v62 = vunpack.c.l.b16 %v1858_v59  ;;  %v2046_v52 = vpack.c.bf16 %v2042_v61, %v2042_v61  ;;  %v2230_v25 = vld [vmem:[#allocation3 + $0x18] sm:$0xf] }
 0xc7d   :  { %v1721_v63 = vunpack.c.l.b16 %v1690_v60  ;;  %v2234_v26 = vpack.c.bf16 %v2230_v25, %v2230_v25 }
 0xc7e   :  { %v1892_v32 = vpack.c.b16 %v1891_v62, %v1890_v41  ;;  %v2079_v5 = vunpack.c.l.b16 %v2046_v52 }
 0xc7f   :  { %v1722_v3 = vpack.c.b16 %v1721_v63, %v1890_v41  ;;  %v2267_v27 = vunpack.c.l.b16 %v2234_v26 }
 0xc80   :  { %1864 = vrot.lane.b32.xlu0 %v1863_v57, %s3469_s17  ;;  %v4170_v14 = vpack.c.b16 %v2079_v5, %v1890_v41 }
 0xc81   :  { %1893 = vrot.lane.b32.xlu2 %v1892_v32, %s3469_s17  ;;  %1723 = vrot.lane.b32.xlu1 %v1722_v3, %s3465_s26  ;;  %v4187_v30 = vpack.c.b16 %v2267_v27, %v1890_v41  ;;  %s4629_s26 = smov 64   ;;  %s4631_s17 = smov 56  }
 0xc88   :  { %1895 = vrot.lane.b32.xlu0 %v1892_v32, %s3468_s28  ;;  %s4630_s28 = smov 72  }
 0xc89   :  { %2083 = vrot.lane.b32.xlu2 %v4170_v14, %s3472_s3  ;;  %2054 = vrot.lane.b32.xlu1 %v4172_v22, %s3472_s3  ;;  %s4632_s3 = smov 48  }
 0xc90   :  { %2052 = vrot.lane.b32.xlu0 %v4172_v22, %s4628_s11 }
 0xc91   :  { %2240 = vrot.lane.b32.xlu2 %v4179_v34, %s3473_s0  ;;  %2081 = vrot.lane.b32.xlu1 %v4170_v14, %s4628_s11 }
 0xc98   :  { %2242 = vrot.lane.b32.xlu0 %v4179_v34, %s4630_s28 }
 0xc99   :  { %1798 = vrot.lane.b32.xlu2 %v1695_v56, %s4629_s26  ;;  %2271 = vrot.lane.b32.xlu1 %v4187_v30, %s4630_s28  ;;  %s2856_s28 = sshll.u32 %s4581_s23, 4  ;;  %s2857_s28 = int_to_ptr.hbm [resolvable:$true] %s2856_s28 }
 0xca0   :  { %2269 = vrot.lane.b32.xlu0 %v4187_v30, %s3473_s0  ;;  %s4633_s0 = smov 40  }
 0xca1   :  { %1970 = vrot.lane.b32.xlu2 %v1863_v57, %s4631_s17 }
 0xca8   :  { %1825 = vrot.lane.b32.xlu0 %v1722_v3, %s4629_s26 }
 0xca9   :  { %1997 = vrot.lane.b32.xlu2 %v1892_v32, %s4631_s17  ;;  %s3481_s17 = smov 128  }
 0xcd3   :  { %v1867_v40 = vpop.permute.xlu2 %1866 }
 0xcd4   :  { %v1872_v33 = vsel %vm519_vm3, %v1867_v40, 0 }
 0xcdb   :  { %v1894_v19 = vpop.permute.xlu2 %1893 }
 0xce3   :  { %v2084_v0 = vpop.permute.xlu2 %2083 }
 0xce4   :  { %v2089_v39 = vsel %vm519_vm3, %v2084_v0, 0 }
 0xcea   :  { %v1697_v38 = vpop.permute.xlu0 %1696 }
 0xceb   :  { %v2241_v17 = vpop.permute.xlu2 %2240  ;;  %v1702_v1 = vsel %vm519_vm3, %v1697_v38, 0 }
 0xcec   :  { %1711 = vmatpush.bf16.xpose.msra.mxu3 %v1702_v1 }
 0xcf2   :  { %v1865_v4 = vpop.permute.xlu0 %1864 }
 0xcf3   :  { %v1799_v8 = vpop.permute.xlu2 %1798  ;;  %v1724_v11 = vpop.permute.xlu1 %1723  ;;  %3064 = vmatmul.msk.bf16.vlgmr.msra.gmra.mxu3 %vm519_vm3, %v1695_v56 }
 0xcf4   :  { %v1804_v6 = vsel %vm627_vm4, %v1799_v8, 0  ;;  %v1729_v35 = vsel %vm519_vm3, %v1724_v11, 0 }
 0xcf5   :  { %1813 = vmatpush.bf16.msra.mxu2 %v1804_v6  ;;  %1738 = vmatpush.bf16.xpose.msra.mxu0 %v1729_v35 }
 0xcfa   :  { %v1896_v36 = vpop.permute.xlu0 %1895 }
 0xcfb   :  { %v1971_v28 = vpop.permute.xlu2 %1970  ;;  %v1901_v12 = vsel %vm519_vm3, %v1896_v36, 0  ;;  %v2055_v48 = vpop.permute.xlu1 %2054 }
 0xcfc   :  { %v1976_v7 = vsel %vm627_vm4, %v1971_v28, 0  ;;  %v2060_v37 = vsel %vm519_vm3, %v2055_v48, 0  ;;  %3065 = vmatmul.msk.bf16.vlgmr.msra.gmra.mxu0 %vm519_vm3, %v1722_v3  ;;  %1910 = vmatpush.bf16.xpose.msra.mxu1 %v1901_v12 }
 0xcfd   :  { %1881 = vmatpush.bf16.xpose.msrb.mxu0 %v1872_v33  ;;  %1985 = vmatpush.bf16.msrb.mxu2 %v1976_v7 }
 0xd02   :  { %v2053_v43 = vpop.permute.xlu0 %2052 }
 0xd03   :  { %v2082_v44 = vpop.permute.xlu1 %2081  ;;  %3069 = vmatmul.msk.bf16.vlgmr.msra.gmra.mxu1 %vm519_vm3, %v1894_v19  ;;  %v1998_v56 = vpop.permute.xlu2 %1997 }
 0xd04   :  { %2098 = vmatpush.bf16.xpose.msrb.mxu1 %v2089_v39  ;;  %v2003_v54 = vsel %vm627_vm4, %v1998_v56, 0 }
 0xd05   :  { %2069 = vmatpush.bf16.xpose.msra.mxu0 %v2060_v37 }
 0xd0a   :  { %v2243_v13 = vpop.permute.xlu0 %2242 }
 0xd0b   :  { %v2248_v49 = vsel %vm519_vm3, %v2243_v13, 0  ;;  %v2272_v29 = vpop.permute.xlu1 %2271 }
 0xd0c   :  { %v2277_v50 = vsel %vm519_vm3, %v2272_v29, 0  ;;  %3068 = vmatmul.msk.bf16.vlgmr.msrb.gmra.mxu0 %vm519_vm3, %v1865_v4 }
 0xd0d   :  { %2257 = vmatpush.bf16.xpose.msrb.mxu0 %v2248_v49  ;;  %2286 = vmatpush.bf16.xpose.msra.mxu1 %v2277_v50 }
 0xd12   :  { %v2270_v53 = vpop.permute.xlu0 %2269 }
 0xd13   :  { %3073 = vmatmul.msk.bf16.vlgmr.msrb.gmra.mxu1 %vm519_vm3, %v2082_v44 }
 0xd1a   :  { %v1826_v57 = vpop.permute.xlu0 %1825 }
 0xd1b   :  { %v1831_v51 = vsel %vm627_vm4, %v1826_v57, 0 }
 0xd1c   :  { %3072 = vmatmul.msk.bf16.vlgmr.msra.gmra.mxu0 %vm519_vm3, %v2053_v43  ;;  %1840 = vmatpush.bf16.msrb.mxu3 %v1831_v51 }
 0xd20   :  { %2012 = vmatpush.bf16.msra.mxu3 %v2003_v54 }
 0xd23   :  { %3077 = vmatmul.msk.bf16.vlgmr.msra.gmra.mxu1 %vm519_vm3, %v2270_v53 }
 0xd2c   :  { %3076 = vmatmul.msk.bf16.vlgmr.msrb.gmra.mxu0 %vm519_vm3, %v2241_v17 }
 0xd76   :  { %v1713_v16 = vpop.f32.mrf.mxu3 }
 0xd77   :  { %v4220_v18 = vadd.f32 %v1713_v16, %v3755_v20 }
 0xd79   :  { %v1740_v45 = vpop.f32.mrf.mxu0  ;;  %v1745_v59 = vsel %vm567_vm9, %v4220_v18, -inf }
 0xd7a   :  { %v4225_v60 = vadd.f32 %v1740_v45, %v3833_v46  ;;  %1746 = vmax.xlane.f32.xlu2 %v1745_v59 }
 0xd7c   :  { %v1751_v61 = vsel %vm567_vm9, %v4225_v60, -inf }
 0xd7d   :  { %1752 = vmax.xlane.f32.xlu0 %v1751_v61 }
 0xd7e   :  { %v1715_v41 = vpop.f32.mrf.mxu3 }
 0xd7f   :  { %v4230_v62 = vadd.f32 %v1715_v41, %v3765_v24 }
 0xd80   :  { %v1912_v63 = vpop.f32.mrf.mxu1 }
 0xd81   :  { %v1742_v2 = vpop.f32.mrf.mxu0  ;;  %v4233_v32 = vadd.f32 %v1912_v63, %v3833_v46  ;;  %v1748_v3 = vsel %vm571_vm12, %v4230_v62, -inf }
 0xd82   :  { %v4238_v52 = vadd.f32 %v1742_v2, %v3846_v15  ;;  %1749 = vmax.xlane.f32.xlu1 %v1748_v3 }
 0xd83   :  { %v1923_v55 = vsel %vm567_vm9, %v4233_v32, -inf }
 0xd84   :  { %v1754_v5 = vsel %vm571_vm12, %v4238_v52, -inf }
 0xd85   :  { %1755 = vmax.xlane.f32.xlu2 %v1754_v5  ;;  %1924 = vmax.xlane.f32.xlu0 %v1923_v55 }
 0xd88   :  { %v1914_v9 = vpop.f32.mrf.mxu1 }
 0xd89   :  { %v1883_v10 = vpop.f32.mrf.mxu0  ;;  %v4245_v21 = vadd.f32 %v1914_v9, %v3846_v15 }
 0xd8a   :  { %v4250_v25 = vadd.f32 %v1883_v10, %v3755_v20 }
 0xd8b   :  { %v1926_v23 = vsel %vm571_vm12, %v4245_v21, -inf }
 0xd8c   :  { %1927 = vmax.xlane.f32.xlu1 %v1926_v23  ;;  %v1917_v19 = vsel %vm567_vm9, %v4250_v25, -inf }
 0xd90   :  { %v2100_v26 = vpop.f32.mrf.mxu1 }
 0xd91   :  { %v1885_v27 = vpop.f32.mrf.mxu0  ;;  %v4260_v38 = vadd.f32 %v2100_v26, %v3833_v46 }
 0xd92   :  { %v4253_v40 = vadd.f32 %v1885_v27, %v3765_v24 }
 0xd93   :  { %v2111_v11 = vsel %vm567_vm9, %v4260_v38, -inf }
 0xd94   :  { %v1920_v0 = vsel %vm571_vm12, %v4253_v40, -inf  ;;  %1918 = vmax.xlane.f32.xlu1 %v1917_v19 }
 0xd95   :  { %1921 = vmax.xlane.f32.xlu2 %v1920_v0 }
 0xd98   :  { %v2102_v17 = vpop.f32.mrf.mxu1 }
 0xd99   :  { %v2071_v1 = vpop.f32.mrf.mxu0  ;;  %v4263_v4 = vadd.f32 %v2102_v17, %v3846_v15 }
 0xd9a   :  { %v4270_v6 = vadd.f32 %v2071_v1, %v3755_v20 }
 0xd9b   :  { %v2114_v8 = vsel %vm571_vm12, %v4263_v4, -inf }
 0xd9c   :  { %2112 = vmax.xlane.f32.xlu1 %v2111_v11  ;;  %v2105_v48 = vsel %vm567_vm9, %v4270_v6, -inf }
 0xd9d   :  { %2115 = vmax.xlane.f32.xlu2 %v2114_v8 }
 0xda0   :  { %v2288_v35 = vpop.f32.mrf.mxu1 }
 0xda1   :  { %v2073_v33 = vpop.f32.mrf.mxu0  ;;  %v4273_v36 = vadd.f32 %v2288_v35, %v3833_v46 }
 0xda2   :  { %v4276_v28 = vadd.f32 %v2073_v33, %v3765_v24 }
 0xda3   :  { %v2299_v12 = vsel %vm567_vm9, %v4273_v36, -inf }
 0xda4   :  { %2300 = vmax.xlane.f32.xlu1 %v2299_v12  ;;  %v2108_v7 = vsel %vm571_vm12, %v4276_v28, -inf }
 0xda5   :  { %2106 = vmax.xlane.f32.xlu2 %v2105_v48  ;;  %2109 = vmax.xlane.f32.xlu0 %v2108_v7 }
 0xda8   :  { %v2290_v37 = vpop.f32.mrf.mxu1 }
 0xda9   :  { %v2259_v39 = vpop.f32.mrf.mxu0  ;;  %v4285_v46 = vadd.f32 %v2290_v37, %v3846_v15 }
 0xdaa   :  { %v4288_v43 = vadd.f32 %v2259_v39, %v3755_v20 }
 0xdab   :  { %v2302_v44 = vsel %vm571_vm12, %v4285_v46, -inf }
 0xdac   :  { %v2293_v13 = vsel %vm567_vm9, %v4288_v43, -inf }
 0xdad   :  { %2303 = vmax.xlane.f32.xlu2 %v2302_v44  ;;  %2294 = vmax.xlane.f32.xlu0 %v2293_v13 }
 0xdb1   :  { %v2261_v49 = vpop.f32.mrf.mxu0 }
 0xdb2   :  { %v4295_v29 = vadd.f32 %v2261_v49, %v3765_v24 }
 0xdb4   :  { %v2296_v50 = vsel %vm571_vm12, %v4295_v29, -inf }
 0xdb5   :  { %2297 = vmax.xlane.f32.xlu1 %v2296_v50 }
 0xded   :  { %v1747_v15 = vpop.xlane.xlu2 %1746 }
 0xdee   :  { %v1757_v20 = vsub.f32 %v4220_v18, %v1747_v15 }
 0xdf0   :  { %v1761_v53 = vmul.f32 1.442695, %v1757_v20  ;;  %v1753_v56 = vpop.xlane.xlu0 %1752 }
 0xdf1   :  { %v1759_v57 = vsub.f32 %v4225_v60, %v1753_v56 }
 0xdf2   :  { %3352 = vpow2.f32 %v1761_v53 }
 0xdf3   :  { %v1765_v51 = vmul.f32 1.442695, %v1759_v57 }
 0xdf5   :  { %3354 = vpow2.f32 %v1765_v51  ;;  %v1750_v54 = vpop.xlane.xlu1 %1749 }
 0xdf6   :  { %v1758_v16 = vsub.f32 %v4230_v62, %v1750_v54 }
 0xdf8   :  { %v4302_v45 = vpop.eup %3352  ;;  %v1763_v24 = vmul.f32 1.442695, %v1758_v16  ;;  %v1925_v59 = vpop.xlane.xlu0 %1924 }
 0xdf9   :  { %v1756_v61 = vpop.xlane.xlu2 %1755  ;;  %v1931_v41 = vsub.f32 %v4233_v32, %v1925_v59  ;;  %v1769_v18 = vsel %vm567_vm9, %v4302_v45, 0.0 }
 0xdfa   :  { %1770 = vadd.xlane.f32.xlu2 %v1769_v18  ;;  %3356 = vpow2.f32 %v1763_v24  ;;  %v1760_v2 = vsub.f32 %v4238_v52, %v1756_v61 }
 0xdfb   :  { %v4307_v63 = vpop.eup %3354  ;;  %v1937_v60 = vmul.f32 1.442695, %v1931_v41 }
 0xdfc   :  { %v1775_v62 = vsel %vm567_vm9, %v4307_v63, 0.0  ;;  %v1767_v55 = vmul.f32 1.442695, %v1760_v2 }
 0xdfd   :  { %1776 = vadd.xlane.f32.xlu0 %v1775_v62  ;;  %3358 = vpow2.f32 %v1937_v60 }
 0xdfe   :  { %3360 = vpow2.f32 %v1767_v55 }
 0xdff   :  { %v1928_v3 = vpop.xlane.xlu1 %1927 }
 0xe00   :  { %v4312_v5 = vpop.eup %3356  ;;  %v1932_v32 = vsub.f32 %v4245_v21, %v1928_v3 }
 0xe01   :  { %v1772_v10 = vsel %vm571_vm12, %v4312_v5, 0.0 }
 0xe02   :  { %v1939_v23 = vmul.f32 1.442695, %v1932_v32 }
 0xe03   :  { %v4315_v9 = vpop.eup %3358 }
 0xe04   :  { %v1947_v52 = vsel %vm567_vm9, %v4315_v9, 0.0  ;;  %v4322_v0 = vpop.eup %3360  ;;  %3362 = vpow2.f32 %v1939_v23 }
 0xe05   :  { %1773 = vadd.xlane.f32.xlu0 %v1772_v10  ;;  %1948 = vadd.xlane.f32.xlu1 %v1947_v52  ;;  %v1778_v21 = vsel %vm571_vm12, %v4322_v0, 0.0 }
 0xe07   :  { %v1919_v26 = vpop.xlane.xlu1 %1918 }
 0xe08   :  { %v1922_v27 = vpop.xlane.xlu2 %1921  ;;  %v1929_v19 = vsub.f32 %v4250_v25, %v1919_v26 }
 0xe09   :  { %v1930_v48 = vsub.f32 %v4253_v40, %v1922_v27 }
 0xe0a   :  { %v1933_v17 = vmul.f32 1.442695, %v1929_v19  ;;  %v4327_v35 = vpop.eup %3362 }
 0xe0b   :  { %v1950_v39 = vsel %vm571_vm12, %v4327_v35, 0.0 }
 0xe0c   :  { %3364 = vpow2.f32 %v1933_v17 }
 0xe0d   :  { %1779 = vadd.xlane.f32.xlu1 %v1778_v21 }
 0xe0f   :  { %v2113_v1 = vpop.xlane.xlu1 %2112 }
 0xe10   :  { %v2116_v8 = vpop.xlane.xlu2 %2115  ;;  %v2119_v11 = vsub.f32 %v4260_v38, %v2113_v1  ;;  %v1935_v38 = vmul.f32 1.442695, %v1930_v48 }
 0xe11   :  { %v2120_v33 = vsub.f32 %v4263_v4, %v2116_v8 }
 0xe12   :  { %v4330_v12 = vpop.eup %3364  ;;  %v2125_v25 = vmul.f32 1.442695, %v2119_v11 }
 0xe13   :  { %v2127_v7 = vmul.f32 1.442695, %v2120_v33  ;;  %v1941_v37 = vsel %vm567_vm9, %v4330_v12, 0.0 }
 0xe14   :  { %3366 = vpow2.f32 %v2125_v25  ;;  %1942 = vadd.xlane.f32.xlu0 %v1941_v37 }
 0xe15   :  { %3368 = vpow2.f32 %v2127_v7  ;;  %1951 = vadd.xlane.f32.xlu1 %v1950_v39 }
 0xe16   :  { %3370 = vpow2.f32 %v1935_v38 }
 0xe17   :  { %v2301_v44 = vpop.xlane.xlu1 %2300 }
 0xe18   :  { %v2107_v13 = vpop.xlane.xlu2 %2106  ;;  %v2307_v4 = vsub.f32 %v4273_v36, %v2301_v44  ;;  %v2110_v49 = vpop.xlane.xlu0 %2109 }
 0xe19   :  { %v2118_v50 = vsub.f32 %v4276_v28, %v2110_v49  ;;  %v2117_v57 = vsub.f32 %v4270_v6, %v2107_v13 }
 0xe1a   :  { %v4339_v40 = vpop.eup %3366  ;;  %v2313_v15 = vmul.f32 1.442695, %v2307_v4 }
 0xe1b   :  { %v4341_v20 = vpop.eup %3368  ;;  %v2123_v53 = vmul.f32 1.442695, %v2118_v50  ;;  %v2135_v56 = vsel %vm567_vm9, %v4339_v40, 0.0  ;;  %v2121_v36 = vmul.f32 1.442695, %v2117_v57 }
 0xe1c   :  { %3372 = vpow2.f32 %v2313_v15  ;;  %v2138_v51 = vsel %vm571_vm12, %v4341_v20, 0.0  ;;  %v4348_v54 = vpop.eup %3370 }
 0xe1d   :  { %2139 = vadd.xlane.f32.xlu2 %v2138_v51  ;;  %3374 = vpow2.f32 %v2123_v53  ;;  %2136 = vadd.xlane.f32.xlu1 %v2135_v56  ;;  %v1944_v41 = vsel %vm571_vm12, %v4348_v54, 0.0 }
 0xe1e   :  { %3376 = vpow2.f32 %v2121_v36 }
 0xe20   :  { %v2304_v28 = vpop.xlane.xlu2 %2303  ;;  %v2295_v10 = vpop.xlane.xlu0 %2294 }
 0xe21   :  { %v2308_v16 = vsub.f32 %v4285_v46, %v2304_v28  ;;  %v2305_v52 = vsub.f32 %v4288_v43, %v2295_v10 }
 0xe22   :  { %v4351_v24 = vpop.eup %3372 }
 0xe23   :  { %v2315_v59 = vmul.f32 1.442695, %v2308_v16  ;;  %v2323_v61 = vsel %vm567_vm9, %v4351_v24, 0.0  ;;  %v4355_v6 = vpop.eup %3374  ;;  %v2309_v26 = vmul.f32 1.442695, %v2305_v52 }
 0xe24   :  { %v2132_v18 = vsel %vm571_vm12, %v4355_v6, 0.0  ;;  %v4361_v46 = vpop.eup %3376 }
 0xe25   :  { %3378 = vpow2.f32 %v2315_v59  ;;  %2324 = vadd.xlane.f32.xlu2 %v2323_v61  ;;  %1945 = vadd.xlane.f32.xlu1 %v1944_v41  ;;  %v2129_v62 = vsel %vm567_vm9, %v4361_v46, 0.0 }
 0xe26   :  { %2133 = vadd.xlane.f32.xlu0 %v2132_v18 }
 0xe28   :  { %v2298_v3 = vpop.xlane.xlu1 %2297 }
 0xe29   :  { %v2306_v55 = vsub.f32 %v4295_v29, %v2298_v3 }
 0xe2b   :  { %v4363_v60 = vpop.eup %3378  ;;  %v2311_v32 = vmul.f32 1.442695, %v2306_v55 }
 0xe2c   :  { %v2326_v2 = vsel %vm571_vm12, %v4363_v60, 0.0 }
 0xe2d   :  { %2327 = vadd.xlane.f32.xlu2 %v2326_v2  ;;  %2130 = vadd.xlane.f32.xlu1 %v2129_v62  ;;  %3380 = vpow2.f32 %v2311_v32 }
 0xe2e   :  { %3382 = vpow2.f32 %v2309_v26 }
 0xe33   :  { %v4377_v23 = vpop.eup %3380 }
 0xe3a   :  { %2185 = vrot.lane.b32.xlu0 %v4170_v14, %s4632_s3  ;;  %v2320_v14 = vsel %vm571_vm12, %v4377_v23, 0.0  ;;  %vm4643_vm12 = vcmask 257216  }
 0xe3b   :  { %vm4646_vm14 = vmmov %vm4643_vm12 }
 0xe45   :  { %2346 = vrot.lane.b32.xlu2 %v4179_v34, %s4633_s0  ;;  %v4381_v34 = vpop.eup %3382 }
 0xe46   :  { %2158 = vrot.lane.b32.xlu1 %v4172_v22, %s4632_s3  ;;  %v2317_v22 = vsel %vm567_vm9, %v4381_v34, 0.0 }
 0xe64   :  { %2321 = vadd.xlane.f32.xlu0 %v2320_v14 }
 0xe6d   :  { %v1771_v27 = vpop.xlane.xlu2 %1770 }
 0xe6e   :  { %3384 = vrcp.f32 %v1771_v27 }
 0xe70   :  { %v1777_v29 = vpop.xlane.xlu0 %1776  ;;  %2318 = vadd.xlane.f32.xlu1 %v2317_v22 }
 0xe74   :  { %v3385_v19 = vpop.eup %3384 }
 0xe75   :  { %v1785_v21 = vmul.f32 %v3385_v19, %v4302_v45 }
 0xe77   :  { %v1789_v8 = vpack.c.bf16 %v1785_v21, %v1785_v21 }
 0xe78   :  { %2373 = vrot.lane.b32.xlu0 %v4187_v30, %s4633_s0  ;;  %v1774_v43 = vpop.xlane.xlu0 %1773  ;;  %v1949_v17 = vpop.xlane.xlu1 %1948 }
 0xe79   :  { %3386 = vrcp.f32 %v1774_v43  ;;  %v1795_v7 = vunpack.c.l.b16 %v1789_v8 }
 0xe7a   :  { %3388 = vrcp.f32 %v1777_v29 }
 0xe7f   :  { %v3387_v1 = vpop.eup %3386 }
 0xe80   :  { %v1786_v11 = vmul.f32 %v3387_v1, %v4312_v5  ;;  %v1780_v33 = vpop.xlane.xlu1 %1779  ;;  %v3389_v25 = vpop.eup %3388 }
 0xe81   :  { %3390 = vrcp.f32 %v1780_v33  ;;  %v1787_v39 = vmul.f32 %v3389_v25, %v4307_v63 }
 0xe82   :  { %v1790_v48 = vpack.c.bf16 %v1786_v11, %v1786_v11 }
 0xe83   :  { %v1791_v44 = vpack.c.bf16 %v1787_v39, %v1787_v39 }
 0xe84   :  { %v1796_v37 = vunpack.c.l.b16 %v1790_v48 }
 0xe85   :  { %v1822_v5 = vunpack.c.l.b16 %v1791_v44 }
 0xe86   :  { %v1797_v30 = vpack.c.b16 %v1796_v37, %v1795_v7 }
 0xe87   :  { %v3391_v38 = vpop.eup %3390  ;;  %v1943_v53 = vpop.xlane.xlu0 %1942 }
 0xe88   :  { %3066 = vmatmul.msk.bf16.vlgmr.msra.gmra.mxu2 %vm567_vm9, %v1797_v30  ;;  %v1788_v45 = vmul.f32 %v3391_v38, %v4322_v0  ;;  %v1952_v13 = vpop.xlane.xlu1 %1951 }
 0xe89   :  { %3392 = vrcp.f32 %v1952_v13 }
 0xe8a   :  { %v1792_v4 = vpack.c.bf16 %v1788_v45, %v1788_v45  ;;  %3394 = vrcp.f32 %v1949_v17 }
 0xe8b   :  { %3396 = vrcp.f32 %v1943_v53 }
 0xe8c   :  { %v1823_v49 = vunpack.c.l.b16 %v1792_v4 }
 0xe8e   :  { %v1824_v50 = vpack.c.b16 %v1823_v49, %v1822_v5 }
 0xe8f   :  { %v3393_v15 = vpop.eup %3392 }
 0xe90   :  { %v2137_v56 = vpop.xlane.xlu1 %2136  ;;  %3067 = vmatmul.msk.bf16.vlgmr.msrb.gmra.mxu3 %vm567_vm9, %v1824_v50  ;;  %v3395_v63 = vpop.eup %3394  ;;  %v1960_v57 = vmul.f32 %v3393_v15, %v4327_v35 }
 0xe91   :  { %v1959_v51 = vmul.f32 %v3395_v63, %v4315_v9  ;;  %v2140_v36 = vpop.xlane.xlu2 %2139  ;;  %v3397_v59 = vpop.eup %3396 }
 0xe92   :  { %v1964_v0 = vpack.c.bf16 %v1960_v57, %v1960_v57  ;;  %3398 = vrcp.f32 %v2140_v36  ;;  %v1957_v18 = vmul.f32 %v3397_v59, %v4330_v12 }
 0xe93   :  { %v1963_v28 = vpack.c.bf16 %v1959_v51, %v1959_v51  ;;  %3400 = vrcp.f32 %v2137_v56 }
 0xe94   :  { %v1995_v61 = vunpack.c.l.b16 %v1964_v0  ;;  %v1961_v35 = vpack.c.bf16 %v1957_v18, %v1957_v18 }
 0xe95   :  { %v1994_v41 = vunpack.c.l.b16 %v1963_v28 }
 0xe96   :  { %v1967_v22 = vunpack.c.l.b16 %v1961_v35 }
 0xe97   :  { %v1996_v3 = vpack.c.b16 %v1995_v61, %v1994_v41 }
 0xe98   :  { %v1946_v16 = vpop.xlane.xlu1 %1945  ;;  %v3399_v2 = vpop.eup %3398 }
 0xe99   :  { %3402 = vrcp.f32 %v1946_v16  ;;  %v3401_v62 = vpop.eup %3400  ;;  %v2148_v9 = vmul.f32 %v3399_v2, %v4341_v20  ;;  %v2325_v52 = vpop.xlane.xlu2 %2324 }
 0xe9a   :  { %v2147_v10 = vmul.f32 %v3401_v62, %v4339_v40  ;;  %v2134_v14 = vpop.xlane.xlu0 %2133 }
 0xe9b   :  { %v2152_v12 = vpack.c.bf16 %v2148_v9, %v2148_v9 }
 0xe9c   :  { %v2151_v43 = vpack.c.bf16 %v2147_v10, %v2147_v10 }
 0xe9e   :  { %v2182_v17 = vunpack.c.l.b16 %v2151_v43 }
 0xe9f   :  { %v3403_v55 = vpop.eup %3402 }
 0xea0   :  { %v1958_v32 = vmul.f32 %v3403_v55, %v4348_v54  ;;  %3071 = vmatmul.msk.bf16.vlgmr.msra.gmra.mxu3 %vm567_vm9, %v1996_v3  ;;  %v2131_v27 = vpop.xlane.xlu1 %2130  ;;  %v2183_v54 = vunpack.c.l.b16 %v2152_v12 }
 0xea1   :  { %3404 = vrcp.f32 %v2131_v27  ;;  %v2328_v40 = vpop.xlane.xlu2 %2327 }
 0xea2   :  { %v1962_v26 = vpack.c.bf16 %v1958_v32, %v1958_v32  ;;  %3406 = vrcp.f32 %v2134_v14  ;;  %v2184_v11 = vpack.c.b16 %v2183_v54, %v2182_v17 }
 0xea3   :  { %3408 = vrcp.f32 %v2328_v40  ;;  %v3204_v40 = vld [vmem:[%s4570_s12 + $0x10] sm:$0xff] }
 0xea4   :  { %v1968_v29 = vunpack.c.l.b16 %v1962_v26  ;;  %3410 = vrcp.f32 %v2325_v52 }
 0xea6   :  { %v1969_v19 = vpack.c.b16 %v1968_v29, %v1967_v22 }
 0xea7   :  { %v3405_v1 = vpop.eup %3404 }
 0xea8   :  { %3070 = vmatmul.msk.bf16.vlgmr.msrb.gmra.mxu2 %vm567_vm9, %v1969_v19  ;;  %v3407_v8 = vpop.eup %3406  ;;  %v2145_v33 = vmul.f32 %v3405_v1, %v4361_v46 }
 0xea9   :  { %v2146_v25 = vmul.f32 %v3407_v8, %v4355_v6  ;;  %v2347_v39 = vpop.permute.xlu2 %2346  ;;  %v3409_v4 = vpop.eup %3408 }
 0xeaa   :  { %v2149_v48 = vpack.c.bf16 %v2145_v33, %v2145_v33  ;;  %v2352_v45 = vsel %vm627_vm4, %v2347_v39, 0  ;;  %v3411_v6 = vpop.eup %3410  ;;  %v2336_v5 = vmul.f32 %v3409_v4, %v4363_v60 }
 0xeab   :  { %v2150_v7 = vpack.c.bf16 %v2146_v25, %v2146_v25  ;;  %v2335_v49 = vmul.f32 %v3411_v6, %v4351_v24 }
 0xeac   :  { %v2186_v21 = vpop.permute.xlu0 %2185  ;;  %v2155_v37 = vunpack.c.l.b16 %v2149_v48  ;;  %v2340_v53 = vpack.c.bf16 %v2336_v5, %v2336_v5 }
 0xead   :  { %v2191_v20 = vsel %vm627_vm4, %v2186_v21, 0  ;;  %v2156_v38 = vunpack.c.l.b16 %v2150_v7  ;;  %v2339_v56 = vpack.c.bf16 %v2335_v49, %v2335_v49 }
 0xeae   :  { %2200 = vmatpush.bf16.msrb.mxu3 %v2191_v20  ;;  %v2371_v57 = vunpack.c.l.b16 %v2340_v53  ;;  %v3205_v20 = vld [vmem:[%s4570_s12 + $0x18] sm:$0xff] }
 0xeaf   :  { %v2157_v13 = vpack.c.b16 %v2156_v38, %v2155_v37  ;;  %v2370_v0 = vunpack.c.l.b16 %v2339_v56  ;;  %2449 = vmatpush.bf16.msra.mxu0 %v3205_v20 }
 0xeb1   :  { %3075 = vmatmul.msk.bf16.vlgmr.msrb.gmra.mxu3 %vm567_vm9, %v2184_v11  ;;  %v2372_v60 = vpack.c.b16 %v2371_v57, %v2370_v0 }
 0xeb3   :  { %2450 = vmatpush.bf16.msra.mxu0 %v3204_v40 }
 0xeb8   :  { %v2159_v30 = vpop.permute.xlu1 %2158 }
 0xeb9   :  { %v2164_v44 = vsel %vm627_vm4, %v2159_v30, 0 }
 0xeba   :  { %2173 = vmatpush.bf16.msra.mxu2 %v2164_v44  ;;  %v3253_v44 = vld [vmem:[%s4571_s13 + $0x1] ss:$0 sm:$0xff] }
 0xebd   :  { %3074 = vmatmul.msk.bf16.vlgmr.msra.gmra.mxu2 %vm567_vm9, %v2157_v13 }
 0xebe   :  { %2361 = vmatpush.bf16.msrb.mxu2 %v2352_v45 }
 0xed7   :  { %v2322_v46 = vpop.xlane.xlu0 %2321 }
 0xed8   :  { %3412 = vrcp.f32 %v2322_v46 }
 0xede   :  { %v3413_v15 = vpop.eup %3412 }
 0xedf   :  { %v2334_v63 = vmul.f32 %v3413_v15, %v4377_v23 }
 0xee1   :  { %v2338_v16 = vpack.c.bf16 %v2334_v63, %v2334_v63 }
 0xee3   :  { %v2319_v50 = vpop.xlane.xlu1 %2318  ;;  %v2344_v24 = vunpack.c.l.b16 %v2338_v16 }
 0xee4   :  { %3414 = vrcp.f32 %v2319_v50 }
 0xeea   :  { %v2374_v51 = vpop.permute.xlu0 %2373  ;;  %v3415_v36 = vpop.eup %3414 }
 0xeeb   :  { %v2379_v28 = vsel %vm627_vm4, %v2374_v51, 0  ;;  %v2333_v59 = vmul.f32 %v3415_v36, %v4381_v34  ;;  %vm4641_vm4 = vcmask 261312  }
 0xeec   :  { %2388 = vmatpush.bf16.msra.mxu3 %v2379_v28 }
 0xeed   :  { %v2337_v61 = vpack.c.bf16 %v2333_v59, %v2333_v59 }
 0xeef   :  { %3079 = vmatmul.msk.bf16.vlgmr.msra.gmra.mxu3 %vm567_vm9, %v2372_v60  ;;  %v2343_v41 = vunpack.c.l.b16 %v2337_v61 }
 0xef1   :  { %v2345_v18 = vpack.c.b16 %v2344_v24, %v2343_v41 }
 0xef3   :  { %3078 = vmatmul.msk.bf16.vlgmr.msrb.gmra.mxu2 %vm567_vm9, %v2345_v18  ;;  %vm4642_vm9 = vmmov %vm4641_vm4 }
 0xf0b   :  { %v1815_v23 = vpop.f32.mrf.mxu2 }
 0xf0c   :  { %1847 = vst.msk [vmem:[#allocation4] sm:$0xff] %vm519_vm3, %v1815_v23 }
 0xf13   :  { %v1817_v2 = vpop.f32.mrf.mxu2  ;;  %v1842_v62 = vpop.f32.mrf.mxu3 }
 0xf14   :  { %1848 = vst.msk [vmem:[#allocation4 + $0x8] sm:$0xf] %vm673_vm6, %v1817_v2  ;;  %v3207_v2 = vld [vmem:[%s4574_s16 + $0x18] sm:$0xff] }
 0xf15   :  { %1849 = vst.msk [vmem:[#allocation4 + $0xc] sm:$0xff] %vm519_vm3, %v1842_v62  ;;  %vm4640_vm3 = vcmask 191616   ;;  %2590 = vmatpush.bf16.msrb.mxu1 %v3207_v2 }
 0xf1b   :  { %v1844_v34 = vpop.f32.mrf.mxu3 }
 0xf1c   :  { %1850 = vst.msk [vmem:[#allocation4 + $0x14] sm:$0xf] %vm673_vm6, %v1844_v34  ;;  %vm4644_vm6 = vmmov %vm4638_vm0 }
 0xf23   :  { %v2014_v55 = vpop.f32.mrf.mxu3 }
 0xf2b   :  { %v1987_v3 = vpop.f32.mrf.mxu2  ;;  %v2016_v32 = vpop.f32.mrf.mxu3 }
 0xf2c   :  { %2021 = vrot.lane.b32.xlu0 %v1987_v3, %s4634_s25 }
 0xf33   :  { %v1989_v35 = vpop.f32.mrf.mxu2 }
 0xf34   :  { %2031 = vrot.lane.b32.xlu0 %v2014_v55, %s4634_s25  ;;  %2023 = vrot.lane.b32.xlu1 %v1989_v35, %s4634_s25  ;;  %v2202_v10 = vpop.f32.mrf.mxu3  ;;  %v3206_v55 = vld [vmem:[%s4574_s16 + $0x10] sm:$0xff] }
 0xf35   :  { %2591 = vmatpush.bf16.msrb.mxu1 %v3206_v55 }
 0xf3c   :  { %v2204_v26 = vpop.f32.mrf.mxu3 }
 0xf40   :  { %v2175_v9 = vpop.f32.mrf.mxu2 }
 0xf41   :  { %2209 = vrot.lane.b32.xlu2 %v2175_v9, %s4635_s1 }
 0xf48   :  { %v2177_v52 = vpop.f32.mrf.mxu2 }
 0xf49   :  { %2211 = vrot.lane.b32.xlu0 %v2177_v52, %s4635_s1  ;;  %2219 = vrot.lane.b32.xlu2 %v2202_v10, %s4635_s1 }
 0xf72   :  { %v2390_v14 = vpop.f32.mrf.mxu3 }
 0xf73   :  { %2407 = vrot.lane.b32.xlu2 %v2390_v14, %s4636_s2 }
 0xf76   :  { %v2363_v27 = vpop.f32.mrf.mxu2 }
 0xf77   :  { %2397 = vrot.lane.b32.xlu0 %v2363_v27, %s4636_s2 }
 0xf7a   :  { %v2392_v22 = vpop.f32.mrf.mxu3 }
 0xf7b   :  { %2409 = vrot.lane.b32.xlu2 %v2392_v22, %s4636_s2 }
 0xf7e   :  { %v2365_v29 = vpop.f32.mrf.mxu2 }
 0xf7f   :  { %2033 = vrot.lane.b32.xlu0 %v2016_v32, %s4634_s25  ;;  %2399 = vrot.lane.b32.xlu1 %v2365_v29, %s4636_s2 }
 0xf87   :  { %2221 = vrot.lane.b32.xlu1 %v2204_v26, %s4635_s1 }
 0xf9b   :  { %v2210_v12 = vpop.permute.xlu2 %2209 }
 0xf9e   :  { %v2022_v43 = vpop.permute.xlu0 %2021 }
 0xf9f   :  { %2027 = vst.msk [vmem:[#allocation4] sm:$0xff] %vm853_vm8, %v2022_v43 }
 0xfa0   :  { %2215 = vst.msk [vmem:[#allocation4] sm:$0xff] %vm4637_vm15, %v2210_v12 }
 0xfa3   :  { %v2220_v17 = vpop.permute.xlu2 %2219 }
 0xfa6   :  { %v2024_v19 = vpop.permute.xlu1 %2023  ;;  %v2032_v54 = vpop.permute.xlu0 %2031 }
 0xfa7   :  { %2028 = vst.msk [vmem:[#allocation4 + $0x8] sm:$0xf] %vm4638_vm0, %v2024_v19 }
 0xfa8   :  { %2037 = vst.msk [vmem:[#allocation4 + $0xc] sm:$0xff] %vm853_vm8, %v2032_v54  ;;  %vm4645_vm8 = vmmov %vm4640_vm3 }
 0xfa9   :  { %2225 = vst.msk [vmem:[#allocation4 + $0xc] sm:$0xff] %vm4639_vm1, %v2220_v17 }
 0xfbb   :  { %v2212_v21 = vpop.permute.xlu0 %2211 }
 0xfbc   :  { %2216 = vst.msk [vmem:[#allocation4 + $0x8] sm:$0xf] %vm4640_vm3, %v2212_v21 }
 0xfcd   :  { %v2408_v1 = vpop.permute.xlu2 %2407 }
 0xfce   :  { %2413 = vst.msk [vmem:[#allocation4 + $0xc] sm:$0xff] %vm4641_vm4, %v2408_v1 }
 0xfd5   :  { %v2410_v37 = vpop.permute.xlu2 %2409 }
 0xfe9   :  { %v2398_v8 = vpop.permute.xlu0 %2397 }
 0xfea   :  { %2403 = vst.msk [vmem:[#allocation4] sm:$0xff] %vm4642_vm9, %v2398_v8  ;;  %v3254_v8 = vld [vmem:[%s4572_s14 + $0x1] ss:$0 sm:$0xff] }
 0xff1   :  { %v2400_v11 = vpop.permute.xlu1 %2399  ;;  %v2034_v33 = vpop.permute.xlu0 %2033  ;;  %v2415_v48 = vld [vmem:[#allocation4] sm:$0xff] }
 0xff2   :  { %2404 = vst.msk [vmem:[#allocation4 + $0x8] sm:$0xf] %vm4643_vm12, %v2400_v11 }
 0xff3   :  { %2038 = vst.msk [vmem:[#allocation4 + $0x14] sm:$0xf] %vm4644_vm6, %v2034_v33 }
 0xff9   :  { %v2222_v25 = vpop.permute.xlu1 %2221  ;;  %v2416_v7 = vld [vmem:[#allocation4 + $0x8] sm:$0xff] }
 0xffa   :  { %2226 = vst.msk [vmem:[#allocation4 + $0x14] sm:$0xf] %vm4645_vm8, %v2222_v25  ;;  %v2423_v39 = vpack.c.bf16 %v2416_v7, %v2415_v48 }
 0xffb   :  { %2414 = vst.msk [vmem:[#allocation4 + $0x14] sm:$0xf] %vm4646_vm14, %v2410_v37  ;;  %v3255_v37 = vld [vmem:[%s4573_s15 + $0x1] ss:$0 sm:$0xff] }
 0xffc   :  { %3092 = vmatmul.msk.bf16.vlgmr.msra.gmra.mxu0 %vm79_vm2, %v2423_v39 }
0x1002   :  { %v2417_v30 = vld [vmem:[#allocation4 + $0x10] sm:$0xff] }
0x1003   :  { %v2424_v38 = vpack.c.bf16 %v2417_v30, %v2417_v30 }
0x100c   :  { %3093 = vmatmul.msk.bf16.gmra.mxu0 %vm79_vm2, %v2424_v38 }
0x1079   :  { %v2452_v45 = vpop.f32.mrf.mxu0 }
0x107a   :  { %v2461_v13 = vadd.f32 %v2452_v45, %v4118_v47 }
0x107c   :  { %v4455_v46 = vadd.f32 %v3253_v44, %v2461_v13 }
0x107e   :  { %v2476_v4 = vsel %vm79_vm2, %v4455_v46, 0.0 }
0x107f   :  { %2477 = vadd.xlane.f32.xlu0 %v2476_v4 }
0x1081   :  { %v2454_v6 = vpop.f32.mrf.mxu0 }
0x1082   :  { %v2462_v5 = vadd.f32 %v2454_v6, %v4123_v31 }
0x1084   :  { %v4460_v49 = vadd.f32 %v3253_v44, %v2462_v5 }
0x1086   :  { %v2479_v50 = vsel %vm79_vm2, %v4460_v49, 0.0 }
0x1087   :  { %2480 = vadd.xlane.f32.xlu1 %v2479_v50 }
0x1089   :  { %v2457_v15 = vpop.f32.mrf.mxu0 }
0x108a   :  { %v2463_v53 = vadd.f32 %v2457_v15, %v4128_v42 }
0x108c   :  { %v4465_v56 = vadd.f32 %v3253_v44, %v2463_v53 }
0x108e   :  { %v2482_v47 = vsel %vm79_vm2, %v4465_v56, 0.0 }
0x108f   :  { %2483 = vadd.xlane.f32.xlu2 %v2482_v47 }
0x1091   :  { %v2459_v63 = vpop.f32.mrf.mxu0 }
0x10f2   :  { %v2478_v57 = vpop.xlane.xlu0 %2477 }
0x10f3   :  { %v2485_v51 = vmul.f32 %v2478_v57, %v3693_v58  ;;  %v3215_v57 = vld [vmem:[%s4576_s18 + $0x78] sm:$0xff] }
0x10f4   :  { %2696 = vmatpush.bf16.msra.mxu2 %v3215_v57 }
0x10f5   :  { %v2488_v31 = vsub.f32 %v4455_v46, %v2485_v51  ;;  %v3214_v51 = vld [vmem:[%s4576_s18 + $0x70] sm:$0xff] }
0x10f7   :  { %v2491_v36 = vmul.f32 %v2488_v31, %v2488_v31 }
0x10f8   :  { %2697 = vmatpush.bf16.msra.mxu2 %v3214_v51 }
0x10f9   :  { %v2494_v0 = vsel %vm79_vm2, %v2491_v36, 0.0  ;;  %v3212_v36 = vld [vmem:[%s4576_s18 + $0x60] sm:$0xff] }
0x10fa   :  { %v2481_v28 = vpop.xlane.xlu1 %2480  ;;  %2495 = vadd.xlane.f32.xlu0 %v2494_v0  ;;  %v3211_v0 = vld [vmem:[%s4576_s18 + $0x58] sm:$0xff] }
0x10fb   :  { %v2486_v16 = vmul.f32 %v2481_v28, %v3693_v58  ;;  %v3210_v28 = vld [vmem:[%s4576_s18 + $0x50] sm:$0xff] }
0x10fd   :  { %v2489_v42 = vsub.f32 %v4460_v49, %v2486_v16  ;;  %v3209_v16 = vld [vmem:[%s4576_s18 + $0x48] sm:$0xff] }
0x10ff   :  { %v2492_v59 = vmul.f32 %v2489_v42, %v2489_v42 }
0x1101   :  { %v2497_v60 = vsel %vm79_vm2, %v2492_v59, 0.0  ;;  %v3256_v59 = vld [vmem:[%s4627_s29 + $0x1] ss:$0 sm:$0xff] }
0x1102   :  { %2498 = vadd.xlane.f32.xlu1 %v2497_v60  ;;  %v2484_v61 = vpop.xlane.xlu2 %2483 }
0x1103   :  { %v2487_v24 = vmul.f32 %v2484_v61, %v3693_v58 }
0x1105   :  { %v2490_v41 = vsub.f32 %v4465_v56, %v2487_v24 }
0x1107   :  { %v2493_v18 = vmul.f32 %v2490_v41, %v2490_v41 }
0x1109   :  { %v2500_v23 = vsel %vm79_vm2, %v2493_v18, 0.0 }
0x110a   :  { %2501 = vadd.xlane.f32.xlu2 %v2500_v23 }
0x116d   :  { %v2496_v62 = vpop.xlane.xlu0 %2495 }
0x116e   :  { %v2503_v34 = vmul.f32 %v2496_v62, %v3693_v58 }
0x1170   :  { %v2506_v3 = vadd.f32 1e-05, %v2503_v34 }
0x1172   :  { %3416 = vrsqrt.f32 %v2506_v3  ;;  %vm2515_vm7 = vweird.f32 %v2506_v3 }
0x1175   :  { %v2499_v35 = vpop.xlane.xlu1 %2498 }
0x1176   :  { %v2504_v32 = vmul.f32 %v2499_v35, %v3693_v58 }
0x1178   :  { %v3417_v9 = vpop.eup %3416  ;;  %v2507_v10 = vadd.f32 1e-05, %v2504_v32 }
0x1179   :  { %v2510_v52 = vmul.f32 %v3417_v9, %v2506_v3  ;;  %vm2516_vm5 = vweird.f32 %v3417_v9 }
0x117a   :  { %3418 = vrsqrt.f32 %v2507_v10  ;;  %vm2517_vm10 = vmor %vm2515_vm7, %vm2516_vm5  ;;  %vm2525_vm13 = vweird.f32 %v2507_v10 }
0x117b   :  { %v2511_v26 = vmul.f32 %v3417_v9, %v2510_v52 }
0x117d   :  { %v2512_v14 = vmul.f32 0.5, %v2511_v26  ;;  %v2502_v27 = vpop.xlane.xlu2 %2501 }
0x117e   :  { %v2505_v22 = vmul.f32 %v2502_v27, %v3693_v58 }
0x117f   :  { %v2513_v29 = vsub.f32 1.5, %v2512_v14 }
0x1180   :  { %v3419_v12 = vpop.eup %3418  ;;  %v2508_v43 = vadd.f32 1e-05, %v2505_v22 }
0x1181   :  { %v2514_v19 = vmul.f32 %v3417_v9, %v2513_v29  ;;  %v2520_v54 = vmul.f32 %v3419_v12, %v2507_v10  ;;  %vm2526_vm11 = vweird.f32 %v3419_v12 }
0x1182   :  { %3420 = vrsqrt.f32 %v2508_v43  ;;  %vm2527_vm15 = vmor %vm2525_vm13, %vm2526_vm11  ;;  %vm2535_vm1 = vweird.f32 %v2508_v43 }
0x1183   :  { %v2521_v17 = vmul.f32 %v3419_v12, %v2520_v54  ;;  %v2518_v21 = vsel %vm2517_vm10, %v3417_v9, %v2514_v19 }
0x1184   :  { %v2539_v11 = vmul.f32 %v2518_v21, %v2488_v31  ;;  %v3213_v31 = vld [vmem:[%s4576_s18 + $0x68] sm:$0xff] }
0x1185   :  { %v2522_v1 = vmul.f32 0.5, %v2521_v17  ;;  %2698 = vmatpush.bf16.msra.mxu2 %v3213_v31 }
0x1186   :  { %v2545_v39 = vmul.f32 %v3254_v8, %v2539_v11 }
0x1187   :  { %v2523_v20 = vsub.f32 1.5, %v2522_v1 }
0x1188   :  { %v3421_v40 = vpop.eup %3420  ;;  %v2551_v13 = vadd.f32 %v3255_v37, %v2545_v39 }
0x1189   :  { %v2524_v33 = vmul.f32 %v3419_v12, %v2523_v20  ;;  %v2530_v25 = vmul.f32 %v3421_v40, %v2508_v43  ;;  %vm2536_vm0 = vweird.f32 %v3421_v40  ;;  %2699 = vmatpush.bf16.msra.mxu2 %v3212_v36 }
0x118a   :  { %vm2537_vm3 = vmor %vm2535_vm1, %vm2536_vm0 }
0x118b   :  { %v2528_v48 = vsel %vm2527_vm15, %v3419_v12, %v2524_v33  ;;  %v2531_v7 = vmul.f32 %v3421_v40, %v2530_v25 }
0x118c   :  { %v2540_v30 = vmul.f32 %v2528_v48, %v2489_v42  ;;  %v3208_v42 = vld [vmem:[%s4576_s18 + $0x40] sm:$0xff] }
0x118d   :  { %v2532_v38 = vmul.f32 0.5, %v2531_v7  ;;  %2700 = vmatpush.bf16.msra.mxu2 %v3211_v0 }
0x118e   :  { %v2546_v44 = vmul.f32 %v3254_v8, %v2540_v30 }
0x118f   :  { %v2533_v45 = vsub.f32 1.5, %v2532_v38 }
0x1190   :  { %v2552_v4 = vadd.f32 %v3255_v37, %v2546_v44 }
0x1191   :  { %v2534_v6 = vmul.f32 %v3421_v40, %v2533_v45  ;;  %2701 = vmatpush.bf16.msra.mxu2 %v3210_v28 }
0x1192   :  { %v2559_v5 = vpack.c.bf16 %v2552_v4, %v2551_v13 }
0x1193   :  { %v2538_v50 = vsel %vm2537_vm3, %v3421_v40, %v2534_v6 }
0x1194   :  { %3110 = vmatmul.msk.bf16.vlgmr.msrb.gmra.mxu1 %vm79_vm2, %v2559_v5  ;;  %v2541_v15 = vmul.f32 %v2538_v50, %v2490_v41 }
0x1195   :  { %2702 = vmatpush.bf16.msra.mxu2 %v3209_v16 }
0x1196   :  { %v2547_v53 = vmul.f32 %v3254_v8, %v2541_v15 }
0x1198   :  { %v2553_v47 = vadd.f32 %v3255_v37, %v2547_v53  ;;  %v3257_v37 = vld [vmem:[%s4577_s19 + $0x1] ss:$0 sm:$0xff] }
0x1199   :  { %2703 = vmatpush.bf16.msra.mxu2 %v3208_v42 }
0x119a   :  { %v2560_v63 = vpack.c.bf16 %v2553_v47, %v2553_v47 }
0x11a4   :  { %3111 = vmatmul.msk.bf16.gmra.mxu1 %vm79_vm2, %v2560_v63 }
0x1211   :  { %v2593_v60 = vpop.f32.mrf.mxu1 }
0x1212   :  { %v2594_v61 = vadd.f32 %v3256_v59, %v2593_v60 }
0x1214   :  { %v2605_v24 = vmul.f32 0.044715, %v2594_v61  ;;  %v2602_v17 = vmul.f32 0.5, %v2594_v61 }
0x1216   :  { %v2608_v41 = vmul.f32 %v2605_v24, %v2594_v61  ;;  %v3217_v24 = vld [vmem:[%s4580_s22 + $0x8] sm:$0xff] }
0x1217   :  { %2835 = vmatpush.bf16.msrb.mxu3 %v3217_v24 }
0x1218   :  { %v2611_v18 = vmul.f32 %v2608_v41, %v2594_v61 }
0x1219   :  { %v2595_v23 = vpop.f32.mrf.mxu1 }
0x121a   :  { %v2614_v2 = vadd.f32 %v2611_v18, %v2594_v61  ;;  %v2596_v62 = vadd.f32 %v3256_v59, %v2595_v23 }
0x121c   :  { %v2606_v34 = vmul.f32 0.044715, %v2596_v62  ;;  %v2617_v3 = vmul.f32 0.7978846, %v2614_v2  ;;  %v2603_v21 = vmul.f32 0.5, %v2596_v62  ;;  %v3216_v2 = vld [vmem:[%s4580_s22] sm:$0xff] }
0x121d   :  { %2836 = vmatpush.bf16.msrb.mxu3 %v3216_v2 }
0x121e   :  { %v2609_v55 = vmul.f32 %v2606_v34, %v2596_v62  ;;  %3422 = vtanh.f32 %v2617_v3 }
0x1220   :  { %v2612_v35 = vmul.f32 %v2609_v55, %v2596_v62 }
0x1221   :  { %v2598_v32 = vpop.f32.mrf.mxu1 }
0x1222   :  { %v2615_v9 = vadd.f32 %v2612_v35, %v2596_v62  ;;  %v2599_v10 = vadd.f32 %v3256_v59, %v2598_v32 }
0x1224   :  { %v2618_v52 = vmul.f32 0.7978846, %v2615_v9  ;;  %v2607_v26 = vmul.f32 0.044715, %v2599_v10  ;;  %v3423_v27 = vpop.eup %3422  ;;  %v2604_v25 = vmul.f32 0.5, %v2599_v10 }
0x1225   :  { %v2623_v43 = vadd.f32 1.0, %v3423_v27 }
0x1226   :  { %v2610_v14 = vmul.f32 %v2607_v26, %v2599_v10  ;;  %3424 = vtanh.f32 %v2618_v52 }
0x1227   :  { %v2626_v20 = vmul.f32 %v2623_v43, %v2602_v17 }
0x1228   :  { %v2613_v22 = vmul.f32 %v2610_v14, %v2599_v10 }
0x1229   :  { %v2600_v29 = vpop.f32.mrf.mxu1 }
0x122a   :  { %v2616_v12 = vadd.f32 %v2613_v22, %v2599_v10 }
0x122c   :  { %v3425_v19 = vpop.eup %3424  ;;  %v2619_v54 = vmul.f32 0.7978846, %v2616_v12 }
0x122d   :  { %v2624_v1 = vadd.f32 1.0, %v3425_v19 }
0x122e   :  { %3426 = vtanh.f32 %v2619_v54 }
0x122f   :  { %v2627_v40 = vmul.f32 %v2624_v1, %v2603_v21  ;;  %v3258_v21 = vld [vmem:[%s4578_s20] ss:$0 sm:$0xff]  ;;  %s3480_s20 = smov [#allocation5]  }
0x1231   :  { %v2646_v8 = vpack.c.bf16 %v2627_v40, %v2626_v20 }
0x1233   :  { %2704 = vmatmul.bf16.vlgmr.msra.gmra.mxu2 %v2646_v8 }
0x1234   :  { %v3427_v11 = vpop.eup %3426 }
0x1235   :  { %v2625_v33 = vadd.f32 1.0, %v3427_v11  ;;  %v3259_v11 = vld [vmem:[%s4579_s21] ss:$0 sm:$0xff]  ;;  %s2854_s21 = sshll.u32 %s3480_s20, 4  ;;  %s2855_s21 = int_to_ptr.vmem [resolvable:$true] %s2854_s21 }
0x1237   :  { %v2628_v48 = vmul.f32 %v2625_v33, %v2604_v25 }
0x1239   :  { %v2647_v7 = vpack.c.bf16 %v2628_v48, %v2628_v48 }
0x1243   :  { %2709 = vmatmul.bf16.gmra.mxu2 %v2647_v7 }
0x12b6   :  { %v2705_v39 = vpop.f32.mrf.mxu2 }
0x12b7   :  { %v2714_v30 = vadd.f32 %v2705_v39, %v4455_v46 }
0x12b9   :  { %v2722_v38 = vadd.f32 %v3257_v37, %v2714_v30 }
0x12bb   :  { %v2727_v44 = vsel %vm79_vm2, %v2722_v38, 0.0 }
0x12bc   :  { %2728 = vadd.xlane.f32.xlu0 %v2727_v44 }
0x12be   :  { %v2707_v45 = vpop.f32.mrf.mxu2 }
0x12bf   :  { %v2715_v13 = vadd.f32 %v2707_v45, %v4460_v49 }
0x12c1   :  { %v2723_v4 = vadd.f32 %v3257_v37, %v2715_v13 }
0x12c3   :  { %v2730_v6 = vsel %vm79_vm2, %v2723_v4, 0.0 }
0x12c4   :  { %2731 = vadd.xlane.f32.xlu1 %v2730_v6 }
0x12c6   :  { %v2710_v5 = vpop.f32.mrf.mxu2 }
0x12c7   :  { %v2716_v50 = vadd.f32 %v2710_v5, %v4465_v56 }
0x12c9   :  { %v2724_v15 = vadd.f32 %v3257_v37, %v2716_v50 }
0x12cb   :  { %v2733_v53 = vsel %vm79_vm2, %v2724_v15, 0.0 }
0x12cc   :  { %2734 = vadd.xlane.f32.xlu2 %v2733_v53 }
0x12ce   :  { %v2712_v47 = vpop.f32.mrf.mxu2 }
0x132f   :  { %v2729_v46 = vpop.xlane.xlu0 %2728 }
0x1330   :  { %v2736_v63 = vmul.f32 %v2729_v46, %v3693_v58 }
0x1332   :  { %v2739_v57 = vsub.f32 %v2722_v38, %v2736_v63 }
0x1334   :  { %v2742_v51 = vmul.f32 %v2739_v57, %v2739_v57 }
0x1336   :  { %v2745_v31 = vsel %vm79_vm2, %v2742_v51, 0.0 }
0x1337   :  { %2746 = vadd.xlane.f32.xlu0 %v2745_v31  ;;  %v2732_v49 = vpop.xlane.xlu1 %2731 }
0x1338   :  { %v2737_v36 = vmul.f32 %v2732_v49, %v3693_v58 }
0x133a   :  { %v2740_v0 = vsub.f32 %v2723_v4, %v2737_v36 }
0x133c   :  { %v2743_v28 = vmul.f32 %v2740_v0, %v2740_v0 }
0x133e   :  { %v2748_v56 = vsel %vm79_vm2, %v2743_v28, 0.0 }
0x133f   :  { %2749 = vadd.xlane.f32.xlu1 %v2748_v56  ;;  %v2735_v16 = vpop.xlane.xlu2 %2734 }
0x1340   :  { %v2738_v42 = vmul.f32 %v2735_v16, %v3693_v58 }
0x1342   :  { %v2741_v59 = vsub.f32 %v2724_v15, %v2738_v42 }
0x1344   :  { %v2744_v60 = vmul.f32 %v2741_v59, %v2741_v59 }
0x1346   :  { %v2751_v61 = vsel %vm79_vm2, %v2744_v60, 0.0 }
0x1347   :  { %2752 = vadd.xlane.f32.xlu2 %v2751_v61 }
0x13aa   :  { %v2747_v41 = vpop.xlane.xlu0 %2746 }
0x13ab   :  { %v2754_v18 = vmul.f32 %v2747_v41, %v3693_v58 }
0x13ad   :  { %v2757_v23 = vadd.f32 1e-05, %v2754_v18 }
0x13af   :  { %3428 = vrsqrt.f32 %v2757_v23  ;;  %vm2766_vm9 = vweird.f32 %v2757_v23 }
0x13b2   :  { %v2750_v62 = vpop.xlane.xlu1 %2749 }
0x13b3   :  { %v2755_v34 = vmul.f32 %v2750_v62, %v3693_v58 }
0x13b5   :  { %v3429_v3 = vpop.eup %3428  ;;  %v2758_v55 = vadd.f32 1e-05, %v2755_v34 }
0x13b6   :  { %v2761_v35 = vmul.f32 %v3429_v3, %v2757_v23  ;;  %vm2767_vm4 = vweird.f32 %v3429_v3 }
0x13b7   :  { %3430 = vrsqrt.f32 %v2758_v55  ;;  %vm2768_vm12 = vmor %vm2766_vm9, %vm2767_vm4  ;;  %vm2776_vm8 = vweird.f32 %v2758_v55 }
0x13b8   :  { %v2762_v32 = vmul.f32 %v3429_v3, %v2761_v35 }
0x13ba   :  { %v2763_v9 = vmul.f32 0.5, %v2762_v32  ;;  %v2753_v10 = vpop.xlane.xlu2 %2752 }
0x13bb   :  { %v2756_v52 = vmul.f32 %v2753_v10, %v3693_v58 }
0x13bc   :  { %v2764_v26 = vsub.f32 1.5, %v2763_v9 }
0x13bd   :  { %v3431_v14 = vpop.eup %3430  ;;  %v2759_v27 = vadd.f32 1e-05, %v2756_v52 }
0x13be   :  { %v2765_v22 = vmul.f32 %v3429_v3, %v2764_v26  ;;  %v2771_v29 = vmul.f32 %v3431_v14, %v2758_v55  ;;  %vm2777_vm6 = vweird.f32 %v3431_v14 }
0x13bf   :  { %3432 = vrsqrt.f32 %v2759_v27  ;;  %vm2778_vm14 = vmor %vm2776_vm8, %vm2777_vm6  ;;  %vm2786_vm7 = vweird.f32 %v2759_v27 }
0x13c0   :  { %v2772_v12 = vmul.f32 %v3431_v14, %v2771_v29  ;;  %v2769_v43 = vsel %vm2768_vm12, %v3429_v3, %v2765_v22 }
0x13c1   :  { %v2790_v58 = vmul.f32 %v2769_v43, %v2739_v57 }
0x13c2   :  { %v2773_v19 = vmul.f32 0.5, %v2772_v12 }
0x13c3   :  { %v2796_v33 = vmul.f32 %v3258_v21, %v2790_v58 }
0x13c4   :  { %v2774_v54 = vsub.f32 1.5, %v2773_v19 }
0x13c5   :  { %v3433_v17 = vpop.eup %3432  ;;  %v2802_v39 = vadd.f32 %v3259_v11, %v2796_v33 }
0x13c6   :  { %v2775_v1 = vmul.f32 %v3431_v14, %v2774_v54  ;;  %v2781_v20 = vmul.f32 %v3433_v17, %v2759_v27  ;;  %vm2787_vm5 = vweird.f32 %v3433_v17 }
0x13c7   :  { %vm2788_vm10 = vmor %vm2786_vm7, %vm2787_vm5 }
0x13c8   :  { %v2779_v40 = vsel %vm2778_vm14, %v3431_v14, %v2775_v1  ;;  %v2782_v8 = vmul.f32 %v3433_v17, %v2781_v20 }
0x13c9   :  { %v2791_v25 = vmul.f32 %v2779_v40, %v2740_v0 }
0x13ca   :  { %v2783_v48 = vmul.f32 0.5, %v2782_v8 }
0x13cb   :  { %v2797_v7 = vmul.f32 %v3258_v21, %v2791_v25 }
0x13cc   :  { %v2784_v37 = vsub.f32 1.5, %v2783_v48 }
0x13cd   :  { %v2803_v30 = vadd.f32 %v3259_v11, %v2797_v7 }
0x13ce   :  { %v2785_v38 = vmul.f32 %v3433_v17, %v2784_v37 }
0x13cf   :  { %v2809_v44 = vpack.c.bf16 %v2803_v30, %v2802_v39 }
0x13d0   :  { %v2789_v45 = vsel %vm2788_vm10, %v3433_v17, %v2785_v38 }
0x13d1   :  { %3169 = vmatmul.msk.bf16.vlgmr.msrb.gmra.mxu3 %vm79_vm2, %v2809_v44  ;;  %v2792_v13 = vmul.f32 %v2789_v45, %v2741_v59 }
0x13d3   :  { %v2798_v4 = vmul.f32 %v3258_v21, %v2792_v13 }
0x13d5   :  { %v2804_v6 = vadd.f32 %v3259_v11, %v2798_v4 }
0x13d7   :  { %v2810_v5 = vpack.c.bf16 %v2804_v6, %v2804_v6 }
0x13e1   :  { %3170 = vmatmul.msk.bf16.gmra.mxu3 %vm79_vm2, %v2810_v5 }
0x1454   :  { %v2838_v50 = vpop.f32.mrf.mxu3 }
0x1455   :  { %2847 = vst [vmem:[#allocation5] sm:$0xff] %v2838_v50 }
0x145c   :  { %v2840_v15 = vpop.f32.mrf.mxu3 }
0x145d   :  { %2848 = vst [vmem:[#allocation5 + $0x8] sm:$0xff] %v2840_v15 }
0x1464   :  { %v2843_v53 = vpop.f32.mrf.mxu3 }
0x1465   :  { %2849 = vst [vmem:[#allocation5 + $0x10] sm:$0xff] %v2843_v53 }
0x1466   :  { %2862 = dma.vmem_to_hbm [thread:$0]  %s2855_s21, 384, %s2857_s28, [#allocation6], %s3481_s17, %s3481_s17, %s4634_s25  }
0x146c   :  { %v2845_v47 = vpop.f32.mrf.mxu3 }
0x146d   :  { %3461 = dma.done.wait [#allocation6], 384  }
0x146e   :  { %3462 = vsyncadd [#allocation6], 4294966912 }
0x146f   :  { %2867 = vsyncpa [#allocation6], 1 }

</bundles_post_ra>
